<compile_context>
chip_gen: v5e
topology: v5e:2x2
jax: 0.10.0
libtpu: 0.0.40
codegen_flags: <defaults>
</compile_context>

<pallas_src>
import jax
import jax.numpy as jnp
from jax.experimental import pallas as pl
from jax.experimental.pallas import tpu as pltpu

NUM_EXPERTS = 16
TWO_E = 2 * NUM_EXPERTS            # 32 experts total (gender 0..15, race 16..31)
NUM_PAIRS = TWO_E // 2             # 16 paired layer-2 matmuls
H1, H2 = 128, 64                   # ExpertNetwork hidden dims (128, 128 // 2)
R1, R2 = 64, 32                    # router hidden dims
BN_EPS = 1e-5
OUT_W = 128                        # packed, lane-dense output width
_BP_OFF = TWO_E                    # lanes [32, 34) = branch preds (gender, race)
_FIN_OFF = TWO_E + 2               # lane 34 = final pred

# pl.reciprocal(approx=True) -> routing weights sum to 1 only to ~1e-3/1e-4 rel.
# error (EUP approximate reciprocal).  Set False for exact softmax division.
APPROX_SOFTMAX_RECIP = True


# ----------------------------------------------------------------------------
# Pallas kernel: both branches (fused routers + 32 experts) + branch mixing.
# ----------------------------------------------------------------------------
def _moe_kernel(x_ref, w1_ref, b1_ref, w2_ref, b2_ref, w3_ref, b3_ref,
                wr2_ref, br2_ref, wr3_ref, br3_ref, bw_ref,
                out_ref, h2_scr):
    tb = x_ref.shape[0]

    # ---- fused layer 1: 32 experts + both routers in ONE bf16 matmul ---------
    h1 = jnp.dot(x_ref[...], w1_ref[...], preferred_element_type=jnp.float32)
    h1 = jnp.maximum(h1 + b1_ref[...], 0.0).astype(jnp.bfloat16)        # (TB, 4224)

    # ---- expert layer 2: 16 paired block-diagonal (256,128) matmuls ----------
    # bias + ReLU fused into each lane-aligned 128-wide store (no slab re-pass).
    for p in range(NUM_PAIRS):
        h1_p = h1[:, 2 * p * H1:(2 * p + 2) * H1]                       # (TB, 256) bf16
        acc = jnp.dot(h1_p, w2_ref[p], preferred_element_type=jnp.float32)
        acc = jnp.maximum(acc + b2_ref[:, 2 * p * H2:(2 * p + 2) * H2], 0.0)
        h2_scr[:, 2 * p * H2:(2 * p + 2) * H2] = acc.astype(jnp.bfloat16)

    # ---- expert layer 3: all 32 heads via one block-structured matmul --------
    raw = jnp.dot(h2_scr[...], w3_ref[...],
                  preferred_element_type=jnp.float32) + b3_ref[...]
    eouts = jax.nn.sigmoid(raw)                 # (TB, 32) f32: [:16] gender, [16:] race

    # ---- routers: both branches fused with block-diagonal weights ------------
    hr = h1[:, TWO_E * H1:]                                             # (TB, 128) bf16
    hr2 = jnp.dot(hr, wr2_ref[...], preferred_element_type=jnp.float32)
    hr2 = jnp.maximum(hr2 + br2_ref[...], 0.0).astype(jnp.bfloat16)     # (TB, 64)
    logits = jnp.dot(hr2, wr3_ref[...],
                     preferred_element_type=jnp.float32) + br3_ref[...]  # (TB, 32) f32

    def _softmax(l):
        l = l - jnp.max(l, axis=-1, keepdims=True)
        el = jnp.exp(l)
        s = jnp.sum(el, axis=-1, keepdims=True)
        if APPROX_SOFTMAX_RECIP:
            return el * pl.reciprocal(s, approx=True)
        return el / s

    rout_g = _softmax(logits[:, :NUM_EXPERTS])                          # (TB, 16)
    rout_r = _softmax(logits[:, NUM_EXPERTS:])                          # (TB, 16)

    # ---- mixture-of-experts + branch mixing ----------------------------------
    bp_g = jnp.sum(rout_g * eouts[:, :NUM_EXPERTS], axis=-1, keepdims=True)   # (TB, 1)
    bp_r = jnp.sum(rout_r * eouts[:, NUM_EXPERTS:], axis=-1, keepdims=True)   # (TB, 1)
    final = bp_g * bw_ref[0] + bp_r * bw_ref[1]          # branch weights = SMEM scalars

    # ---- single lane-dense packed store ---------------------------------------
    pad = jnp.zeros((tb, OUT_W - (TWO_E + 3)), jnp.float32)
    out_ref[...] = jnp.concatenate([eouts, bp_g, bp_r, final, pad], axis=-1)


# ----------------------------------------------------------------------------
# Deterministic parameter initialization (shapes from the module's __init__).
# ----------------------------------------------------------------------------
def _xavier_uniform(key, shape, gain):
    fan_in, fan_out = shape
    bound = gain * (6.0 / (fan_in + fan_out)) ** 0.5
    return jax.random.uniform(key, shape, jnp.float32, -bound, bound)


def _torch_linear_default_w(key, shape):
    bound = 1.0 / shape[0] ** 0.5
    return jax.random.uniform(key, shape, jnp.float32, -bound, bound)


def _torch_linear_default_b(key, fan_in, out):
    bound = 1.0 / fan_in ** 0.5
    return jax.random.uniform(key, (out,), jnp.float32, -bound, bound)


def _make_branch_params(key, input_dim):
    ks = jax.random.split(key, NUM_EXPERTS * 3 + 6)
    # Experts: xavier_uniform(gain=2.0), biases = 0.1 (as in ExpertNetwork.__init__)
    ew1 = jnp.stack([_xavier_uniform(ks[3 * e + 0], (input_dim, H1), 2.0) for e in range(NUM_EXPERTS)])
    ew2 = jnp.stack([_xavier_uniform(ks[3 * e + 1], (H1, H2), 2.0) for e in range(NUM_EXPERTS)])
    ew3 = jnp.stack([_xavier_uniform(ks[3 * e + 2], (H2, 1), 2.0)[:, 0] for e in range(NUM_EXPERTS)])
    eb1 = jnp.full((NUM_EXPERTS, H1), 0.1, jnp.float32)
    eb2 = jnp.full((NUM_EXPERTS, H2), 0.1, jnp.float32)
    eb3 = jnp.full((NUM_EXPERTS,), 0.1, jnp.float32)
    # Router: PyTorch default Linear init
    r = ks[NUM_EXPERTS * 3:]
    rw1 = _torch_linear_default_w(r[0], (input_dim, R1))
    rb1 = _torch_linear_default_b(r[1], input_dim, R1)
    rw2 = _torch_linear_default_w(r[2], (R1, R2))
    rb2 = _torch_linear_default_b(r[3], R1, R2)
    rw3 = _torch_linear_default_w(r[4], (R2, NUM_EXPERTS))
    rb3 = _torch_linear_default_b(r[5], R2, NUM_EXPERTS)
    # Fold eval-mode BatchNorm1d (mean=0, var=1, gamma=1, beta=0, eps=1e-5) into
    # the first Linear of every sub-network: BN(x) = x / sqrt(1 + eps).
    bn_scale = 1.0 / (1.0 + BN_EPS) ** 0.5
    ew1 = ew1 * bn_scale
    rw1 = rw1 * bn_scale
    return dict(ew1=ew1, eb1=eb1, ew2=ew2, eb2=eb2, ew3=ew3, eb3=eb3,
                rw1=rw1, rb1=rb1, rw2=rw2, rb2=rb2, rw3=rw3, rb3=rb3)


def init_params(key, input_dim):
    kg, kr = jax.random.split(key)
    g = _make_branch_params(kg, input_dim)
    r = _make_branch_params(kr, input_dim)
    stacked = {name: jnp.stack([g[name], r[name]]) for name in g}     # leading dim 2 = (gender, race)
    stacked["branch_weights"] = jnp.array([0.5, 0.5], jnp.float32)    # nn.Parameter(torch.tensor([0.5, 0.5]))
    return stacked


# ----------------------------------------------------------------------------
# Pack weights into kernel-friendly lane-dense slabs (done ONCE, outside kernel).
# Weight slabs are bf16 (MXU operands); biases stay f32 (VPU math).
# ----------------------------------------------------------------------------
def pack_params(params):
    ew1 = params["ew1"]                                  # (2, 16, D, 128)
    D = ew1.shape[2]
    e1 = ew1.reshape(TWO_E, D, H1)
    w1_exp = jnp.transpose(e1, (1, 0, 2)).reshape(D, TWO_E * H1)         # (D, 4096)
    w1_rt = jnp.transpose(params["rw1"], (1, 0, 2)).reshape(D, 2 * R1)   # (D, 128)
    w1 = jnp.concatenate([w1_exp, w1_rt], axis=1).astype(jnp.bfloat16)   # (D, 4224)
    b1 = jnp.concatenate([params["eb1"].reshape(1, TWO_E * H1),
                          params["rb1"].reshape(1, 2 * R1)], axis=1)     # (1, 4224) f32

    # Layer 2: pair experts (2p, 2p+1) into block-diagonal (256, 128) tiles.
    e2 = params["ew2"].reshape(TWO_E, H1, H2)                            # (32, 128, 64)
    z = jnp.zeros((H1, H2), jnp.float32)
    pairs = []
    for p in range(NUM_PAIRS):
        top = jnp.concatenate([e2[2 * p], z], axis=1)                    # (128, 128)
        bot = jnp.concatenate([z, e2[2 * p + 1]], axis=1)                # (128, 128)
        pairs.append(jnp.concatenate([top, bot], axis=0))                # (256, 128)
    w2 = jnp.stack(pairs).astype(jnp.bfloat16)                           # (16, 256, 128)
    b2 = params["eb2"].reshape(1, TWO_E * H2)                            # (1, 2048) f32

    # Block-structured layer-3 weight: column e only sees expert e's h2 block.
    e3 = params["ew3"].reshape(TWO_E, H2)                                # (32, 64)
    eye = jnp.eye(TWO_E, dtype=jnp.float32)
    w3 = (e3[:, :, None] * eye[:, None, :]).reshape(TWO_E * H2, TWO_E)   # (2048, 32)
    w3 = w3.astype(jnp.bfloat16)
    b3 = params["eb3"].reshape(1, TWO_E)                                 # (1, 32) f32

    def block_diag2(a, b):
        za = jnp.zeros((a.shape[0], b.shape[1]), a.dtype)
        zb = jnp.zeros((b.shape[0], a.shape[1]), b.dtype)
        return jnp.concatenate(
            [jnp.concatenate([a, za], axis=1),
             jnp.concatenate([zb, b], axis=1)], axis=0)

    wr2 = block_diag2(params["rw2"][0], params["rw2"][1]).astype(jnp.bfloat16)  # (128, 64)
    br2 = params["rb2"].reshape(1, 2 * R2)                               # (1, 64)  f32
    wr3 = block_diag2(params["rw3"][0], params["rw3"][1]).astype(jnp.bfloat16)  # (64, 32)
    br3 = params["rb3"].reshape(1, 2 * NUM_EXPERTS)                      # (1, 32)  f32

    bw = params["branch_weights"].astype(jnp.float32)                    # (2,) -> SMEM scalars

    return dict(w1=w1, b1=b1, w2=w2, b2=b2, w3=w3, b3=b3,
                wr2=wr2, br2=br2, wr3=wr3, br3=br3, bw=bw)


# ----------------------------------------------------------------------------
# Wrapper
# ----------------------------------------------------------------------------
def _round_up(x, m):
    return ((x + m - 1) // m) * m


def _choose_tiling(batch):
    """(tile_b, padded_batch): sublane-aligned tiles, capped at 256 rows (fits the
    v7x 64 MiB VMEM budget with bf16 slabs), and >=2 grid steps whenever B > 8 so
    ("parallel",) can shard batch tiles across v7x's two TensorCores."""
    if batch <= 8:
        return 8, 8
    half = _round_up((batch + 1) // 2, 8)
    tb = min(256, half)
    return tb, _round_up(batch, tb)


@jax.jit
def hierarchical_fairness_moe(x, packed):
    B, D = x.shape
    tb, padded_b = _choose_tiling(B)
    grid = (padded_b // tb,)

    xb = x.astype(jnp.bfloat16)
    if padded_b != B:
        xb = jnp.concatenate(
            [xb, jnp.zeros((padded_b - B, D), jnp.bfloat16)], axis=0)

    def whole(a):
        # Constant-index weight slab: fetched once -> single-buffered.
        zeros = (0,) * a.ndim
        return pl.BlockSpec(a.shape, lambda i, _z=zeros: _z,
                            pipeline_mode=pl.Buffered(1))

    in_specs = [
        pl.BlockSpec((tb, D), lambda i: (i, 0)),
        whole(packed["w1"]), whole(packed["b1"]),
        whole(packed["w2"]), whole(packed["b2"]),
        whole(packed["w3"]), whole(packed["b3"]),
        whole(packed["wr2"]), whole(packed["br2"]),
        whole(packed["wr3"]), whole(packed["br3"]),
        pl.BlockSpec(memory_space=pltpu.MemorySpace.SMEM),   # branch weights (2,)
    ]

    flops = 2 * padded_b * (D * (TWO_E * H1 + 2 * R1)
                            + NUM_PAIRS * (2 * H1) * (2 * H2)
                            + (TWO_E * H2) * TWO_E
                            + (2 * R1) * (2 * R2) + (2 * R2) * TWO_E)
    weight_bytes = sum(int(v.size) * v.dtype.itemsize for v in packed.values())
    cost = pl.CostEstimate(
        flops=int(flops),
        transcendentals=int(padded_b * (TWO_E + TWO_E + 2)),
        bytes_accessed=int(xb.size) * 2 + padded_b * OUT_W * 4 + int(weight_bytes),
    )

    out = pl.pallas_call(
        _moe_kernel,
        out_shape=jax.ShapeDtypeStruct((padded_b, OUT_W), jnp.float32),
        grid=grid,
        in_specs=in_specs,
        out_specs=pl.BlockSpec((tb, OUT_W), lambda i: (i, 0)),
        scratch_shapes=[pltpu.VMEM((tb, TWO_E * H2), jnp.bfloat16)],
        compiler_params=pltpu.CompilerParams(
            dimension_semantics=("parallel",),
            vmem_limit_bytes=32 * 1024 * 1024),
        cost_estimate=cost,
    )(xb, packed["w1"], packed["b1"], packed["w2"], packed["b2"],
      packed["w3"], packed["b3"], packed["wr2"], packed["br2"],
      packed["wr3"], packed["br3"], packed["bw"])

    out = out[:B]
    eouts = out[:, :TWO_E]
    return {
        "final_pred": out[:, _FIN_OFF],                                # (B,)
        "branch_preds": out[:, _BP_OFF:_BP_OFF + 2],                   # (B, 2)
        "branch_weights": packed["bw"],                                # (2,)
        "expert_outputs": {"gender": eouts[:, :NUM_EXPERTS],           # (B, 16)
                           "race": eouts[:, NUM_EXPERTS:]},            # (B, 16)
    }


if __name__ == "__main__":
    key = jax.random.PRNGKey(0)
    k_x, k_p = jax.random.split(key)

    B, INPUT_DIM = 8, 32          # gender_categories=2, race_categories=5 are training-only
    x = jax.random.normal(k_x, (B, INPUT_DIM), jnp.float32)
    params = init_params(k_p, INPUT_DIM)
    packed = pack_params(params)

    out = hierarchical_fairness_moe(x, packed)
    jax.block_until_ready(out)

    assert out["final_pred"].shape == (B,)
    assert out["branch_preds"].shape == (B, 2)
    assert out["expert_outputs"]["gender"].shape == (B, NUM_EXPERTS)
    assert out["expert_outputs"]["race"].shape == (B, NUM_EXPERTS)
    assert bool(jnp.all(jnp.isfinite(out["final_pred"])))
    print("KERNEL_OK")
</pallas_src>

<mosaic_0001>
module attributes {stable_mosaic.version = 11 : i64} {
  func.func @_moe_kernel(%arg0: i32, %arg1: memref<8x32xbf16, #tpu.memory_space<vmem>>, %arg2: memref<32x4224xbf16, #tpu.memory_space<vmem>>, %arg3: memref<1x4224xf32, #tpu.memory_space<vmem>>, %arg4: memref<16x256x128xbf16, #tpu.memory_space<vmem>>, %arg5: memref<1x2048xf32, #tpu.memory_space<vmem>>, %arg6: memref<2048x32xbf16, #tpu.memory_space<vmem>>, %arg7: memref<1x32xf32, #tpu.memory_space<vmem>>, %arg8: memref<128x64xbf16, #tpu.memory_space<vmem>>, %arg9: memref<1x64xf32, #tpu.memory_space<vmem>>, %arg10: memref<64x32xbf16, #tpu.memory_space<vmem>>, %arg11: memref<1x32xf32, #tpu.memory_space<vmem>>, %arg12: memref<2xf32, #tpu.memory_space<smem>>, %arg13: memref<8x128xf32, #tpu.memory_space<vmem>>, %arg14: memref<8x2048xbf16, #tpu.memory_space<vmem>>) attributes {dimension_semantics = [#tpu.dimension_semantics<parallel>], iteration_bounds = array<i64: 1>, scalar_prefetch = 0 : i64, scratch_operands = 1 : i64, tpu.core_type = #tpu.core_type<tc>, window_params = [{transform_indices = @transform_0, window_bounds = array<i64: 8, 32>}, {pipeline_mode = #tpu.pipeline_mode<synchronous>, transform_indices = @transform_1, window_bounds = array<i64: 32, 4224>}, {pipeline_mode = #tpu.pipeline_mode<synchronous>, transform_indices = @transform_2, window_bounds = array<i64: 1, 4224>}, {pipeline_mode = #tpu.pipeline_mode<synchronous>, transform_indices = @transform_3, window_bounds = array<i64: 16, 256, 128>}, {pipeline_mode = #tpu.pipeline_mode<synchronous>, transform_indices = @transform_4, window_bounds = array<i64: 1, 2048>}, {pipeline_mode = #tpu.pipeline_mode<synchronous>, transform_indices = @transform_5, window_bounds = array<i64: 2048, 32>}, {pipeline_mode = #tpu.pipeline_mode<synchronous>, transform_indices = @transform_6, window_bounds = array<i64: 1, 32>}, {pipeline_mode = #tpu.pipeline_mode<synchronous>, transform_indices = @transform_7, window_bounds = array<i64: 128, 64>}, {pipeline_mode = #tpu.pipeline_mode<synchronous>, transform_indices = @transform_8, window_bounds = array<i64: 1, 64>}, {pipeline_mode = #tpu.pipeline_mode<synchronous>, transform_indices = @transform_9, window_bounds = array<i64: 64, 32>}, {pipeline_mode = #tpu.pipeline_mode<synchronous>, transform_indices = @transform_10, window_bounds = array<i64: 1, 32>}, {transform_indices = @transform_11, window_bounds = array<i64: 2>}, {transform_indices = @transform_12, window_bounds = array<i64: 8, 128>}]} {
    %c0 = arith.constant 0 : index
    %c0_0 = arith.constant 0 : index
    %0 = vector.load %arg1[%c0, %c0_0] : memref<8x32xbf16, #tpu.memory_space<vmem>>, vector<8x32xbf16>
    %c0_1 = arith.constant 0 : index
    %c0_2 = arith.constant 0 : index
    %1 = vector.load %arg2[%c0_1, %c0_2] : memref<32x4224xbf16, #tpu.memory_space<vmem>>, vector<32x4224xbf16>
    %cst = arith.constant dense<0.000000e+00> : vector<8x4224xf32>
    %2 = tpu.matmul %0, %1, %cst {dimension_numbers = #tpu.dot_dimension_numbers<[1], [0], [0], [1], [0, 0, 1, 1], [], []>} : vector<8x32xbf16>, vector<32x4224xbf16>, vector<8x4224xf32> -> vector<8x4224xf32>
    %c0_3 = arith.constant 0 : index
    %c0_4 = arith.constant 0 : index
    %3 = vector.load %arg3[%c0_3, %c0_4] : memref<1x4224xf32, #tpu.memory_space<vmem>>, vector<1x4224xf32>
    %4 = vector.broadcast %3 : vector<1x4224xf32> to vector<8x4224xf32>
    %5 = arith.addf %2, %4 : vector<8x4224xf32>
    %cst_5 = arith.constant 0.000000e+00 : f32
    %6 = vector.broadcast %cst_5 : f32 to vector<8x4224xf32>
    %7 = arith.maximumf %5, %6 : vector<8x4224xf32>
    %8 = arith.truncf %7 : vector<8x4224xf32> to vector<8x4224xbf16>
    %9 = vector.extract_strided_slice %8 {offsets = [0, 0], sizes = [8, 256], strides = [1, 1]} : vector<8x4224xbf16> to vector<8x256xbf16>
    %c0_6 = arith.constant 0 : index
    %c0_7 = arith.constant 0 : index
    %c0_8 = arith.constant 0 : index
    %10 = vector.load %arg4[%c0_6, %c0_7, %c0_8] : memref<16x256x128xbf16, #tpu.memory_space<vmem>>, vector<1x256x128xbf16>
    %11 = vector.shape_cast %10 : vector<1x256x128xbf16> to vector<256x128xbf16>
    %cst_9 = arith.constant dense<0.000000e+00> : vector<8x128xf32>
    %12 = tpu.matmul %9, %11, %cst_9 {dimension_numbers = #tpu.dot_dimension_numbers<[1], [0], [0], [1], [0, 0, 1, 1], [], []>} : vector<8x256xbf16>, vector<256x128xbf16>, vector<8x128xf32> -> vector<8x128xf32>
    %c0_10 = arith.constant 0 : index
    %c0_11 = arith.constant 0 : index
    %13 = vector.load %arg5[%c0_10, %c0_11] : memref<1x2048xf32, #tpu.memory_space<vmem>>, vector<1x128xf32>
    %14 = vector.broadcast %13 : vector<1x128xf32> to vector<8x128xf32>
    %15 = arith.addf %12, %14 : vector<8x128xf32>
    %cst_12 = arith.constant 0.000000e+00 : f32
    %16 = vector.broadcast %cst_12 : f32 to vector<8x128xf32>
    %17 = arith.maximumf %15, %16 : vector<8x128xf32>
    %18 = arith.truncf %17 : vector<8x128xf32> to vector<8x128xbf16>
    %c0_13 = arith.constant 0 : index
    %c0_14 = arith.constant 0 : index
    %19 = vector.load %arg14[%c0_13, %c0_14] : memref<8x2048xbf16, #tpu.memory_space<vmem>>, vector<8x128xbf16>
    tpu.vector_store %arg14[%c0_13, %c0_14], %18 {strides = array<i32>} : memref<8x2048xbf16, #tpu.memory_space<vmem>>, vector<8x128xbf16>,
    %20 = vector.extract_strided_slice %8 {offsets = [0, 256], sizes = [8, 256], strides = [1, 1]} : vector<8x4224xbf16> to vector<8x256xbf16>
    %c1 = arith.constant 1 : index
    %c0_15 = arith.constant 0 : index
    %c0_16 = arith.constant 0 : index
    %21 = vector.load %arg4[%c1, %c0_15, %c0_16] : memref<16x256x128xbf16, #tpu.memory_space<vmem>>, vector<1x256x128xbf16>
    %22 = vector.shape_cast %21 : vector<1x256x128xbf16> to vector<256x128xbf16>
    %cst_17 = arith.constant dense<0.000000e+00> : vector<8x128xf32>
    %23 = tpu.matmul %20, %22, %cst_17 {dimension_numbers = #tpu.dot_dimension_numbers<[1], [0], [0], [1], [0, 0, 1, 1], [], []>} : vector<8x256xbf16>, vector<256x128xbf16>, vector<8x128xf32> -> vector<8x128xf32>
    %c0_18 = arith.constant 0 : index
    %c128 = arith.constant 128 : index
    %24 = vector.load %arg5[%c0_18, %c128] : memref<1x2048xf32, #tpu.memory_space<vmem>>, vector<1x128xf32>
    %25 = vector.broadcast %24 : vector<1x128xf32> to vector<8x128xf32>
    %26 = arith.addf %23, %25 : vector<8x128xf32>
    %cst_19 = arith.constant 0.000000e+00 : f32
    %27 = vector.broadcast %cst_19 : f32 to vector<8x128xf32>
    %28 = arith.maximumf %26, %27 : vector<8x128xf32>
    %29 = arith.truncf %28 : vector<8x128xf32> to vector<8x128xbf16>
    %c0_20 = arith.constant 0 : index
    %c128_21 = arith.constant 128 : index
    %30 = vector.load %arg14[%c0_20, %c128_21] : memref<8x2048xbf16, #tpu.memory_space<vmem>>, vector<8x128xbf16>
    tpu.vector_store %arg14[%c0_20, %c128_21], %29 {strides = array<i32>} : memref<8x2048xbf16, #tpu.memory_space<vmem>>, vector<8x128xbf16>,
    %31 = vector.extract_strided_slice %8 {offsets = [0, 512], sizes = [8, 256], strides = [1, 1]} : vector<8x4224xbf16> to vector<8x256xbf16>
    %c2 = arith.constant 2 : index
    %c0_22 = arith.constant 0 : index
    %c0_23 = arith.constant 0 : index
    %32 = vector.load %arg4[%c2, %c0_22, %c0_23] : memref<16x256x128xbf16, #tpu.memory_space<vmem>>, vector<1x256x128xbf16>
    %33 = vector.shape_cast %32 : vector<1x256x128xbf16> to vector<256x128xbf16>
    %cst_24 = arith.constant dense<0.000000e+00> : vector<8x128xf32>
    %34 = tpu.matmul %31, %33, %cst_24 {dimension_numbers = #tpu.dot_dimension_numbers<[1], [0], [0], [1], [0, 0, 1, 1], [], []>} : vector<8x256xbf16>, vector<256x128xbf16>, vector<8x128xf32> -> vector<8x128xf32>
    %c0_25 = arith.constant 0 : index
    %c256 = arith.constant 256 : index
    %35 = vector.load %arg5[%c0_25, %c256] : memref<1x2048xf32, #tpu.memory_space<vmem>>, vector<1x128xf32>
    %36 = vector.broadcast %35 : vector<1x128xf32> to vector<8x128xf32>
    %37 = arith.addf %34, %36 : vector<8x128xf32>
    %cst_26 = arith.constant 0.000000e+00 : f32
    %38 = vector.broadcast %cst_26 : f32 to vector<8x128xf32>
    %39 = arith.maximumf %37, %38 : vector<8x128xf32>
    %40 = arith.truncf %39 : vector<8x128xf32> to vector<8x128xbf16>
    %c0_27 = arith.constant 0 : index
    %c256_28 = arith.constant 256 : index
    %41 = vector.load %arg14[%c0_27, %c256_28] : memref<8x2048xbf16, #tpu.memory_space<vmem>>, vector<8x128xbf16>
    tpu.vector_store %arg14[%c0_27, %c256_28], %40 {strides = array<i32>} : memref<8x2048xbf16, #tpu.memory_space<vmem>>, vector<8x128xbf16>,
    %42 = vector.extract_strided_slice %8 {offsets = [0, 768], sizes = [8, 256], strides = [1, 1]} : vector<8x4224xbf16> to vector<8x256xbf16>
    %c3 = arith.constant 3 : index
    %c0_29 = arith.constant 0 : index
    %c0_30 = arith.constant 0 : index
    %43 = vector.load %arg4[%c3, %c0_29, %c0_30] : memref<16x256x128xbf16, #tpu.memory_space<vmem>>, vector<1x256x128xbf16>
    %44 = vector.shape_cast %43 : vector<1x256x128xbf16> to vector<256x128xbf16>
    %cst_31 = arith.constant dense<0.000000e+00> : vector<8x128xf32>
    %45 = tpu.matmul %42, %44, %cst_31 {dimension_numbers = #tpu.dot_dimension_numbers<[1], [0], [0], [1], [0, 0, 1, 1], [], []>} : vector<8x256xbf16>, vector<256x128xbf16>, vector<8x128xf32> -> vector<8x128xf32>
    %c0_32 = arith.constant 0 : index
    %c384 = arith.constant 384 : index
    %46 = vector.load %arg5[%c0_32, %c384] : memref<1x2048xf32, #tpu.memory_space<vmem>>, vector<1x128xf32>
    %47 = vector.broadcast %46 : vector<1x128xf32> to vector<8x128xf32>
    %48 = arith.addf %45, %47 : vector<8x128xf32>
    %cst_33 = arith.constant 0.000000e+00 : f32
    %49 = vector.broadcast %cst_33 : f32 to vector<8x128xf32>
    %50 = arith.maximumf %48, %49 : vector<8x128xf32>
    %51 = arith.truncf %50 : vector<8x128xf32> to vector<8x128xbf16>
    %c0_34 = arith.constant 0 : index
    %c384_35 = arith.constant 384 : index
    %52 = vector.load %arg14[%c0_34, %c384_35] : memref<8x2048xbf16, #tpu.memory_space<vmem>>, vector<8x128xbf16>
    tpu.vector_store %arg14[%c0_34, %c384_35], %51 {strides = array<i32>} : memref<8x2048xbf16, #tpu.memory_space<vmem>>, vector<8x128xbf16>,
    %53 = vector.extract_strided_slice %8 {offsets = [0, 1024], sizes = [8, 256], strides = [1, 1]} : vector<8x4224xbf16> to vector<8x256xbf16>
    %c4 = arith.constant 4 : index
    %c0_36 = arith.constant 0 : index
    %c0_37 = arith.constant 0 : index
    %54 = vector.load %arg4[%c4, %c0_36, %c0_37] : memref<16x256x128xbf16, #tpu.memory_space<vmem>>, vector<1x256x128xbf16>
    %55 = vector.shape_cast %54 : vector<1x256x128xbf16> to vector<256x128xbf16>
    %cst_38 = arith.constant dense<0.000000e+00> : vector<8x128xf32>
    %56 = tpu.matmul %53, %55, %cst_38 {dimension_numbers = #tpu.dot_dimension_numbers<[1], [0], [0], [1], [0, 0, 1, 1], [], []>} : vector<8x256xbf16>, vector<256x128xbf16>, vector<8x128xf32> -> vector<8x128xf32>
    %c0_39 = arith.constant 0 : index
    %c512 = arith.constant 512 : index
    %57 = vector.load %arg5[%c0_39, %c512] : memref<1x2048xf32, #tpu.memory_space<vmem>>, vector<1x128xf32>
    %58 = vector.broadcast %57 : vector<1x128xf32> to vector<8x128xf32>
    %59 = arith.addf %56, %58 : vector<8x128xf32>
    %cst_40 = arith.constant 0.000000e+00 : f32
    %60 = vector.broadcast %cst_40 : f32 to vector<8x128xf32>
    %61 = arith.maximumf %59, %60 : vector<8x128xf32>
    %62 = arith.truncf %61 : vector<8x128xf32> to vector<8x128xbf16>
    %c0_41 = arith.constant 0 : index
    %c512_42 = arith.constant 512 : index
    %63 = vector.load %arg14[%c0_41, %c512_42] : memref<8x2048xbf16, #tpu.memory_space<vmem>>, vector<8x128xbf16>
    tpu.vector_store %arg14[%c0_41, %c512_42], %62 {strides = array<i32>} : memref<8x2048xbf16, #tpu.memory_space<vmem>>, vector<8x128xbf16>,
    %64 = vector.extract_strided_slice %8 {offsets = [0, 1280], sizes = [8, 256], strides = [1, 1]} : vector<8x4224xbf16> to vector<8x256xbf16>
    %c5 = arith.constant 5 : index
    %c0_43 = arith.constant 0 : index
    %c0_44 = arith.constant 0 : index
    %65 = vector.load %arg4[%c5, %c0_43, %c0_44] : memref<16x256x128xbf16, #tpu.memory_space<vmem>>, vector<1x256x128xbf16>
    %66 = vector.shape_cast %65 : vector<1x256x128xbf16> to vector<256x128xbf16>
    %cst_45 = arith.constant dense<0.000000e+00> : vector<8x128xf32>
    %67 = tpu.matmul %64, %66, %cst_45 {dimension_numbers = #tpu.dot_dimension_numbers<[1], [0], [0], [1], [0, 0, 1, 1], [], []>} : vector<8x256xbf16>, vector<256x128xbf16>, vector<8x128xf32> -> vector<8x128xf32>
    %c0_46 = arith.constant 0 : index
    %c640 = arith.constant 640 : index
    %68 = vector.load %arg5[%c0_46, %c640] : memref<1x2048xf32, #tpu.memory_space<vmem>>, vector<1x128xf32>
    %69 = vector.broadcast %68 : vector<1x128xf32> to vector<8x128xf32>
    %70 = arith.addf %67, %69 : vector<8x128xf32>
    %cst_47 = arith.constant 0.000000e+00 : f32
    %71 = vector.broadcast %cst_47 : f32 to vector<8x128xf32>
    %72 = arith.maximumf %70, %71 : vector<8x128xf32>
    %73 = arith.truncf %72 : vector<8x128xf32> to vector<8x128xbf16>
    %c0_48 = arith.constant 0 : index
    %c640_49 = arith.constant 640 : index
    %74 = vector.load %arg14[%c0_48, %c640_49] : memref<8x2048xbf16, #tpu.memory_space<vmem>>, vector<8x128xbf16>
    tpu.vector_store %arg14[%c0_48, %c640_49], %73 {strides = array<i32>} : memref<8x2048xbf16, #tpu.memory_space<vmem>>, vector<8x128xbf16>,
    %75 = vector.extract_strided_slice %8 {offsets = [0, 1536], sizes = [8, 256], strides = [1, 1]} : vector<8x4224xbf16> to vector<8x256xbf16>
    %c6 = arith.constant 6 : index
    %c0_50 = arith.constant 0 : index
    %c0_51 = arith.constant 0 : index
    %76 = vector.load %arg4[%c6, %c0_50, %c0_51] : memref<16x256x128xbf16, #tpu.memory_space<vmem>>, vector<1x256x128xbf16>
    %77 = vector.shape_cast %76 : vector<1x256x128xbf16> to vector<256x128xbf16>
    %cst_52 = arith.constant dense<0.000000e+00> : vector<8x128xf32>
    %78 = tpu.matmul %75, %77, %cst_52 {dimension_numbers = #tpu.dot_dimension_numbers<[1], [0], [0], [1], [0, 0, 1, 1], [], []>} : vector<8x256xbf16>, vector<256x128xbf16>, vector<8x128xf32> -> vector<8x128xf32>
    %c0_53 = arith.constant 0 : index
    %c768 = arith.constant 768 : index
    %79 = vector.load %arg5[%c0_53, %c768] : memref<1x2048xf32, #tpu.memory_space<vmem>>, vector<1x128xf32>
    %80 = vector.broadcast %79 : vector<1x128xf32> to vector<8x128xf32>
    %81 = arith.addf %78, %80 : vector<8x128xf32>
    %cst_54 = arith.constant 0.000000e+00 : f32
    %82 = vector.broadcast %cst_54 : f32 to vector<8x128xf32>
    %83 = arith.maximumf %81, %82 : vector<8x128xf32>
    %84 = arith.truncf %83 : vector<8x128xf32> to vector<8x128xbf16>
    %c0_55 = arith.constant 0 : index
    %c768_56 = arith.constant 768 : index
    %85 = vector.load %arg14[%c0_55, %c768_56] : memref<8x2048xbf16, #tpu.memory_space<vmem>>, vector<8x128xbf16>
    tpu.vector_store %arg14[%c0_55, %c768_56], %84 {strides = array<i32>} : memref<8x2048xbf16, #tpu.memory_space<vmem>>, vector<8x128xbf16>,
    %86 = vector.extract_strided_slice %8 {offsets = [0, 1792], sizes = [8, 256], strides = [1, 1]} : vector<8x4224xbf16> to vector<8x256xbf16>
    %c7 = arith.constant 7 : index
    %c0_57 = arith.constant 0 : index
    %c0_58 = arith.constant 0 : index
    %87 = vector.load %arg4[%c7, %c0_57, %c0_58] : memref<16x256x128xbf16, #tpu.memory_space<vmem>>, vector<1x256x128xbf16>
    %88 = vector.shape_cast %87 : vector<1x256x128xbf16> to vector<256x128xbf16>
    %cst_59 = arith.constant dense<0.000000e+00> : vector<8x128xf32>
    %89 = tpu.matmul %86, %88, %cst_59 {dimension_numbers = #tpu.dot_dimension_numbers<[1], [0], [0], [1], [0, 0, 1, 1], [], []>} : vector<8x256xbf16>, vector<256x128xbf16>, vector<8x128xf32> -> vector<8x128xf32>
    %c0_60 = arith.constant 0 : index
    %c896 = arith.constant 896 : index
    %90 = vector.load %arg5[%c0_60, %c896] : memref<1x2048xf32, #tpu.memory_space<vmem>>, vector<1x128xf32>
    %91 = vector.broadcast %90 : vector<1x128xf32> to vector<8x128xf32>
    %92 = arith.addf %89, %91 : vector<8x128xf32>
    %cst_61 = arith.constant 0.000000e+00 : f32
    %93 = vector.broadcast %cst_61 : f32 to vector<8x128xf32>
    %94 = arith.maximumf %92, %93 : vector<8x128xf32>
    %95 = arith.truncf %94 : vector<8x128xf32> to vector<8x128xbf16>
    %c0_62 = arith.constant 0 : index
    %c896_63 = arith.constant 896 : index
    %96 = vector.load %arg14[%c0_62, %c896_63] : memref<8x2048xbf16, #tpu.memory_space<vmem>>, vector<8x128xbf16>
    tpu.vector_store %arg14[%c0_62, %c896_63], %95 {strides = array<i32>} : memref<8x2048xbf16, #tpu.memory_space<vmem>>, vector<8x128xbf16>,
    %97 = vector.extract_strided_slice %8 {offsets = [0, 2048], sizes = [8, 256], strides = [1, 1]} : vector<8x4224xbf16> to vector<8x256xbf16>
    %c8 = arith.constant 8 : index
    %c0_64 = arith.constant 0 : index
    %c0_65 = arith.constant 0 : index
    %98 = vector.load %arg4[%c8, %c0_64, %c0_65] : memref<16x256x128xbf16, #tpu.memory_space<vmem>>, vector<1x256x128xbf16>
    %99 = vector.shape_cast %98 : vector<1x256x128xbf16> to vector<256x128xbf16>
    %cst_66 = arith.constant dense<0.000000e+00> : vector<8x128xf32>
    %100 = tpu.matmul %97, %99, %cst_66 {dimension_numbers = #tpu.dot_dimension_numbers<[1], [0], [0], [1], [0, 0, 1, 1], [], []>} : vector<8x256xbf16>, vector<256x128xbf16>, vector<8x128xf32> -> vector<8x128xf32>
    %c0_67 = arith.constant 0 : index
    %c1024 = arith.constant 1024 : index
    %101 = vector.load %arg5[%c0_67, %c1024] : memref<1x2048xf32, #tpu.memory_space<vmem>>, vector<1x128xf32>
    %102 = vector.broadcast %101 : vector<1x128xf32> to vector<8x128xf32>
    %103 = arith.addf %100, %102 : vector<8x128xf32>
    %cst_68 = arith.constant 0.000000e+00 : f32
    %104 = vector.broadcast %cst_68 : f32 to vector<8x128xf32>
    %105 = arith.maximumf %103, %104 : vector<8x128xf32>
    %106 = arith.truncf %105 : vector<8x128xf32> to vector<8x128xbf16>
    %c0_69 = arith.constant 0 : index
    %c1024_70 = arith.constant 1024 : index
    %107 = vector.load %arg14[%c0_69, %c1024_70] : memref<8x2048xbf16, #tpu.memory_space<vmem>>, vector<8x128xbf16>
    tpu.vector_store %arg14[%c0_69, %c1024_70], %106 {strides = array<i32>} : memref<8x2048xbf16, #tpu.memory_space<vmem>>, vector<8x128xbf16>,
    %108 = vector.extract_strided_slice %8 {offsets = [0, 2304], sizes = [8, 256], strides = [1, 1]} : vector<8x4224xbf16> to vector<8x256xbf16>
    %c9 = arith.constant 9 : index
    %c0_71 = arith.constant 0 : index
    %c0_72 = arith.constant 0 : index
    %109 = vector.load %arg4[%c9, %c0_71, %c0_72] : memref<16x256x128xbf16, #tpu.memory_space<vmem>>, vector<1x256x128xbf16>
    %110 = vector.shape_cast %109 : vector<1x256x128xbf16> to vector<256x128xbf16>
    %cst_73 = arith.constant dense<0.000000e+00> : vector<8x128xf32>
    %111 = tpu.matmul %108, %110, %cst_73 {dimension_numbers = #tpu.dot_dimension_numbers<[1], [0], [0], [1], [0, 0, 1, 1], [], []>} : vector<8x256xbf16>, vector<256x128xbf16>, vector<8x128xf32> -> vector<8x128xf32>
    %c0_74 = arith.constant 0 : index
    %c1152 = arith.constant 1152 : index
    %112 = vector.load %arg5[%c0_74, %c1152] : memref<1x2048xf32, #tpu.memory_space<vmem>>, vector<1x128xf32>
    %113 = vector.broadcast %112 : vector<1x128xf32> to vector<8x128xf32>
    %114 = arith.addf %111, %113 : vector<8x128xf32>
    %cst_75 = arith.constant 0.000000e+00 : f32
    %115 = vector.broadcast %cst_75 : f32 to vector<8x128xf32>
    %116 = arith.maximumf %114, %115 : vector<8x128xf32>
    %117 = arith.truncf %116 : vector<8x128xf32> to vector<8x128xbf16>
    %c0_76 = arith.constant 0 : index
    %c1152_77 = arith.constant 1152 : index
    %118 = vector.load %arg14[%c0_76, %c1152_77] : memref<8x2048xbf16, #tpu.memory_space<vmem>>, vector<8x128xbf16>
    tpu.vector_store %arg14[%c0_76, %c1152_77], %117 {strides = array<i32>} : memref<8x2048xbf16, #tpu.memory_space<vmem>>, vector<8x128xbf16>,
    %119 = vector.extract_strided_slice %8 {offsets = [0, 2560], sizes = [8, 256], strides = [1, 1]} : vector<8x4224xbf16> to vector<8x256xbf16>
    %c10 = arith.constant 10 : index
    %c0_78 = arith.constant 0 : index
    %c0_79 = arith.constant 0 : index
    %120 = vector.load %arg4[%c10, %c0_78, %c0_79] : memref<16x256x128xbf16, #tpu.memory_space<vmem>>, vector<1x256x128xbf16>
    %121 = vector.shape_cast %120 : vector<1x256x128xbf16> to vector<256x128xbf16>
    %cst_80 = arith.constant dense<0.000000e+00> : vector<8x128xf32>
    %122 = tpu.matmul %119, %121, %cst_80 {dimension_numbers = #tpu.dot_dimension_numbers<[1], [0], [0], [1], [0, 0, 1, 1], [], []>} : vector<8x256xbf16>, vector<256x128xbf16>, vector<8x128xf32> -> vector<8x128xf32>
    %c0_81 = arith.constant 0 : index
    %c1280 = arith.constant 1280 : index
    %123 = vector.load %arg5[%c0_81, %c1280] : memref<1x2048xf32, #tpu.memory_space<vmem>>, vector<1x128xf32>
    %124 = vector.broadcast %123 : vector<1x128xf32> to vector<8x128xf32>
    %125 = arith.addf %122, %124 : vector<8x128xf32>
    %cst_82 = arith.constant 0.000000e+00 : f32
    %126 = vector.broadcast %cst_82 : f32 to vector<8x128xf32>
    %127 = arith.maximumf %125, %126 : vector<8x128xf32>
    %128 = arith.truncf %127 : vector<8x128xf32> to vector<8x128xbf16>
    %c0_83 = arith.constant 0 : index
    %c1280_84 = arith.constant 1280 : index
    %129 = vector.load %arg14[%c0_83, %c1280_84] : memref<8x2048xbf16, #tpu.memory_space<vmem>>, vector<8x128xbf16>
    tpu.vector_store %arg14[%c0_83, %c1280_84], %128 {strides = array<i32>} : memref<8x2048xbf16, #tpu.memory_space<vmem>>, vector<8x128xbf16>,
    %130 = vector.extract_strided_slice %8 {offsets = [0, 2816], sizes = [8, 256], strides = [1, 1]} : vector<8x4224xbf16> to vector<8x256xbf16>
    %c11 = arith.constant 11 : index
    %c0_85 = arith.constant 0 : index
    %c0_86 = arith.constant 0 : index
    %131 = vector.load %arg4[%c11, %c0_85, %c0_86] : memref<16x256x128xbf16, #tpu.memory_space<vmem>>, vector<1x256x128xbf16>
    %132 = vector.shape_cast %131 : vector<1x256x128xbf16> to vector<256x128xbf16>
    %cst_87 = arith.constant dense<0.000000e+00> : vector<8x128xf32>
    %133 = tpu.matmul %130, %132, %cst_87 {dimension_numbers = #tpu.dot_dimension_numbers<[1], [0], [0], [1], [0, 0, 1, 1], [], []>} : vector<8x256xbf16>, vector<256x128xbf16>, vector<8x128xf32> -> vector<8x128xf32>
    %c0_88 = arith.constant 0 : index
    %c1408 = arith.constant 1408 : index
    %134 = vector.load %arg5[%c0_88, %c1408] : memref<1x2048xf32, #tpu.memory_space<vmem>>, vector<1x128xf32>
    %135 = vector.broadcast %134 : vector<1x128xf32> to vector<8x128xf32>
    %136 = arith.addf %133, %135 : vector<8x128xf32>
    %cst_89 = arith.constant 0.000000e+00 : f32
    %137 = vector.broadcast %cst_89 : f32 to vector<8x128xf32>
    %138 = arith.maximumf %136, %137 : vector<8x128xf32>
    %139 = arith.truncf %138 : vector<8x128xf32> to vector<8x128xbf16>
    %c0_90 = arith.constant 0 : index
    %c1408_91 = arith.constant 1408 : index
    %140 = vector.load %arg14[%c0_90, %c1408_91] : memref<8x2048xbf16, #tpu.memory_space<vmem>>, vector<8x128xbf16>
    tpu.vector_store %arg14[%c0_90, %c1408_91], %139 {strides = array<i32>} : memref<8x2048xbf16, #tpu.memory_space<vmem>>, vector<8x128xbf16>,
    %141 = vector.extract_strided_slice %8 {offsets = [0, 3072], sizes = [8, 256], strides = [1, 1]} : vector<8x4224xbf16> to vector<8x256xbf16>
    %c12 = arith.constant 12 : index
    %c0_92 = arith.constant 0 : index
    %c0_93 = arith.constant 0 : index
    %142 = vector.load %arg4[%c12, %c0_92, %c0_93] : memref<16x256x128xbf16, #tpu.memory_space<vmem>>, vector<1x256x128xbf16>
    %143 = vector.shape_cast %142 : vector<1x256x128xbf16> to vector<256x128xbf16>
    %cst_94 = arith.constant dense<0.000000e+00> : vector<8x128xf32>
    %144 = tpu.matmul %141, %143, %cst_94 {dimension_numbers = #tpu.dot_dimension_numbers<[1], [0], [0], [1], [0, 0, 1, 1], [], []>} : vector<8x256xbf16>, vector<256x128xbf16>, vector<8x128xf32> -> vector<8x128xf32>
    %c0_95 = arith.constant 0 : index
    %c1536 = arith.constant 1536 : index
    %145 = vector.load %arg5[%c0_95, %c1536] : memref<1x2048xf32, #tpu.memory_space<vmem>>, vector<1x128xf32>
    %146 = vector.broadcast %145 : vector<1x128xf32> to vector<8x128xf32>
    %147 = arith.addf %144, %146 : vector<8x128xf32>
    %cst_96 = arith.constant 0.000000e+00 : f32
    %148 = vector.broadcast %cst_96 : f32 to vector<8x128xf32>
    %149 = arith.maximumf %147, %148 : vector<8x128xf32>
    %150 = arith.truncf %149 : vector<8x128xf32> to vector<8x128xbf16>
    %c0_97 = arith.constant 0 : index
    %c1536_98 = arith.constant 1536 : index
    %151 = vector.load %arg14[%c0_97, %c1536_98] : memref<8x2048xbf16, #tpu.memory_space<vmem>>, vector<8x128xbf16>
    tpu.vector_store %arg14[%c0_97, %c1536_98], %150 {strides = array<i32>} : memref<8x2048xbf16, #tpu.memory_space<vmem>>, vector<8x128xbf16>,
    %152 = vector.extract_strided_slice %8 {offsets = [0, 3328], sizes = [8, 256], strides = [1, 1]} : vector<8x4224xbf16> to vector<8x256xbf16>
    %c13 = arith.constant 13 : index
    %c0_99 = arith.constant 0 : index
    %c0_100 = arith.constant 0 : index
    %153 = vector.load %arg4[%c13, %c0_99, %c0_100] : memref<16x256x128xbf16, #tpu.memory_space<vmem>>, vector<1x256x128xbf16>
    %154 = vector.shape_cast %153 : vector<1x256x128xbf16> to vector<256x128xbf16>
    %cst_101 = arith.constant dense<0.000000e+00> : vector<8x128xf32>
    %155 = tpu.matmul %152, %154, %cst_101 {dimension_numbers = #tpu.dot_dimension_numbers<[1], [0], [0], [1], [0, 0, 1, 1], [], []>} : vector<8x256xbf16>, vector<256x128xbf16>, vector<8x128xf32> -> vector<8x128xf32>
    %c0_102 = arith.constant 0 : index
    %c1664 = arith.constant 1664 : index
    %156 = vector.load %arg5[%c0_102, %c1664] : memref<1x2048xf32, #tpu.memory_space<vmem>>, vector<1x128xf32>
    %157 = vector.broadcast %156 : vector<1x128xf32> to vector<8x128xf32>
    %158 = arith.addf %155, %157 : vector<8x128xf32>
    %cst_103 = arith.constant 0.000000e+00 : f32
    %159 = vector.broadcast %cst_103 : f32 to vector<8x128xf32>
    %160 = arith.maximumf %158, %159 : vector<8x128xf32>
    %161 = arith.truncf %160 : vector<8x128xf32> to vector<8x128xbf16>
    %c0_104 = arith.constant 0 : index
    %c1664_105 = arith.constant 1664 : index
    %162 = vector.load %arg14[%c0_104, %c1664_105] : memref<8x2048xbf16, #tpu.memory_space<vmem>>, vector<8x128xbf16>
    tpu.vector_store %arg14[%c0_104, %c1664_105], %161 {strides = array<i32>} : memref<8x2048xbf16, #tpu.memory_space<vmem>>, vector<8x128xbf16>,
    %163 = vector.extract_strided_slice %8 {offsets = [0, 3584], sizes = [8, 256], strides = [1, 1]} : vector<8x4224xbf16> to vector<8x256xbf16>
    %c14 = arith.constant 14 : index
    %c0_106 = arith.constant 0 : index
    %c0_107 = arith.constant 0 : index
    %164 = vector.load %arg4[%c14, %c0_106, %c0_107] : memref<16x256x128xbf16, #tpu.memory_space<vmem>>, vector<1x256x128xbf16>
    %165 = vector.shape_cast %164 : vector<1x256x128xbf16> to vector<256x128xbf16>
    %cst_108 = arith.constant dense<0.000000e+00> : vector<8x128xf32>
    %166 = tpu.matmul %163, %165, %cst_108 {dimension_numbers = #tpu.dot_dimension_numbers<[1], [0], [0], [1], [0, 0, 1, 1], [], []>} : vector<8x256xbf16>, vector<256x128xbf16>, vector<8x128xf32> -> vector<8x128xf32>
    %c0_109 = arith.constant 0 : index
    %c1792 = arith.constant 1792 : index
    %167 = vector.load %arg5[%c0_109, %c1792] : memref<1x2048xf32, #tpu.memory_space<vmem>>, vector<1x128xf32>
    %168 = vector.broadcast %167 : vector<1x128xf32> to vector<8x128xf32>
    %169 = arith.addf %166, %168 : vector<8x128xf32>
    %cst_110 = arith.constant 0.000000e+00 : f32
    %170 = vector.broadcast %cst_110 : f32 to vector<8x128xf32>
    %171 = arith.maximumf %169, %170 : vector<8x128xf32>
    %172 = arith.truncf %171 : vector<8x128xf32> to vector<8x128xbf16>
    %c0_111 = arith.constant 0 : index
    %c1792_112 = arith.constant 1792 : index
    %173 = vector.load %arg14[%c0_111, %c1792_112] : memref<8x2048xbf16, #tpu.memory_space<vmem>>, vector<8x128xbf16>
    tpu.vector_store %arg14[%c0_111, %c1792_112], %172 {strides = array<i32>} : memref<8x2048xbf16, #tpu.memory_space<vmem>>, vector<8x128xbf16>,
    %174 = vector.extract_strided_slice %8 {offsets = [0, 3840], sizes = [8, 256], strides = [1, 1]} : vector<8x4224xbf16> to vector<8x256xbf16>
    %c15 = arith.constant 15 : index
    %c0_113 = arith.constant 0 : index
    %c0_114 = arith.constant 0 : index
    %175 = vector.load %arg4[%c15, %c0_113, %c0_114] : memref<16x256x128xbf16, #tpu.memory_space<vmem>>, vector<1x256x128xbf16>
    %176 = vector.shape_cast %175 : vector<1x256x128xbf16> to vector<256x128xbf16>
    %cst_115 = arith.constant dense<0.000000e+00> : vector<8x128xf32>
    %177 = tpu.matmul %174, %176, %cst_115 {dimension_numbers = #tpu.dot_dimension_numbers<[1], [0], [0], [1], [0, 0, 1, 1], [], []>} : vector<8x256xbf16>, vector<256x128xbf16>, vector<8x128xf32> -> vector<8x128xf32>
    %c0_116 = arith.constant 0 : index
    %c1920 = arith.constant 1920 : index
    %178 = vector.load %arg5[%c0_116, %c1920] : memref<1x2048xf32, #tpu.memory_space<vmem>>, vector<1x128xf32>
    %179 = vector.broadcast %178 : vector<1x128xf32> to vector<8x128xf32>
    %180 = arith.addf %177, %179 : vector<8x128xf32>
    %cst_117 = arith.constant 0.000000e+00 : f32
    %181 = vector.broadcast %cst_117 : f32 to vector<8x128xf32>
    %182 = arith.maximumf %180, %181 : vector<8x128xf32>
    %183 = arith.truncf %182 : vector<8x128xf32> to vector<8x128xbf16>
    %c0_118 = arith.constant 0 : index
    %c1920_119 = arith.constant 1920 : index
    %184 = vector.load %arg14[%c0_118, %c1920_119] : memref<8x2048xbf16, #tpu.memory_space<vmem>>, vector<8x128xbf16>
    tpu.vector_store %arg14[%c0_118, %c1920_119], %183 {strides = array<i32>} : memref<8x2048xbf16, #tpu.memory_space<vmem>>, vector<8x128xbf16>,
    %c0_120 = arith.constant 0 : index
    %c0_121 = arith.constant 0 : index
    %185 = vector.load %arg14[%c0_120, %c0_121] : memref<8x2048xbf16, #tpu.memory_space<vmem>>, vector<8x2048xbf16>
    %c0_122 = arith.constant 0 : index
    %c0_123 = arith.constant 0 : index
    %186 = vector.load %arg6[%c0_122, %c0_123] : memref<2048x32xbf16, #tpu.memory_space<vmem>>, vector<2048x32xbf16>
    %cst_124 = arith.constant dense<0.000000e+00> : vector<8x32xf32>
    %187 = tpu.matmul %185, %186, %cst_124 {dimension_numbers = #tpu.dot_dimension_numbers<[1], [0], [0], [1], [0, 0, 1, 1], [], []>} : vector<8x2048xbf16>, vector<2048x32xbf16>, vector<8x32xf32> -> vector<8x32xf32>
    %c0_125 = arith.constant 0 : index
    %c0_126 = arith.constant 0 : index
    %188 = vector.load %arg7[%c0_125, %c0_126] : memref<1x32xf32, #tpu.memory_space<vmem>>, vector<1x32xf32>
    %189 = vector.broadcast %188 : vector<1x32xf32> to vector<8x32xf32>
    %190 = arith.addf %187, %189 : vector<8x32xf32>
    %191 = arith.negf %190 : vector<8x32xf32>
    %192 = math.exp %191 : vector<8x32xf32>
    %cst_127 = arith.constant 1.000000e+00 : f32
    %193 = vector.broadcast %cst_127 : f32 to vector<8x32xf32>
    %194 = arith.addf %193, %192 : vector<8x32xf32>
    %195 = arith.divf %193, %194 : vector<8x32xf32>
    %196 = vector.extract_strided_slice %8 {offsets = [0, 4096], sizes = [8, 128], strides = [1, 1]} : vector<8x4224xbf16> to vector<8x128xbf16>
    %c0_128 = arith.constant 0 : index
    %c0_129 = arith.constant 0 : index
    %197 = vector.load %arg8[%c0_128, %c0_129] : memref<128x64xbf16, #tpu.memory_space<vmem>>, vector<128x64xbf16>
    %cst_130 = arith.constant dense<0.000000e+00> : vector<8x64xf32>
    %198 = tpu.matmul %196, %197, %cst_130 {dimension_numbers = #tpu.dot_dimension_numbers<[1], [0], [0], [1], [0, 0, 1, 1], [], []>} : vector<8x128xbf16>, vector<128x64xbf16>, vector<8x64xf32> -> vector<8x64xf32>
    %c0_131 = arith.constant 0 : index
    %c0_132 = arith.constant 0 : index
    %199 = vector.load %arg9[%c0_131, %c0_132] : memref<1x64xf32, #tpu.memory_space<vmem>>, vector<1x64xf32>
    %200 = vector.broadcast %199 : vector<1x64xf32> to vector<8x64xf32>
    %201 = arith.addf %198, %200 : vector<8x64xf32>
    %cst_133 = arith.constant 0.000000e+00 : f32
    %202 = vector.broadcast %cst_133 : f32 to vector<8x64xf32>
    %203 = arith.maximumf %201, %202 : vector<8x64xf32>
    %204 = arith.truncf %203 : vector<8x64xf32> to vector<8x64xbf16>
    %c0_134 = arith.constant 0 : index
    %c0_135 = arith.constant 0 : index
    %205 = vector.load %arg10[%c0_134, %c0_135] : memref<64x32xbf16, #tpu.memory_space<vmem>>, vector<64x32xbf16>
    %cst_136 = arith.constant dense<0.000000e+00> : vector<8x32xf32>
    %206 = tpu.matmul %204, %205, %cst_136 {dimension_numbers = #tpu.dot_dimension_numbers<[1], [0], [0], [1], [0, 0, 1, 1], [], []>} : vector<8x64xbf16>, vector<64x32xbf16>, vector<8x32xf32> -> vector<8x32xf32>
    %c0_137 = arith.constant 0 : index
    %c0_138 = arith.constant 0 : index
    %207 = vector.load %arg11[%c0_137, %c0_138] : memref<1x32xf32, #tpu.memory_space<vmem>>, vector<1x32xf32>
    %208 = vector.broadcast %207 : vector<1x32xf32> to vector<8x32xf32>
    %209 = arith.addf %206, %208 : vector<8x32xf32>
    %210 = vector.extract_strided_slice %209 {offsets = [0, 0], sizes = [8, 16], strides = [1, 1]} : vector<8x32xf32> to vector<8x16xf32>
    %cst_139 = arith.constant dense<0xFF800000> : vector<8xf32>
    %211 = vector.multi_reduction <maximumf>, %210, %cst_139 [1] : vector<8x16xf32> to vector<8xf32>
    %212 = vector.shape_cast %211 : vector<8xf32> to vector<8x1xf32>
    %213 = vector.broadcast %212 : vector<8x1xf32> to vector<8x16xf32>
    %214 = arith.subf %210, %213 : vector<8x16xf32>
    %215 = math.exp %214 : vector<8x16xf32>
    %cst_140 = arith.constant dense<0.000000e+00> : vector<8xf32>
    %216 = vector.multi_reduction <add>, %215, %cst_140 [1] : vector<8x16xf32> to vector<8xf32>
    %217 = vector.shape_cast %216 : vector<8xf32> to vector<8x1xf32>
    %218 = tpu.reciprocal %217 {approx = true} : vector<8x1xf32> -> vector<8x1xf32>
    %219 = vector.broadcast %218 : vector<8x1xf32> to vector<8x16xf32>
    %220 = arith.mulf %215, %219 : vector<8x16xf32>
    %221 = vector.extract_strided_slice %209 {offsets = [0, 16], sizes = [8, 16], strides = [1, 1]} : vector<8x32xf32> to vector<8x16xf32>
    %cst_141 = arith.constant dense<0xFF800000> : vector<8xf32>
    %222 = vector.multi_reduction <maximumf>, %221, %cst_141 [1] : vector<8x16xf32> to vector<8xf32>
    %223 = vector.shape_cast %222 : vector<8xf32> to vector<8x1xf32>
    %224 = vector.broadcast %223 : vector<8x1xf32> to vector<8x16xf32>
    %225 = arith.subf %221, %224 : vector<8x16xf32>
    %226 = math.exp %225 : vector<8x16xf32>
    %cst_142 = arith.constant dense<0.000000e+00> : vector<8xf32>
    %227 = vector.multi_reduction <add>, %226, %cst_142 [1] : vector<8x16xf32> to vector<8xf32>
    %228 = vector.shape_cast %227 : vector<8xf32> to vector<8x1xf32>
    %229 = tpu.reciprocal %228 {approx = true} : vector<8x1xf32> -> vector<8x1xf32>
    %230 = vector.broadcast %229 : vector<8x1xf32> to vector<8x16xf32>
    %231 = arith.mulf %226, %230 : vector<8x16xf32>
    %232 = vector.extract_strided_slice %195 {offsets = [0, 0], sizes = [8, 16], strides = [1, 1]} : vector<8x32xf32> to vector<8x16xf32>
    %233 = arith.mulf %220, %232 : vector<8x16xf32>
    %cst_143 = arith.constant dense<0.000000e+00> : vector<8xf32>
    %234 = vector.multi_reduction <add>, %233, %cst_143 [1] : vector<8x16xf32> to vector<8xf32>
    %235 = vector.shape_cast %234 : vector<8xf32> to vector<8x1xf32>
    %236 = vector.extract_strided_slice %195 {offsets = [0, 16], sizes = [8, 16], strides = [1, 1]} : vector<8x32xf32> to vector<8x16xf32>
    %237 = arith.mulf %231, %236 : vector<8x16xf32>
    %cst_144 = arith.constant dense<0.000000e+00> : vector<8xf32>
    %238 = vector.multi_reduction <add>, %237, %cst_144 [1] : vector<8x16xf32> to vector<8xf32>
    %239 = vector.shape_cast %238 : vector<8xf32> to vector<8x1xf32>
    %c0_145 = arith.constant 0 : index
    %240 = memref.load %arg12[%c0_145] : memref<2xf32, #tpu.memory_space<smem>>
    %241 = vector.broadcast %240 : f32 to vector<8x1xf32>
    %242 = arith.mulf %235, %241 : vector<8x1xf32>
    %c1_146 = arith.constant 1 : index
    %243 = memref.load %arg12[%c1_146] : memref<2xf32, #tpu.memory_space<smem>>
    %244 = vector.broadcast %243 : f32 to vector<8x1xf32>
    %245 = arith.mulf %239, %244 : vector<8x1xf32>
    %246 = arith.addf %242, %245 : vector<8x1xf32>
    %cst_147 = arith.constant 0.000000e+00 : f32
    %247 = vector.broadcast %cst_147 : f32 to vector<8x93xf32>
    %248 = tpu.concatenate %195, %235, %239, %246, %247 in 1 : vector<8x32xf32>, vector<8x1xf32>, vector<8x1xf32>, vector<8x1xf32>, vector<8x93xf32> -> vector<8x128xf32>
    %c0_148 = arith.constant 0 : index
    %c0_149 = arith.constant 0 : index
    %249 = vector.load %arg13[%c0_148, %c0_149] : memref<8x128xf32, #tpu.memory_space<vmem>>, vector<8x128xf32>
    tpu.vector_store %arg13[%c0_148, %c0_149], %248 {strides = array<i32>} : memref<8x128xf32, #tpu.memory_space<vmem>>, vector<8x128xf32>,
    return
  }
  func.func @transform_0(%arg0: i32) -> (i32, i32) {
    %c0_i32 = arith.constant 0 : i32
    %c0_i32_0 = arith.constant 0 : i32
    return %arg0, %c0_i32 : i32, i32
  }
  func.func @transform_1(%arg0: i32) -> (i32, i32) {
    %c0_i32 = arith.constant 0 : i32
    %c0_i32_0 = arith.constant 0 : i32
    %c0_i32_1 = arith.constant 0 : i32
    return %c0_i32, %c0_i32_0 : i32, i32
  }
  func.func @transform_2(%arg0: i32) -> (i32, i32) {
    %c0_i32 = arith.constant 0 : i32
    %c0_i32_0 = arith.constant 0 : i32
    %c0_i32_1 = arith.constant 0 : i32
    return %c0_i32, %c0_i32_0 : i32, i32
  }
  func.func @transform_3(%arg0: i32) -> (i32, i32, i32) {
    %c0_i32 = arith.constant 0 : i32
    %c0_i32_0 = arith.constant 0 : i32
    %c0_i32_1 = arith.constant 0 : i32
    %c0_i32_2 = arith.constant 0 : i32
    return %c0_i32, %c0_i32_0, %c0_i32_1 : i32, i32, i32
  }
  func.func @transform_4(%arg0: i32) -> (i32, i32) {
    %c0_i32 = arith.constant 0 : i32
    %c0_i32_0 = arith.constant 0 : i32
    %c0_i32_1 = arith.constant 0 : i32
    return %c0_i32, %c0_i32_0 : i32, i32
  }
  func.func @transform_5(%arg0: i32) -> (i32, i32) {
    %c0_i32 = arith.constant 0 : i32
    %c0_i32_0 = arith.constant 0 : i32
    %c0_i32_1 = arith.constant 0 : i32
    return %c0_i32, %c0_i32_0 : i32, i32
  }
  func.func @transform_6(%arg0: i32) -> (i32, i32) {
    %c0_i32 = arith.constant 0 : i32
    %c0_i32_0 = arith.constant 0 : i32
    %c0_i32_1 = arith.constant 0 : i32
    return %c0_i32, %c0_i32_0 : i32, i32
  }
  func.func @transform_7(%arg0: i32) -> (i32, i32) {
    %c0_i32 = arith.constant 0 : i32
    %c0_i32_0 = arith.constant 0 : i32
    %c0_i32_1 = arith.constant 0 : i32
    return %c0_i32, %c0_i32_0 : i32, i32
  }
  func.func @transform_8(%arg0: i32) -> (i32, i32) {
    %c0_i32 = arith.constant 0 : i32
    %c0_i32_0 = arith.constant 0 : i32
    %c0_i32_1 = arith.constant 0 : i32
    return %c0_i32, %c0_i32_0 : i32, i32
  }
  func.func @transform_9(%arg0: i32) -> (i32, i32) {
    %c0_i32 = arith.constant 0 : i32
    %c0_i32_0 = arith.constant 0 : i32
    %c0_i32_1 = arith.constant 0 : i32
    return %c0_i32, %c0_i32_0 : i32, i32
  }
  func.func @transform_10(%arg0: i32) -> (i32, i32) {
    %c0_i32 = arith.constant 0 : i32
    %c0_i32_0 = arith.constant 0 : i32
    %c0_i32_1 = arith.constant 0 : i32
    return %c0_i32, %c0_i32_0 : i32, i32
  }
  func.func @transform_11(%arg0: i32) -> i32 {
    %c0_i32 = arith.constant 0 : i32
    %c0_i32_0 = arith.constant 0 : i32
    return %c0_i32 : i32
  }
  func.func @transform_12(%arg0: i32) -> (i32, i32) {
    %c0_i32 = arith.constant 0 : i32
    %c0_i32_0 = arith.constant 0 : i32
    return %arg0, %c0_i32 : i32, i32
  }
}

</mosaic_0001>

<bundles_post_ra>
// kernel: hierarchical_fairness_moe.1
= control target key start
LH: loop header
LB: loop body
LE: loop exit
PB: predicated region body
PF: predicated region fallthrough
CT: control target
= control target key end

     0   :  { %17 = vsyncpa [#allocation4], 0  ;;  %s8844_s0 = inlined_call_operand.vmem [shape: bf16[8,32], index: 0, kind: input, shape index: {}]   ;;  %s8845_s1 = inlined_call_operand.vmem [shape: bf16[32,4224], index: 1, kind: input, shape index: {}]   ;;  %s8846_s2 = inlined_call_operand.vmem [shape: f32[1,4224], index: 2, kind: input, shape index: {}]   ;;  %s8847_s3 = inlined_call_operand.hbm [shape: bf16[16,256,128], index: 3, kind: input, shape index: {}]   ;;  %s8848_s4 = inlined_call_operand.vmem [shape: f32[1,2048], index: 4, kind: input, shape index: {}]   ;;  %s8849_s5 = inlined_call_operand.vmem [shape: bf16[2048,32], index: 5, kind: input, shape index: {}]   ;;  %s8850_s6 = inlined_call_operand.vmem [shape: f32[1,32], index: 6, kind: input, shape index: {}]   ;;  %s8851_s7 = inlined_call_operand.vmem [shape: bf16[128,64], index: 7, kind: input, shape index: {}]   ;;  %s8852_s8 = inlined_call_operand.vmem [shape: f32[1,64], index: 8, kind: input, shape index: {}]   ;;  %s8853_s9 = inlined_call_operand.vmem [shape: bf16[64,32], index: 9, kind: input, shape index: {}]   ;;  %s8854_s10 = inlined_call_operand.vmem [shape: f32[1,32], index: 10, kind: input, shape index: {}]   ;;  %s8855_s11 = inlined_call_operand.vmem [shape: f32[2], index: 11, kind: input, shape index: {}]   ;;  %s8856_s12 = inlined_call_operand.vmem [shape: f32[8,128], index: 12, kind: output, shape index: {}]  }
   0x1   :  { %s29_s23 = sshll.u32 %s8847_s3, 4  ;;  %s30_s23 = int_to_ptr.hbm [resolvable:$true] %s29_s23 }
   0x2   :  { %18 = vsyncpa [#allocation5], 0  ;;  %s7673_s24 = smov [#allocation3]   ;;  %s57_s28 = sshll.u32 %s8855_s11, 4  ;;  %s58_s28 = int_to_ptr.vmem [resolvable:$true] %s57_s28 }
   0x3   :  { %s31_s25 = sshll.u32 %s7673_s24, 4  ;;  %s7674_s29 = smov 64   ;;  %s32_s25 = int_to_ptr.vmem [resolvable:$true] %s31_s25 }
   0x4   :  { %s7675_s30 = smov 4   ;;  %s7676_s13 = smov [#allocation6]  }
   0x5   :  { %37 = dma.hbm_to_vmem [thread:$0]  %s30_s23, 32768, %s32_s25, [#allocation4], %s7674_s29, %s7674_s29, %s7675_s30  }
   0x6   :  { %60 = dma.vmem_to_smem %s58_s28, 16, %s7676_s13, [#allocation5]  }
   0x7   :  { %7669 = dma.done.wait [#allocation4], 32768  }
   0x8   :  { %7670 = vsyncadd [#allocation4], 4294934528 }
   0x9   :  { %7671 = dma.done.wait [#allocation5], 16  }
   0xa   :  { %7672 = vsyncadd [#allocation5], 4294967280 }
   0xb   :  { %69 = sfence }
   0xc   :  { %v5384_v0 = vld [vmem:[%s8845_s1 + $0x108] sm:$0xf]  ;;  %v7183_v1 = vld [vmem:[%s8845_s1 + $0x188] sm:$0xf0]  ;;  %v5386_v4 = vld [vmem:[%s8845_s1 + $0x18c] sm:$0xf0] }
   0xd   :  { %v7167_v2 = vld [vmem:[%s8845_s1 + $0x10c] sm:$0xf]  ;;  %v5385_v3 = vor.u32 %v7183_v1, %v5384_v0  ;;  %v5392_v5 = vld [vmem:[%s8845_s1 + $0x110] sm:$0xf]  ;;  %v7184_v6 = vld [vmem:[%s8845_s1 + $0x190] sm:$0xf0] }
   0xe   :  { %v5389_v7 = vor.u32 %v7167_v2, %v5386_v4  ;;  %v5393_v8 = vor.u32 %v7184_v6, %v5392_v5  ;;  %v5252_v9 = vld [vmem:[%s8845_s1] sm:$0xf]  ;;  %v7150_v10 = vld [vmem:[%s8845_s1 + $0x80] sm:$0xf0]  ;;  %v5254_v13 = vld [vmem:[%s8845_s1 + $0x84] sm:$0xf0] }
   0xf   :  { %v7134_v11 = vld [vmem:[%s8845_s1 + $0x4] sm:$0xf]  ;;  %558 = vmatpush.bf16.msra.mxu0 %v5385_v3  ;;  %v5253_v12 = vor.u32 %v7150_v10, %v5252_v9  ;;  %v5260_v14 = vld [vmem:[%s8845_s1 + $0x8] sm:$0xf]  ;;  %v7151_v15 = vld [vmem:[%s8845_s1 + $0x88] sm:$0xf0] }
  0x10   :  { %571 = vmatpush.bf16.msra.mxu3 %v5389_v7  ;;  %584 = vmatpush.bf16.msra.mxu2 %v5393_v8  ;;  %v5257_v16 = vor.u32 %v7134_v11, %v5254_v13  ;;  %v5261_v17 = vor.u32 %v7151_v15, %v5260_v14  ;;  %v7169_v18 = vld [vmem:[%s8845_s1 + $0x11c] sm:$0xf]  ;;  %v5402_v19 = vld [vmem:[%s8845_s1 + $0x19c] sm:$0xf0]  ;;  %vm548_vm0 = vcmask 261120   ;;  %vm5172_vm1 = vcmask 523264  }
  0x11   :  { %v5405_v20 = vor.u32 %v7169_v18, %v5402_v19  ;;  %v7794_v21 = vld [vmem:[%s8844_s0] sm:$0xf]  ;;  %v7136_v22 = vld [vmem:[%s8845_s1 + $0x14] sm:$0xf]  ;;  %v5270_v23 = vld [vmem:[%s8845_s1 + $0x94] sm:$0xf0] }
  0x12   :  { %v7168_v24 = vld [vmem:[%s8845_s1 + $0x114] sm:$0xf]  ;;  %v5394_v25 = vld [vmem:[%s8845_s1 + $0x194] sm:$0xf0]  ;;  %v7185_v28 = vld [vmem:[%s8845_s1 + $0x198] sm:$0xf0]  ;;  %v5273_v31 = vor.u32 %v7136_v22, %v5270_v23 }
  0x13   :  { %v5400_v26 = vld [vmem:[%s8845_s1 + $0x118] sm:$0xf]  ;;  %559 = vmatpush.bf16.msra.mxu0 %v5253_v12  ;;  %623 = vmatpush.bf16.msra.mxu1 %v5405_v20  ;;  %v5397_v27 = vor.u32 %v7168_v24, %v5394_v25  ;;  %v5408_v29 = vld [vmem:[%s8845_s1 + $0x120] sm:$0xf]  ;;  %v7186_v30 = vld [vmem:[%s8845_s1 + $0x1a0] sm:$0xf0] }
  0x14   :  { %572 = vmatpush.bf16.msra.mxu3 %v5257_v16  ;;  %585 = vmatpush.bf16.msra.mxu2 %v5261_v17  ;;  %v5401_v32 = vor.u32 %v7185_v28, %v5400_v26  ;;  %v5409_v33 = vor.u32 %v7186_v30, %v5408_v29  ;;  %v7135_v34 = vld [vmem:[%s8845_s1 + $0xc] sm:$0xf]  ;;  %v5262_v35 = vld [vmem:[%s8845_s1 + $0x8c] sm:$0xf0]  ;;  %v7152_v38 = vld [vmem:[%s8845_s1 + $0x90] sm:$0xf0] }
  0x15   :  { %v5268_v36 = vld [vmem:[%s8845_s1 + $0x10] sm:$0xf]  ;;  %v5265_v37 = vor.u32 %v7135_v34, %v5262_v35  ;;  %v5276_v39 = vld [vmem:[%s8845_s1 + $0x18] sm:$0xf]  ;;  %v7153_v40 = vld [vmem:[%s8845_s1 + $0x98] sm:$0xf0] }
  0x16   :  { %5514 = vmatmul.msk.bf16.vlgmr.msra.gmra.mxu0 %vm548_vm0, %v7794_v21  ;;  %v5277_v41 = vor.u32 %v7153_v40, %v5276_v39  ;;  %v7171_v42 = vld [vmem:[%s8845_s1 + $0x12c] sm:$0xf]  ;;  %v5418_v43 = vld [vmem:[%s8845_s1 + $0x1ac] sm:$0xf0]  ;;  %v7138_v44 = vld [vmem:[%s8845_s1 + $0x24] sm:$0xf]  ;;  %v5269_v49 = vor.u32 %v7152_v38, %v5268_v36 }
  0x17   :  { %5515 = vmatmul.msk.bf16.vlgmr.msra.gmra.mxu3 %vm548_vm0, %v7794_v21  ;;  %5516 = vmatmul.msk.bf16.vlgmr.msra.gmra.mxu2 %vm548_vm0, %v7794_v21  ;;  %v5421_v45 = vor.u32 %v7171_v42, %v5418_v43  ;;  %v5286_v46 = vld [vmem:[%s8845_s1 + $0xa4] sm:$0xf0]  ;;  %v7170_v47 = vld [vmem:[%s8845_s1 + $0x124] sm:$0xf]  ;;  %v7187_v52 = vld [vmem:[%s8845_s1 + $0x1a8] sm:$0xf0] }
  0x18   :  { %597 = vmatpush.bf16.msrb.mxu3 %v5397_v27  ;;  %636 = vmatpush.bf16.msrb.mxu2 %v5409_v33  ;;  %v5410_v48 = vld [vmem:[%s8845_s1 + $0x1a4] sm:$0xf0]  ;;  %v5424_v53 = vld [vmem:[%s8845_s1 + $0x130] sm:$0xf]  ;;  %v5289_v54 = vor.u32 %v7138_v44, %v5286_v46  ;;  %v7188_v56 = vld [vmem:[%s8845_s1 + $0x1b0] sm:$0xf0] }
  0x19   :  { %624 = vmatpush.bf16.msra.mxu1 %v5273_v31  ;;  %610 = vmatpush.bf16.msrb.mxu0 %v5401_v32  ;;  %v5413_v50 = vor.u32 %v7170_v47, %v5410_v48  ;;  %v5416_v51 = vld [vmem:[%s8845_s1 + $0x128] sm:$0xf]  ;;  %v7137_v57 = vld [vmem:[%s8845_s1 + $0x1c] sm:$0xf]  ;;  %v5278_v58 = vld [vmem:[%s8845_s1 + $0x9c] sm:$0xf0]  ;;  %v5425_v59 = vor.u32 %v7188_v56, %v5424_v53 }
  0x1a   :  { %v5417_v55 = vor.u32 %v7187_v52, %v5416_v51  ;;  %v5281_v60 = vor.u32 %v7137_v57, %v5278_v58  ;;  %v5284_v61 = vld [vmem:[%s8845_s1 + $0x20] sm:$0xf]  ;;  %v7154_v62 = vld [vmem:[%s8845_s1 + $0xa0] sm:$0xf0]  ;;  %v5292_v63 = vld [vmem:[%s8845_s1 + $0x28] sm:$0xf] }
  0x1b   :  { %v7155_v0 = vld [vmem:[%s8845_s1 + $0xa8] sm:$0xf0]  ;;  %v7173_v1 = vld [vmem:[%s8845_s1 + $0x13c] sm:$0xf]  ;;  %v5434_v2 = vld [vmem:[%s8845_s1 + $0x1bc] sm:$0xf0]  ;;  %v5285_v7 = vor.u32 %v7154_v62, %v5284_v61 }
  0x1c   :  { %598 = vmatpush.bf16.msrb.mxu3 %v5265_v37  ;;  %637 = vmatpush.bf16.msrb.mxu2 %v5277_v41  ;;  %v5293_v3 = vor.u32 %v7155_v0, %v5292_v63  ;;  %v5437_v4 = vor.u32 %v7173_v1, %v5434_v2  ;;  %v7140_v5 = vld [vmem:[%s8845_s1 + $0x34] sm:$0xf]  ;;  %v5302_v6 = vld [vmem:[%s8845_s1 + $0xb4] sm:$0xf0]  ;;  %v7189_v12 = vld [vmem:[%s8845_s1 + $0x1b8] sm:$0xf0] }
  0x1d   :  { %675 = vmatpush.bf16.msrb.mxu1 %v5421_v45  ;;  %611 = vmatpush.bf16.msrb.mxu0 %v5269_v49  ;;  %v5305_v8 = vor.u32 %v7140_v5, %v5302_v6  ;;  %v7172_v9 = vld [vmem:[%s8845_s1 + $0x134] sm:$0xf]  ;;  %v5426_v10 = vld [vmem:[%s8845_s1 + $0x1b4] sm:$0xf0]  ;;  %v5440_v13 = vld [vmem:[%s8845_s1 + $0x140] sm:$0xf] }
  0x1e   :  { %5519 = vmatmul.msk.bf16.vlgmr.msra.gmra.mxu1 %vm548_vm0, %v7794_v21  ;;  %v5432_v11 = vld [vmem:[%s8845_s1 + $0x138] sm:$0xf]  ;;  %v7190_v14 = vld [vmem:[%s8845_s1 + $0x1c0] sm:$0xf0]  ;;  %v7139_v15 = vld [vmem:[%s8845_s1 + $0x2c] sm:$0xf]  ;;  %v5429_v19 = vor.u32 %v7172_v9, %v5426_v10 }
  0x1f   :  { %v5294_v16 = vld [vmem:[%s8845_s1 + $0xac] sm:$0xf0]  ;;  %v7156_v18 = vld [vmem:[%s8845_s1 + $0xb0] sm:$0xf0]  ;;  %v5433_v20 = vor.u32 %v7189_v12, %v5432_v11  ;;  %v5308_v22 = vld [vmem:[%s8845_s1 + $0x38] sm:$0xf]  ;;  %v5441_v24 = vor.u32 %v7190_v14, %v5440_v13 }
  0x20   :  { %649 = vmatpush.bf16.msra.mxu3 %v5413_v50  ;;  %688 = vmatpush.bf16.msra.mxu2 %v5425_v59  ;;  %v5300_v17 = vld [vmem:[%s8845_s1 + $0x30] sm:$0xf]  ;;  %v7157_v23 = vld [vmem:[%s8845_s1 + $0xb8] sm:$0xf0]  ;;  %v7175_v25 = vld [vmem:[%s8845_s1 + $0x14c] sm:$0xf]  ;;  %v5297_v27 = vor.u32 %v7139_v15, %v5294_v16 }
  0x21   :  { %676 = vmatpush.bf16.msrb.mxu1 %v5289_v54  ;;  %662 = vmatpush.bf16.msra.mxu0 %v5417_v55  ;;  %v5450_v26 = vld [vmem:[%s8845_s1 + $0x1cc] sm:$0xf0]  ;;  %v5301_v28 = vor.u32 %v7156_v18, %v5300_v17  ;;  %v5309_v29 = vor.u32 %v7157_v23, %v5308_v22  ;;  %v7142_v31 = vld [vmem:[%s8845_s1 + $0x44] sm:$0xf]  ;;  %v5318_v32 = vld [vmem:[%s8845_s1 + $0xc4] sm:$0xf0] }
  0x22   :  { %v5453_v30 = vor.u32 %v7175_v25, %v5450_v26  ;;  %v5321_v33 = vor.u32 %v7142_v31, %v5318_v32  ;;  %v7174_v34 = vld [vmem:[%s8845_s1 + $0x144] sm:$0xf]  ;;  %v5442_v35 = vld [vmem:[%s8845_s1 + $0x1c4] sm:$0xf0]  ;;  %v7191_v37 = vld [vmem:[%s8845_s1 + $0x1c8] sm:$0xf0] }
  0x23   :  { %v5448_v36 = vld [vmem:[%s8845_s1 + $0x148] sm:$0xf]  ;;  %v5456_v38 = vld [vmem:[%s8845_s1 + $0x150] sm:$0xf]  ;;  %v7192_v39 = vld [vmem:[%s8845_s1 + $0x1d0] sm:$0xf0]  ;;  %v5445_v40 = vor.u32 %v7174_v34, %v5442_v35 }
  0x24   :  { %650 = vmatpush.bf16.msra.mxu3 %v5281_v60  ;;  %689 = vmatpush.bf16.msra.mxu2 %v5293_v3  ;;  %v5449_v41 = vor.u32 %v7191_v37, %v5448_v36  ;;  %v7141_v42 = vld [vmem:[%s8845_s1 + $0x3c] sm:$0xf]  ;;  %v5310_v43 = vld [vmem:[%s8845_s1 + $0xbc] sm:$0xf0]  ;;  %v5457_v44 = vor.u32 %v7192_v39, %v5456_v38  ;;  %v7158_v46 = vld [vmem:[%s8845_s1 + $0xc0] sm:$0xf0] }
  0x25   :  { %727 = vmatpush.bf16.msra.mxu1 %v5437_v4  ;;  %663 = vmatpush.bf16.msra.mxu0 %v5285_v7  ;;  %v5316_v45 = vld [vmem:[%s8845_s1 + $0x40] sm:$0xf]  ;;  %v5324_v47 = vld [vmem:[%s8845_s1 + $0x48] sm:$0xf]  ;;  %v7159_v48 = vld [vmem:[%s8845_s1 + $0xc8] sm:$0xf0]  ;;  %v5313_v51 = vor.u32 %v7141_v42, %v5310_v43 }
  0x26   :  { %5518 = vmatmul.msk.bf16.vlgmr.msrb.gmra.mxu0 %vm548_vm0, %v7794_v21  ;;  %v7177_v49 = vld [vmem:[%s8845_s1 + $0x15c] sm:$0xf]  ;;  %v5466_v50 = vld [vmem:[%s8845_s1 + $0x1dc] sm:$0xf0]  ;;  %v5317_v52 = vor.u32 %v7158_v46, %v5316_v45  ;;  %v5325_v53 = vor.u32 %v7159_v48, %v5324_v47  ;;  %v7144_v55 = vld [vmem:[%s8845_s1 + $0x54] sm:$0xf] }
  0x27   :  { %5517 = vmatmul.msk.bf16.vlgmr.msrb.gmra.mxu3 %vm548_vm0, %v7794_v21  ;;  %5520 = vmatmul.msk.bf16.vlgmr.msrb.gmra.mxu2 %vm548_vm0, %v7794_v21  ;;  %v5469_v54 = vor.u32 %v7177_v49, %v5466_v50  ;;  %v5334_v56 = vld [vmem:[%s8845_s1 + $0xd4] sm:$0xf0]  ;;  %v7176_v58 = vld [vmem:[%s8845_s1 + $0x154] sm:$0xf]  ;;  %v7193_v61 = vld [vmem:[%s8845_s1 + $0x1d8] sm:$0xf0] }
  0x28   :  { %701 = vmatpush.bf16.msrb.mxu3 %v5429_v19  ;;  %740 = vmatpush.bf16.msrb.mxu2 %v5441_v24  ;;  %v5337_v57 = vor.u32 %v7144_v55, %v5334_v56  ;;  %v5458_v59 = vld [vmem:[%s8845_s1 + $0x1d4] sm:$0xf0]  ;;  %v5472_v62 = vld [vmem:[%s8845_s1 + $0x160] sm:$0xf]  ;;  %v7194_v63 = vld [vmem:[%s8845_s1 + $0x1e0] sm:$0xf0] }
  0x29   :  { %728 = vmatpush.bf16.msra.mxu1 %v5305_v8  ;;  %714 = vmatpush.bf16.msrb.mxu0 %v5433_v20  ;;  %v5464_v60 = vld [vmem:[%s8845_s1 + $0x158] sm:$0xf]  ;;  %v5461_v0 = vor.u32 %v7176_v58, %v5458_v59  ;;  %v7179_v2 = vld [vmem:[%s8845_s1 + $0x16c] sm:$0xf]  ;;  %v5482_v3 = vld [vmem:[%s8845_s1 + $0x1ec] sm:$0xf0]  ;;  %v5473_v4 = vor.u32 %v7194_v63, %v5472_v62 }
  0x2a   :  { %v5465_v1 = vor.u32 %v7193_v61, %v5464_v60  ;;  %v7143_v5 = vld [vmem:[%s8845_s1 + $0x4c] sm:$0xf]  ;;  %v5326_v6 = vld [vmem:[%s8845_s1 + $0xcc] sm:$0xf0]  ;;  %v7160_v8 = vld [vmem:[%s8845_s1 + $0xd0] sm:$0xf0]  ;;  %v5485_v11 = vor.u32 %v7179_v2, %v5482_v3 }
  0x2b   :  { %v5332_v7 = vld [vmem:[%s8845_s1 + $0x50] sm:$0xf]  ;;  %v5340_v9 = vld [vmem:[%s8845_s1 + $0x58] sm:$0xf]  ;;  %v7161_v10 = vld [vmem:[%s8845_s1 + $0xd8] sm:$0xf0]  ;;  %v5329_v12 = vor.u32 %v7143_v5, %v5326_v6 }
  0x2c   :  { %702 = vmatpush.bf16.msrb.mxu3 %v5297_v27  ;;  %741 = vmatpush.bf16.msrb.mxu2 %v5309_v29  ;;  %v5333_v13 = vor.u32 %v7160_v8, %v5332_v7  ;;  %v5341_v14 = vor.u32 %v7161_v10, %v5340_v9  ;;  %v7146_v15 = vld [vmem:[%s8845_s1 + $0x64] sm:$0xf]  ;;  %v5350_v16 = vld [vmem:[%s8845_s1 + $0xe4] sm:$0xf0]  ;;  %v5488_v18 = vld [vmem:[%s8845_s1 + $0x170] sm:$0xf] }
  0x2d   :  { %715 = vmatpush.bf16.msrb.mxu0 %v5301_v28  ;;  %v5353_v17 = vor.u32 %v7146_v15, %v5350_v16  ;;  %v7196_v19 = vld [vmem:[%s8845_s1 + $0x1f0] sm:$0xf0]  ;;  %v7178_v20 = vld [vmem:[%s8845_s1 + $0x164] sm:$0xf]  ;;  %v5474_v22 = vld [vmem:[%s8845_s1 + $0x1e4] sm:$0xf0] }
  0x2e   :  { %5523 = vmatmul.msk.bf16.vlgmr.msrb.gmra.mxu1 %vm548_vm0, %v7794_v21  ;;  %v5480_v23 = vld [vmem:[%s8845_s1 + $0x168] sm:$0xf]  ;;  %v7195_v24 = vld [vmem:[%s8845_s1 + $0x1e8] sm:$0xf0]  ;;  %v7181_v25 = vld [vmem:[%s8845_s1 + $0x17c] sm:$0xf]  ;;  %v5489_v27 = vor.u32 %v7196_v19, %v5488_v18  ;;  %v5477_v28 = vor.u32 %v7178_v20, %v5474_v22 }
  0x2f   :  { %779 = vmatpush.bf16.msrb.mxu1 %v5453_v30  ;;  %v5498_v26 = vld [vmem:[%s8845_s1 + $0x1fc] sm:$0xf0]  ;;  %v5481_v29 = vor.u32 %v7195_v24, %v5480_v23  ;;  %v5356_v30 = vld [vmem:[%s8845_s1 + $0x68] sm:$0xf]  ;;  %v7163_v31 = vld [vmem:[%s8845_s1 + $0xe8] sm:$0xf0] }
  0x30   :  { %v7145_v32 = vld [vmem:[%s8845_s1 + $0x5c] sm:$0xf]  ;;  %v5348_v34 = vld [vmem:[%s8845_s1 + $0x60] sm:$0xf]  ;;  %v7162_v35 = vld [vmem:[%s8845_s1 + $0xe0] sm:$0xf0]  ;;  %v5501_v36 = vor.u32 %v7181_v25, %v5498_v26  ;;  %v5357_v37 = vor.u32 %v7163_v31, %v5356_v30 }
  0x31   :  { %v7148_v38 = vld [vmem:[%s8845_s1 + $0x74] sm:$0xf]  ;;  %v5366_v39 = vld [vmem:[%s8845_s1 + $0xf4] sm:$0xf0]  ;;  %v5504_v43 = vld [vmem:[%s8845_s1 + $0x180] sm:$0xf] }
  0x32   :  { %v5369_v42 = vor.u32 %v7148_v38, %v5366_v39  ;;  %v7180_v45 = vld [vmem:[%s8845_s1 + $0x174] sm:$0xf]  ;;  %v5490_v46 = vld [vmem:[%s8845_s1 + $0x1f4] sm:$0xf0]  ;;  %v7197_v48 = vld [vmem:[%s8845_s1 + $0x1f8] sm:$0xf0] }
  0x33   :  { %780 = vmatpush.bf16.msrb.mxu1 %v5321_v33  ;;  %v5342_v33 = vld [vmem:[%s8845_s1 + $0xdc] sm:$0xf0]  ;;  %v5496_v47 = vld [vmem:[%s8845_s1 + $0x178] sm:$0xf]  ;;  %v5493_v50 = vor.u32 %v7180_v45, %v5490_v46  ;;  %v5358_v55 = vld [vmem:[%s8845_s1 + $0xec] sm:$0xf0] }
  0x34   :  { %v5364_v56 = vld [vmem:[%s8845_s1 + $0x70] sm:$0xf]  ;;  %v7207_v58 = vld [vmem:[#allocation3 + $0x38] sm:$0xff]  ;;  %v7205_v63 = vld [vmem:[#allocation3 + $0x28] sm:$0xff]  ;;  %vm5201_vm2 = vcmask 261248   ;;  %vm5189_vm3 = vcmask 130048  }
  0x35   :  { %v7206_v62 = vld [vmem:[#allocation3 + $0x30] sm:$0xff]  ;;  %v5512_v2 = vld [vmem:[%s8845_s1 + $0x188] sm:$0xf]  ;;  %v7199_v3 = vld [vmem:[%s8845_s1 + $0x208] sm:$0xf0]  ;;  %s7133_s19 = sld [smem:[#allocation6 + $0x1]] }
  0x36   :  { %5522 = vmatmul.msk.bf16.vlgmr.msra.gmra.mxu0 %vm548_vm0, %v7794_v21  ;;  %v7215_v5 = vld [vmem:[#allocation3 + $0x78] sm:$0xff]  ;;  %v5513_v7 = vor.u32 %v7199_v3, %v5512_v2  ;;  %v5374_v9 = vld [vmem:[%s8845_s1 + $0xfc] sm:$0xf0]  ;;  %v7202_v16 = vld [vmem:[#allocation3 + $0x10] sm:$0xff]  ;;  %vm5237_vm8 = vcmask 269312   ;;  %vm5239_vm9 = vcmask 277504  }
  0x37   :  { %5521 = vmatmul.msk.bf16.vlgmr.msra.gmra.mxu3 %vm548_vm0, %v7794_v21  ;;  %5524 = vmatmul.msk.bf16.vlgmr.msra.gmra.mxu2 %vm548_vm0, %v7794_v21  ;;  %v7149_v8 = vld [vmem:[%s8845_s1 + $0x7c] sm:$0xf]  ;;  %v5380_v10 = vld [vmem:[%s8845_s1 + $0x80] sm:$0xf]  ;;  %v7201_v18 = vld [vmem:[#allocation3 + $0x8] sm:$0xff]  ;;  %vm5241_vm10 = vcmask 285696  }
  0x38   :  { %753 = vmatpush.bf16.msra.mxu3 %v5445_v40  ;;  %766 = vmatpush.bf16.msra.mxu0 %v5449_v41  ;;  %v5345_v40 = vor.u32 %v7145_v32, %v5342_v33  ;;  %v5349_v41 = vor.u32 %v7162_v35, %v5348_v34  ;;  %v7212_v19 = vld [vmem:[#allocation3 + $0x60] sm:$0xff]  ;;  %v7231_v20 = vld [vmem:[#allocation3 + $0xf8] sm:$0xff]  ;;  %v7230_v26 = vld [vmem:[#allocation3 + $0xf0] sm:$0xff] }
  0x39   :  { %792 = vmatpush.bf16.msra.mxu2 %v5457_v44  ;;  %v7198_v44 = vld [vmem:[%s8845_s1 + $0x200] sm:$0xf0]  ;;  %v7211_v23 = vld [vmem:[#allocation3 + $0x58] sm:$0xff]  ;;  %v7229_v30 = vld [vmem:[#allocation3 + $0xe8] sm:$0xff] }
  0x3a   :  { %v5505_v49 = vor.u32 %v7198_v44, %v5504_v43  ;;  %v7200_v22 = vld [vmem:[#allocation3] sm:$0xff]  ;;  %v7223_v24 = vld [vmem:[#allocation3 + $0xb8] sm:$0xff]  ;;  %v7209_v31 = vld [vmem:[#allocation3 + $0x48] sm:$0xff] }
  0x3b   :  { %v7239_v25 = vld [vmem:[#allocation3 + $0x138] sm:$0xff]  ;;  %v7221_v32 = vld [vmem:[#allocation3 + $0xa8] sm:$0xff]  ;;  %v7228_v34 = vld [vmem:[#allocation3 + $0xe0] sm:$0xff] }
  0x3c   :  { %754 = vmatpush.bf16.msra.mxu3 %v5313_v51  ;;  %767 = vmatpush.bf16.msra.mxu0 %v5317_v52  ;;  %v5372_v51 = vld [vmem:[%s8845_s1 + $0x78] sm:$0xf]  ;;  %v7165_v52 = vld [vmem:[%s8845_s1 + $0xf8] sm:$0xf0]  ;;  %v7237_v33 = vld [vmem:[#allocation3 + $0x128] sm:$0xff] }
  0x3d   :  { %793 = vmatpush.bf16.msra.mxu2 %v5325_v53  ;;  %v5497_v53 = vor.u32 %v7197_v48, %v5496_v47  ;;  %v5373_v59 = vor.u32 %v7165_v52, %v5372_v51  ;;  %v7208_v35 = vld [vmem:[#allocation3 + $0x40] sm:$0xff]  ;;  %v7247_v39 = vld [vmem:[#allocation3 + $0x178] sm:$0xff]  ;;  %v7246_v45 = vld [vmem:[#allocation3 + $0x170] sm:$0xff] }
  0x3e   :  { %5527 = vmatmul.msk.bf16.vlgmr.msra.gmra.mxu1 %vm548_vm0, %v7794_v21  ;;  %v7236_v38 = vld [vmem:[#allocation3 + $0x120] sm:$0xff]  ;;  %v7219_v43 = vld [vmem:[#allocation3 + $0x98] sm:$0xff]  ;;  %v7226_v48 = vld [vmem:[#allocation3 + $0xd0] sm:$0xff] }
  0x3f   :  { %831 = vmatpush.bf16.msra.mxu1 %v5469_v54  ;;  %v7147_v54 = vld [vmem:[%s8845_s1 + $0x6c] sm:$0xf]  ;;  %v7235_v44 = vld [vmem:[#allocation3 + $0x118] sm:$0xff]  ;;  %v7234_v51 = vld [vmem:[#allocation3 + $0x110] sm:$0xff] }
  0x40   :  { %v5361_v60 = vor.u32 %v7147_v54, %v5358_v55  ;;  %v7263_v2 = vld [vmem:[#allocation3 + $0x1f8] sm:$0xff] }
  0x43   :  { %832 = vmatpush.bf16.msra.mxu1 %v5337_v57  ;;  %v7164_v57 = vld [vmem:[%s8845_s1 + $0xf0] sm:$0xf0] }
  0x44   :  { %v5365_v61 = vor.u32 %v7164_v57, %v5364_v56 }
  0x46   :  { %5526 = vmatmul.msk.bf16.vlgmr.msrb.gmra.mxu0 %vm548_vm0, %v7794_v21 }
  0x47   :  { %5525 = vmatmul.msk.bf16.vlgmr.msrb.gmra.mxu3 %vm548_vm0, %v7794_v21  ;;  %5528 = vmatmul.msk.bf16.vlgmr.msrb.gmra.mxu2 %vm548_vm0, %v7794_v21 }
  0x48   :  { %805 = vmatpush.bf16.msrb.mxu3 %v5461_v0  ;;  %818 = vmatpush.bf16.msrb.mxu0 %v5465_v1  ;;  %v7182_v0 = vld [vmem:[%s8845_s1 + $0x184] sm:$0xf]  ;;  %v5506_v1 = vld [vmem:[%s8845_s1 + $0x204] sm:$0xf0] }
  0x49   :  { %844 = vmatpush.bf16.msrb.mxu2 %v5473_v4  ;;  %v7204_v4 = vld [vmem:[#allocation3 + $0x20] sm:$0xff]  ;;  %v5509_v6 = vor.u32 %v7182_v0, %v5506_v1 }
  0x4c   :  { %806 = vmatpush.bf16.msrb.mxu3 %v5329_v12  ;;  %819 = vmatpush.bf16.msrb.mxu0 %v5333_v13  ;;  %v7203_v12 = vld [vmem:[#allocation3 + $0x18] sm:$0xff]  ;;  %v7214_v13 = vld [vmem:[#allocation3 + $0x70] sm:$0xff] }
  0x4d   :  { %845 = vmatpush.bf16.msrb.mxu2 %v5341_v14  ;;  %v5377_v14 = vor.u32 %v7149_v8, %v5374_v9  ;;  %v7243_v9 = vld [vmem:[#allocation3 + $0x158] sm:$0xff] }
  0x4e   :  { %5531 = vmatmul.msk.bf16.vlgmr.msrb.gmra.mxu1 %vm548_vm0, %v7794_v21 }
  0x4f   :  { %883 = vmatpush.bf16.msrb.mxu1 %v5485_v11  ;;  %v7166_v11 = vld [vmem:[%s8845_s1 + $0x100] sm:$0xf0] }
  0x50   :  { %v5381_v15 = vor.u32 %v7166_v11, %v5380_v10  ;;  %v7255_v10 = vld [vmem:[#allocation3 + $0x1b8] sm:$0xff] }
  0x53   :  { %884 = vmatpush.bf16.msrb.mxu1 %v5353_v17  ;;  %v7213_v17 = vld [vmem:[#allocation3 + $0x68] sm:$0xff] }
  0x56   :  { %5530 = vmatmul.msk.bf16.vlgmr.msra.gmra.mxu0 %vm548_vm0, %v7794_v21 }
  0x57   :  { %5529 = vmatmul.msk.bf16.vlgmr.msra.gmra.mxu3 %vm548_vm0, %v7794_v21  ;;  %5532 = vmatmul.msk.bf16.vlgmr.msra.gmra.mxu2 %vm548_vm0, %v7794_v21 }
  0x58   :  { %896 = vmatpush.bf16.msra.mxu2 %v5489_v27  ;;  %857 = vmatpush.bf16.msra.mxu3 %v5477_v28  ;;  %v7210_v27 = vld [vmem:[#allocation3 + $0x50] sm:$0xff] }
  0x59   :  { %870 = vmatpush.bf16.msra.mxu0 %v5481_v29  ;;  %v7222_v28 = vld [vmem:[#allocation3 + $0xb0] sm:$0xff] }
  0x5a   :  { %v7238_v29 = vld [vmem:[#allocation3 + $0x130] sm:$0xff] }
  0x5c   :  { %897 = vmatpush.bf16.msra.mxu2 %v5357_v37  ;;  %858 = vmatpush.bf16.msra.mxu3 %v5345_v40  ;;  %v7220_v37 = vld [vmem:[#allocation3 + $0xa0] sm:$0xff] }
  0x5d   :  { %871 = vmatpush.bf16.msra.mxu0 %v5349_v41 }
  0x5e   :  { %5535 = vmatmul.msk.bf16.vlgmr.msra.gmra.mxu1 %vm548_vm0, %v7794_v21 }
  0x5f   :  { %935 = vmatpush.bf16.msra.mxu1 %v5501_v36  ;;  %v8215_v36 = vld [vmem:[%s8846_s2] sm:$0xff] }
  0x60   :  { %v150_v40 = vperm.slane %v8215_v36, 0  ;;  %v151_v47 = vperm.slane %v8215_v36, 1  ;;  %v155_v0 = vperm.slane %v8215_v36, 5  ;;  %v154_v1 = vperm.slane %v8215_v36, 4 }
  0x63   :  { %936 = vmatpush.bf16.msra.mxu1 %v5369_v42  ;;  %v7227_v42 = vld [vmem:[#allocation3 + $0xd8] sm:$0xff] }
  0x66   :  { %5534 = vmatmul.msk.bf16.vlgmr.msrb.gmra.mxu0 %vm548_vm0, %v7794_v21 }
  0x67   :  { %5533 = vmatmul.msk.bf16.vlgmr.msrb.gmra.mxu3 %vm548_vm0, %v7794_v21  ;;  %5536 = vmatmul.msk.bf16.vlgmr.msrb.gmra.mxu2 %vm548_vm0, %v7794_v21 }
  0x68   :  { %948 = vmatpush.bf16.msrb.mxu2 %v5505_v49  ;;  %909 = vmatpush.bf16.msrb.mxu3 %v5493_v50  ;;  %v7218_v50 = vld [vmem:[#allocation3 + $0x90] sm:$0xff] }
  0x69   :  { %922 = vmatpush.bf16.msrb.mxu0 %v5497_v53  ;;  %v7245_v53 = vld [vmem:[#allocation3 + $0x168] sm:$0xff] }
  0x6c   :  { %949 = vmatpush.bf16.msrb.mxu2 %v5373_v59  ;;  %910 = vmatpush.bf16.msrb.mxu3 %v5361_v60  ;;  %v7217_v60 = vld [vmem:[#allocation3 + $0x88] sm:$0xff] }
  0x6d   :  { %923 = vmatpush.bf16.msrb.mxu0 %v5365_v61  ;;  %v7233_v61 = vld [vmem:[#allocation3 + $0x108] sm:$0xff] }
  0x6e   :  { %5539 = vmatmul.msk.bf16.vlgmr.msrb.gmra.mxu1 %vm548_vm0, %v7794_v21 }
  0x6f   :  { %1170 = vmatpush.bf16.msrb.mxu1 %v7207_v58  ;;  %v7225_v58 = vld [vmem:[#allocation3 + $0xc8] sm:$0xff] }
  0x73   :  { %1171 = vmatpush.bf16.msrb.mxu1 %v7206_v62 }
  0x76   :  { %5538 = vmatmul.msk.bf16.vlgmr.msra.gmra.mxu0 %vm548_vm0, %v7794_v21 }
  0x77   :  { %1172 = vmatpush.bf16.msrb.mxu1 %v7205_v63  ;;  %5537 = vmatmul.msk.bf16.vlgmr.msra.gmra.mxu3 %vm548_vm0, %v7794_v21  ;;  %v7224_v63 = vld [vmem:[#allocation3 + $0xc0] sm:$0xff] }
  0x78   :  { %5540 = vmatmul.msk.bf16.vlgmr.msra.gmra.mxu2 %vm548_vm0, %v7794_v21  ;;  %961 = vmatpush.bf16.msra.mxu3 %v5509_v6  ;;  %v7216_v6 = vld [vmem:[#allocation3 + $0x80] sm:$0xff] }
  0x79   :  { %1183 = vmatpush.bf16.msra.mxu2 %v7215_v5  ;;  %974 = vmatpush.bf16.msra.mxu0 %v5513_v7  ;;  %v7232_v7 = vld [vmem:[#allocation3 + $0x100] sm:$0xff] }
  0x7b   :  { %1173 = vmatpush.bf16.msrb.mxu1 %v7204_v4 }
  0x7c   :  { %962 = vmatpush.bf16.msra.mxu3 %v5377_v14  ;;  %v152_v14 = vperm.slane %v8215_v36, 2 }
  0x7d   :  { %1184 = vmatpush.bf16.msra.mxu2 %v7214_v13  ;;  %975 = vmatpush.bf16.msra.mxu0 %v5381_v15 }
  0x7e   :  { %5543 = vmatmul.msk.bf16.vlgmr.msra.gmra.mxu1 %vm548_vm0, %v7794_v21 }
  0x7f   :  { %1174 = vmatpush.bf16.msrb.mxu1 %v7203_v12 }
  0x81   :  { %1185 = vmatpush.bf16.msra.mxu2 %v7213_v17 }
  0x83   :  { %1175 = vmatpush.bf16.msrb.mxu1 %v7202_v16 }
  0x85   :  { %1186 = vmatpush.bf16.msra.mxu2 %v7212_v19  ;;  %v7262_v19 = vld [vmem:[#allocation3 + $0x1f0] sm:$0xff] }
  0x86   :  { %5542 = vmatmul.msk.bf16.vlgmr.msrb.gmra.mxu0 %vm548_vm0, %v7794_v21 }
  0x87   :  { %1176 = vmatpush.bf16.msrb.mxu1 %v7201_v18  ;;  %5541 = vmatmul.msk.bf16.vlgmr.msrb.gmra.mxu3 %vm548_vm0, %v7794_v21  ;;  %v7271_v18 = vld [vmem:[#allocation3 + $0x238] sm:$0xff] }
  0x88   :  { %1352 = vmatpush.bf16.msrb.mxu0 %v7231_v20  ;;  %1339 = vmatpush.bf16.msrb.mxu3 %v7223_v24  ;;  %v7242_v20 = vld [vmem:[#allocation3 + $0x150] sm:$0xff] }
  0x89   :  { %1187 = vmatpush.bf16.msra.mxu2 %v7211_v23 }
  0x8a   :  { %5544 = vmatmul.msk.bf16.vlgmr.msrb.gmra.mxu2 %vm548_vm0, %v7794_v21 }
  0x8b   :  { %1177 = vmatpush.bf16.msrb.mxu1 %v7200_v22  ;;  %v7254_v22 = vld [vmem:[#allocation3 + $0x1b0] sm:$0xff] }
  0x8c   :  { %1353 = vmatpush.bf16.msrb.mxu0 %v7230_v26  ;;  %1340 = vmatpush.bf16.msrb.mxu3 %v7222_v28  ;;  %v153_v26 = vperm.slane %v8215_v36, 3  ;;  %v7261_v28 = vld [vmem:[#allocation3 + $0x1e8] sm:$0xff] }
  0x8d   :  { %1188 = vmatpush.bf16.msra.mxu2 %v7210_v27  ;;  %v7270_v27 = vld [vmem:[#allocation3 + $0x230] sm:$0xff] }
  0x8f   :  { %1508 = vmatpush.bf16.msra.mxu1 %v7239_v25 }
  0x90   :  { %1354 = vmatpush.bf16.msrb.mxu0 %v7229_v30  ;;  %1341 = vmatpush.bf16.msrb.mxu3 %v7221_v32  ;;  %v7253_v32 = vld [vmem:[#allocation3 + $0x1a8] sm:$0xff] }
  0x91   :  { %1189 = vmatpush.bf16.msra.mxu2 %v7209_v31  ;;  %v7241_v31 = vld [vmem:[#allocation3 + $0x148] sm:$0xff] }
  0x93   :  { %1509 = vmatpush.bf16.msra.mxu1 %v7238_v29  ;;  %v561_v41 = vpop.f32.mrf.mxu0 }
  0x94   :  { %1355 = vmatpush.bf16.msrb.mxu0 %v7228_v34  ;;  %1342 = vmatpush.bf16.msrb.mxu3 %v7220_v37  ;;  %v562_v46 = vadd.f32 %v561_v41, %v150_v40  ;;  %v7269_v40 = vld [vmem:[#allocation3 + $0x228] sm:$0xff]  ;;  %v7260_v41 = vld [vmem:[#allocation3 + $0x1e0] sm:$0xff] }
  0x95   :  { %1190 = vmatpush.bf16.msra.mxu2 %v7208_v35 }
  0x96   :  { %5546 = vmatmul.msk.bf16.vlgmr.msra.gmra.mxu0 %vm548_vm0, %v7794_v21  ;;  %v981_v55 = vmax.f32 %v562_v46, 0.0 }
  0x97   :  { %1510 = vmatpush.bf16.msra.mxu1 %v7237_v33  ;;  %5545 = vmatmul.msk.bf16.vlgmr.msra.gmra.mxu3 %vm548_vm0, %v7794_v21  ;;  %v7244_v21 = vld [vmem:[#allocation3 + $0x160] sm:$0xff] }
  0x98   :  { %1356 = vmatpush.bf16.msrb.mxu0 %v7227_v42  ;;  %1343 = vmatpush.bf16.msrb.mxu3 %v7219_v43  ;;  %v7240_v43 = vld [vmem:[#allocation3 + $0x140] sm:$0xff] }
  0x99   :  { %1521 = vmatpush.bf16.msrb.mxu2 %v7247_v39  ;;  %v8230_v39 = vld [vmem:[%s8846_s2 + $0x8] sm:$0xff] }
  0x9a   :  { %v574_v52 = vpop.f32.mrf.mxu3  ;;  %v587_v54 = vpop.f32.mrf.mxu2 }
  0x9b   :  { %1511 = vmatpush.bf16.msra.mxu1 %v7236_v38  ;;  %v626_v49 = vpop.f32.mrf.mxu1  ;;  %v575_v56 = vadd.f32 %v574_v52, %v151_v47  ;;  %v563_v57 = vpop.f32.mrf.mxu0  ;;  %v588_v23 = vadd.f32 %v587_v54, %v152_v14  ;;  %v7259_v52 = vld [vmem:[#allocation3 + $0x1d8] sm:$0xff] }
  0x9c   :  { %1357 = vmatpush.bf16.msrb.mxu0 %v7226_v48  ;;  %1344 = vmatpush.bf16.msrb.mxu3 %v7218_v50  ;;  %v627_v16 = vadd.f32 %v626_v49, %v155_v0  ;;  %v7279_v49 = vld [vmem:[#allocation3 + $0x278] sm:$0xff]  ;;  %v7268_v50 = vld [vmem:[#allocation3 + $0x220] sm:$0xff]  ;;  %v156_v57 = vperm.slane %v8215_v36, 6 }
  0x9d   :  { %1522 = vmatpush.bf16.msrb.mxu2 %v7246_v45  ;;  %v982_v59 = vmax.f32 %v575_v56, 0.0  ;;  %v983_v34 = vmax.f32 %v588_v23, 0.0  ;;  %v159_v45 = vperm.slane %v8230_v39, 1 }
  0x9e   :  { %v986_v25 = vmax.f32 %v627_v16, 0.0 }
  0x9f   :  { %1512 = vmatpush.bf16.msra.mxu1 %v7235_v44  ;;  %v1014_v62 = vpack.c.bf16 %v982_v59, %v981_v55  ;;  %v7252_v44 = vld [vmem:[#allocation3 + $0x1a0] sm:$0xff] }
  0xa0   :  { %1358 = vmatpush.bf16.msrb.mxu0 %v7225_v58  ;;  %1345 = vmatpush.bf16.msrb.mxu3 %v7217_v60  ;;  %v7251_v58 = vld [vmem:[#allocation3 + $0x198] sm:$0xff] }
  0xa1   :  { %1523 = vmatpush.bf16.msrb.mxu2 %v7245_v53  ;;  %v1068_v4 = vunpack.c.l.b16 %v1014_v62  ;;  %v1069_v5 = vunpack.c.h.b16 %v1014_v62 }
  0xa2   :  { %v576_v8 = vpop.f32.mrf.mxu3  ;;  %v589_v11 = vpop.f32.mrf.mxu2 }
  0xa3   :  { %1513 = vmatpush.bf16.msra.mxu1 %v7234_v51  ;;  %v628_v3 = vpop.f32.mrf.mxu1  ;;  %v1070_v12 = vpack.c.b16 %v1068_v4, %v1068_v4  ;;  %v1071_v13 = vpack.c.b16 %v1069_v5, %v1069_v5  ;;  %v613_v15 = vpop.f32.mrf.mxu0  ;;  %v158_v51 = vperm.slane %v8230_v39, 0  ;;  %v7258_v4 = vld [vmem:[#allocation3 + $0x1d0] sm:$0xff]  ;;  %v7277_v11 = vld [vmem:[#allocation3 + $0x268] sm:$0xff] }
  0xa4   :  { %1359 = vmatpush.bf16.msrb.mxu0 %v7224_v63  ;;  %v614_v17 = vadd.f32 %v613_v15, %v154_v1  ;;  %1346 = vmatpush.bf16.msrb.mxu3 %v7216_v6  ;;  %v7278_v3 = vld [vmem:[#allocation3 + $0x270] sm:$0xff]  ;;  %v7249_v15 = vld [vmem:[#allocation3 + $0x188] sm:$0xff] }
  0xa5   :  { %1524 = vmatpush.bf16.msrb.mxu2 %v7244_v21  ;;  %1178 = vmatmul.bf16.vlgmr.msrb.gmra.mxu1 %v1070_v12  ;;  %v7250_v5 = vld [vmem:[#allocation3 + $0x190] sm:$0xff] }
  0xa6   :  { %v985_v24 = vmax.f32 %v614_v17, 0.0  ;;  %1191 = vmatmul.bf16.vlgmr.msra.gmra.mxu2 %v1071_v13  ;;  %v7257_v13 = vld [vmem:[#allocation3 + $0x1c8] sm:$0xff] }
  0xa7   :  { %1514 = vmatpush.bf16.msra.mxu1 %v7233_v61 }
  0xa8   :  { %1690 = vmatpush.bf16.msra.mxu0 %v7263_v2  ;;  %1677 = vmatpush.bf16.msra.mxu3 %v7255_v10  ;;  %v1016_v35 = vpack.c.bf16 %v986_v25, %v985_v24  ;;  %v7267_v2 = vld [vmem:[#allocation3 + $0x218] sm:$0xff]  ;;  %v7266_v10 = vld [vmem:[#allocation3 + $0x210] sm:$0xff]  ;;  %v7256_v24 = vld [vmem:[#allocation3 + $0x1c0] sm:$0xff] }
  0xa9   :  { %1525 = vmatpush.bf16.msrb.mxu2 %v7243_v9  ;;  %v157_v9 = vperm.slane %v8215_v36, 7  ;;  %v7265_v36 = vld [vmem:[#allocation3 + $0x208] sm:$0xff]  ;;  %v7248_v25 = vld [vmem:[#allocation3 + $0x180] sm:$0xff] }
  0xaa   :  { %v600_v30 = vpop.f32.mrf.mxu3  ;;  %v639_v33 = vpop.f32.mrf.mxu2  ;;  %v1406_v46 = vunpack.c.l.b16 %v1016_v35  ;;  %v1407_v47 = vunpack.c.h.b16 %v1016_v35  ;;  %v7303_v35 = vld [vmem:[#allocation3 + $0x338] sm:$0xff] }
  0xab   :  { %1515 = vmatpush.bf16.msra.mxu1 %v7232_v7  ;;  %v678_v29 = vpop.f32.mrf.mxu1  ;;  %v601_v37 = vadd.f32 %v600_v30, %v153_v26  ;;  %v615_v38 = vpop.f32.mrf.mxu0  ;;  %v640_v6 = vadd.f32 %v639_v33, %v156_v57  ;;  %v7295_v26 = vld [vmem:[#allocation3 + $0x2f8] sm:$0xff]  ;;  %v7264_v30 = vld [vmem:[#allocation3 + $0x200] sm:$0xff] }
  0xac   :  { %1691 = vmatpush.bf16.msra.mxu0 %v7262_v19  ;;  %1678 = vmatpush.bf16.msra.mxu3 %v7254_v22  ;;  %v679_v59 = vadd.f32 %v678_v29, %v159_v45  ;;  %v1408_v61 = vpack.c.b16 %v1406_v46, %v1406_v46  ;;  %v1409_v21 = vpack.c.b16 %v1407_v47, %v1407_v47  ;;  %v7276_v22 = vld [vmem:[#allocation3 + $0x260] sm:$0xff]  ;;  %v7287_v29 = vld [vmem:[#allocation3 + $0x2b8] sm:$0xff]  ;;  %v7274_v45 = vld [vmem:[#allocation3 + $0x250] sm:$0xff] }
  0xad   :  { %1526 = vmatpush.bf16.msrb.mxu2 %v7242_v20  ;;  %v984_v42 = vmax.f32 %v601_v37, 0.0  ;;  %v987_v17 = vmax.f32 %v640_v6, 0.0  ;;  %v7294_v46 = vld [vmem:[#allocation3 + $0x2f0] sm:$0xff]  ;;  %v7272_v57 = vld [vmem:[#allocation3 + $0x240] sm:$0xff] }
  0xae   :  { %v990_v8 = vmax.f32 %v679_v59, 0.0  ;;  %v7302_v47 = vld [vmem:[#allocation3 + $0x330] sm:$0xff] }
  0xaf   :  { %1846 = vmatpush.bf16.msrb.mxu1 %v7271_v18  ;;  %v1015_v48 = vpack.c.bf16 %v984_v42, %v983_v34 }
  0xb0   :  { %1692 = vmatpush.bf16.msra.mxu0 %v7261_v28  ;;  %1679 = vmatpush.bf16.msra.mxu3 %v7253_v32 }
  0xb1   :  { %1527 = vmatpush.bf16.msrb.mxu2 %v7241_v31  ;;  %v1237_v54 = vunpack.c.l.b16 %v1015_v48  ;;  %v1238_v55 = vunpack.c.h.b16 %v1015_v48  ;;  %v7275_v31 = vld [vmem:[#allocation3 + $0x258] sm:$0xff]  ;;  %v7285_v48 = vld [vmem:[#allocation3 + $0x2a8] sm:$0xff] }
  0xb2   :  { %v602_v56 = vpop.f32.mrf.mxu3  ;;  %v641_v60 = vpop.f32.mrf.mxu2 }
  0xb3   :  { %1847 = vmatpush.bf16.msrb.mxu1 %v7270_v27  ;;  %v680_v53 = vpop.f32.mrf.mxu1  ;;  %v1239_v62 = vpack.c.b16 %v1237_v54, %v1237_v54  ;;  %v1240_v63 = vpack.c.b16 %v1238_v55, %v1238_v55  ;;  %v665_v0 = vpop.f32.mrf.mxu0  ;;  %v7284_v56 = vld [vmem:[#allocation3 + $0x2a0] sm:$0xff]  ;;  %v160_v60 = vperm.slane %v8230_v39, 2 }
  0xb4   :  { %1693 = vmatpush.bf16.msra.mxu0 %v7260_v41  ;;  %1680 = vmatpush.bf16.msra.mxu3 %v7252_v44  ;;  %v666_v1 = vadd.f32 %v665_v0, %v158_v51  ;;  %v7286_v44 = vld [vmem:[#allocation3 + $0x2b0] sm:$0xff]  ;;  %v163_v0 = vperm.slane %v8230_v39, 5 }
  0xb5   :  { %1528 = vmatpush.bf16.msrb.mxu2 %v7240_v43  ;;  %1347 = vmatmul.bf16.vlgmr.msrb.gmra.mxu3 %v1239_v62  ;;  %v7311_v62 = vld [vmem:[#allocation3 + $0x378] sm:$0xff] }
  0xb6   :  { %1360 = vmatmul.bf16.vlgmr.msrb.gmra.mxu0 %v1240_v63  ;;  %v989_v7 = vmax.f32 %v666_v1, 0.0  ;;  %1516 = vmatmul.bf16.vlgmr.msra.gmra.mxu1 %v1408_v61  ;;  %v161_v61 = vperm.slane %v8230_v39, 3  ;;  %v162_v63 = vperm.slane %v8230_v39, 4  ;;  %v7283_v1 = vld [vmem:[#allocation3 + $0x298] sm:$0xff] }
  0xb7   :  { %1848 = vmatpush.bf16.msrb.mxu1 %v7269_v40 }
  0xb8   :  { %1694 = vmatpush.bf16.msra.mxu0 %v7259_v52  ;;  %1681 = vmatpush.bf16.msra.mxu3 %v7251_v58  ;;  %v8240_v18 = vpack.c.bf16 %v990_v8, %v989_v7  ;;  %v7301_v52 = vld [vmem:[#allocation3 + $0x328] sm:$0xff]  ;;  %v7292_v58 = vld [vmem:[#allocation3 + $0x2e0] sm:$0xff]  ;;  %v7299_v7 = vld [vmem:[#allocation3 + $0x318] sm:$0xff] }
  0xb9   :  { %1859 = vmatpush.bf16.msra.mxu2 %v7279_v49  ;;  %v7273_v49 = vld [vmem:[#allocation3 + $0x248] sm:$0xff]  ;;  %v7310_v8 = vld [vmem:[#allocation3 + $0x370] sm:$0xff] }
  0xba   :  { %1529 = vmatmul.bf16.vlgmr.msrb.gmra.mxu2 %v1409_v21  ;;  %v652_v14 = vpop.f32.mrf.mxu3  ;;  %v8238_v16 = vpop.f32.mrf.mxu2  ;;  %v1744_v27 = vunpack.c.l.b16 %v8240_v18  ;;  %v1745_v59 = vunpack.c.h.b16 %v8240_v18  ;;  %v7300_v21 = vld [vmem:[#allocation3 + $0x320] sm:$0xff] }
  0xbb   :  { %1849 = vmatpush.bf16.msrb.mxu1 %v7268_v50  ;;  %v8236_v12 = vpop.f32.mrf.mxu1  ;;  %v653_v19 = vadd.f32 %v652_v14, %v157_v9  ;;  %v667_v20 = vpop.f32.mrf.mxu0  ;;  %v7293_v50 = vld [vmem:[#allocation3 + $0x2e8] sm:$0xff] }
  0xbc   :  { %1695 = vmatpush.bf16.msra.mxu0 %v7258_v4  ;;  %1682 = vmatpush.bf16.msra.mxu3 %v7250_v5  ;;  %v1746_v40 = vpack.c.b16 %v1744_v27, %v1744_v27  ;;  %v1747_v4 = vpack.c.b16 %v1745_v59, %v1745_v59  ;;  %v692_v5 = vadd.f32 %v8238_v16, %v160_v60  ;;  %v7298_v16 = vld [vmem:[#allocation3 + $0x310] sm:$0xff]  ;;  %v7309_v20 = vld [vmem:[#allocation3 + $0x368] sm:$0xff]  ;;  %v7308_v27 = vld [vmem:[#allocation3 + $0x360] sm:$0xff] }
  0xbd   :  { %1860 = vmatpush.bf16.msra.mxu2 %v7278_v3  ;;  %v988_v23 = vmax.f32 %v653_v19, 0.0  ;;  %v7325_v59 = vld [vmem:[#allocation3 + $0x3e8] sm:$0xff] }
  0xbe   :  { %v991_v18 = vmax.f32 %v692_v5, 0.0  ;;  %v7333_v60 = vld [vmem:[#allocation3 + $0x428] sm:$0xff]  ;;  %v7332_v5 = vld [vmem:[#allocation3 + $0x420] sm:$0xff] }
  0xbf   :  { %1850 = vmatpush.bf16.msrb.mxu1 %v7267_v2  ;;  %v1017_v28 = vpack.c.bf16 %v988_v23, %v987_v17  ;;  %v7291_v2 = vld [vmem:[#allocation3 + $0x2d8] sm:$0xff]  ;;  %v7290_v17 = vld [vmem:[#allocation3 + $0x2d0] sm:$0xff]  ;;  %v7281_v23 = vld [vmem:[#allocation3 + $0x288] sm:$0xff] }
  0xc0   :  { %1696 = vmatpush.bf16.msra.mxu0 %v7257_v13  ;;  %1683 = vmatpush.bf16.msra.mxu3 %v7249_v15  ;;  %v7282_v15 = vld [vmem:[#allocation3 + $0x290] sm:$0xff] }
  0xc1   :  { %1861 = vmatpush.bf16.msra.mxu2 %v7277_v11  ;;  %v1575_v33 = vunpack.c.l.b16 %v1017_v28  ;;  %v1576_v34 = vunpack.c.h.b16 %v1017_v28 }
  0xc2   :  { %v654_v37 = vpop.f32.mrf.mxu3  ;;  %v693_v38 = vpop.f32.mrf.mxu2 }
  0xc3   :  { %1851 = vmatpush.bf16.msrb.mxu1 %v7266_v10  ;;  %v732_v32 = vpop.f32.mrf.mxu1  ;;  %v1577_v41 = vpack.c.b16 %v1575_v33, %v1575_v33  ;;  %v1578_v42 = vpack.c.b16 %v1576_v34, %v1576_v34  ;;  %v717_v43 = vpop.f32.mrf.mxu0  ;;  %v731_v10 = vadd.f32 %v8236_v12, %v163_v0  ;;  %v7289_v12 = vld [vmem:[#allocation3 + $0x2c8] sm:$0xff]  ;;  %v7288_v33 = vld [vmem:[#allocation3 + $0x2c0] sm:$0xff]  ;;  %v7319_v34 = vld [vmem:[#allocation3 + $0x3b8] sm:$0xff] }
  0xc4   :  { %1697 = vmatpush.bf16.msra.mxu0 %v7256_v24  ;;  %1684 = vmatpush.bf16.msra.mxu3 %v7248_v25  ;;  %v718_v9 = vadd.f32 %v717_v43, %v162_v63  ;;  %v7280_v32 = vld [vmem:[#allocation3 + $0x280] sm:$0xff]  ;;  %v7335_v43 = vld [vmem:[#allocation3 + $0x438] sm:$0xff] }
  0xc5   :  { %1862 = vmatpush.bf16.msra.mxu2 %v7276_v22  ;;  %v994_v22 = vmax.f32 %v731_v10, 0.0  ;;  %v7296_v38 = vld [vmem:[#allocation3 + $0x300] sm:$0xff] }
  0xc6   :  { %v7304_v63 = vld [vmem:[#allocation3 + $0x340] sm:$0xff] }
  0xc7   :  { %1852 = vmatpush.bf16.msrb.mxu1 %v7265_v36  ;;  %1685 = vmatmul.bf16.vlgmr.msra.gmra.mxu3 %v1577_v41  ;;  %v993_v36 = vmax.f32 %v718_v9, 0.0  ;;  %v7343_v9 = vld [vmem:[#allocation3 + $0x478] sm:$0xff] }
  0xc8   :  { %2028 = vmatpush.bf16.msrb.mxu0 %v7295_v26  ;;  %2015 = vmatpush.bf16.msrb.mxu3 %v7287_v29  ;;  %v7297_v26 = vld [vmem:[#allocation3 + $0x308] sm:$0xff] }
  0xc9   :  { %1863 = vmatpush.bf16.msra.mxu2 %v7275_v31  ;;  %1698 = vmatmul.bf16.vlgmr.msra.gmra.mxu0 %v1578_v42  ;;  %v8258_v28 = vpack.c.bf16 %v994_v22, %v993_v36  ;;  %v7327_v42 = vld [vmem:[#allocation3 + $0x3f8] sm:$0xff]  ;;  %v7314_v36 = vld [vmem:[#allocation3 + $0x390] sm:$0xff] }
  0xca   :  { %v704_v53 = vpop.f32.mrf.mxu3  ;;  %v8245_v54 = vpop.f32.mrf.mxu2 }
  0xcb   :  { %1853 = vmatpush.bf16.msrb.mxu1 %v7264_v30  ;;  %v8243_v51 = vpop.f32.mrf.mxu1  ;;  %v719_v55 = vpop.f32.mrf.mxu0  ;;  %v705_v6 = vadd.f32 %v704_v53, %v161_v61  ;;  %v2082_v41 = vunpack.c.l.b16 %v8258_v28  ;;  %v7334_v53 = vld [vmem:[#allocation3 + $0x430] sm:$0xff]  ;;  %v2083_v0 = vunpack.c.h.b16 %v8258_v28 }
  0xcc   :  { %2016 = vmatpush.bf16.msrb.mxu3 %v7286_v44  ;;  %2029 = vmatpush.bf16.msrb.mxu0 %v7294_v46  ;;  %v7318_v44 = vld [vmem:[#allocation3 + $0x3b0] sm:$0xff] }
  0xcd   :  { %1864 = vmatpush.bf16.msra.mxu2 %v7274_v45  ;;  %v992_v19 = vmax.f32 %v705_v6, 0.0  ;;  %v8270_v61 = vld [vmem:[%s8846_s2 + $0x10] sm:$0xff] }
  0xce   :  { %1854 = vmatmul.bf16.vlgmr.msrb.gmra.mxu1 %v1746_v40  ;;  %v7307_v40 = vld [vmem:[#allocation3 + $0x358] sm:$0xff] }
  0xcf   :  { %2184 = vmatpush.bf16.msra.mxu1 %v7303_v35  ;;  %v1019_v25 = vpack.c.bf16 %v992_v19, %v991_v18  ;;  %v7331_v18 = vld [vmem:[#allocation3 + $0x418] sm:$0xff] }
  0xd0   :  { %2017 = vmatpush.bf16.msrb.mxu3 %v7285_v48  ;;  %2030 = vmatpush.bf16.msrb.mxu0 %v7293_v50  ;;  %v7306_v48 = vld [vmem:[#allocation3 + $0x350] sm:$0xff] }
  0xd1   :  { %1865 = vmatpush.bf16.msra.mxu2 %v7273_v49  ;;  %v1913_v35 = vunpack.c.l.b16 %v1019_v25  ;;  %v1914_v37 = vunpack.c.h.b16 %v1019_v25  ;;  %v2084_v49 = vpack.c.b16 %v2082_v41, %v2082_v41  ;;  %v7322_v25 = vld [vmem:[#allocation3 + $0x3d0] sm:$0xff]  ;;  %v7351_v41 = vld [vmem:[#allocation3 + $0x4b8] sm:$0xff] }
  0xd2   :  { %v706_v11 = vpop.f32.mrf.mxu3  ;;  %v745_v13 = vpop.f32.mrf.mxu2 }
  0xd3   :  { %2185 = vmatpush.bf16.msra.mxu1 %v7302_v47  ;;  %v784_v3 = vpop.f32.mrf.mxu1  ;;  %v8254_v14 = vpop.f32.mrf.mxu0  ;;  %v1915_v46 = vpack.c.b16 %v1913_v35, %v1913_v35  ;;  %v1916_v47 = vpack.c.b16 %v1914_v37, %v1914_v37  ;;  %v7315_v11 = vld [vmem:[#allocation3 + $0x398] sm:$0xff]  ;;  %v2085_v13 = vpack.c.b16 %v2083_v0, %v2083_v0  ;;  %v7340_v37 = vld [vmem:[#allocation3 + $0x460] sm:$0xff]  ;;  %v7358_v0 = vld [vmem:[#allocation3 + $0x4f0] sm:$0xff] }
  0xd4   :  { %2018 = vmatpush.bf16.msrb.mxu3 %v7284_v56  ;;  %2031 = vmatpush.bf16.msrb.mxu0 %v7292_v58  ;;  %v7305_v58 = vld [vmem:[#allocation3 + $0x348] sm:$0xff] }
  0xd5   :  { %1866 = vmatpush.bf16.msra.mxu2 %v7272_v57  ;;  %v7317_v57 = vld [vmem:[#allocation3 + $0x3a8] sm:$0xff] }
  0xd7   :  { %2186 = vmatpush.bf16.msra.mxu1 %v7301_v52  ;;  %v7326_v52 = vld [vmem:[#allocation3 + $0x3f0] sm:$0xff] }
  0xd8   :  { %1867 = vmatmul.bf16.vlgmr.msra.gmra.mxu2 %v1747_v4  ;;  %2019 = vmatpush.bf16.msrb.mxu3 %v7283_v1  ;;  %v164_v1 = vperm.slane %v8230_v39, 6  ;;  %v7324_v4 = vld [vmem:[#allocation3 + $0x3e0] sm:$0xff] }
  0xd9   :  { %2197 = vmatpush.bf16.msrb.mxu2 %v7311_v62  ;;  %2032 = vmatpush.bf16.msrb.mxu0 %v7291_v2  ;;  %v165_v2 = vperm.slane %v8230_v39, 7 }
  0xda   :  { %v8260_v29 = vpop.f32.mrf.mxu3  ;;  %v8262_v30 = vpop.f32.mrf.mxu2  ;;  %v744_v39 = vadd.f32 %v8245_v54, %v164_v1  ;;  %v7366_v1 = vld [vmem:[#allocation3 + $0x530] sm:$0xff] }
  0xdb   :  { %2187 = vmatpush.bf16.msra.mxu1 %v7300_v21  ;;  %v8256_v24 = vpop.f32.mrf.mxu1  ;;  %v771_v31 = vpop.f32.mrf.mxu0  ;;  %v7316_v21 = vld [vmem:[#allocation3 + $0x3a0] sm:$0xff] }
  0xdc   :  { %2020 = vmatpush.bf16.msrb.mxu3 %v7282_v15  ;;  %v757_v15 = vadd.f32 %v8260_v29, %v165_v2 }
  0xdd   :  { %2198 = vmatpush.bf16.msrb.mxu2 %v7310_v8  ;;  %2033 = vmatpush.bf16.msrb.mxu0 %v7290_v17  ;;  %v167_v8 = vperm.slane %v8270_v61, 1  ;;  %v7323_v17 = vld [vmem:[#allocation3 + $0x3d8] sm:$0xff] }
  0xdf   :  { %2188 = vmatpush.bf16.msra.mxu1 %v7299_v7  ;;  %v166_v7 = vperm.slane %v8270_v61, 0 }
  0xe0   :  { %2021 = vmatpush.bf16.msrb.mxu3 %v7281_v23  ;;  %v995_v23 = vmax.f32 %v744_v39, 0.0 }
  0xe1   :  { %2199 = vmatpush.bf16.msrb.mxu2 %v7309_v20  ;;  %2034 = vmatpush.bf16.msrb.mxu0 %v7289_v12  ;;  %v770_v19 = vadd.f32 %v8254_v14, %v166_v7  ;;  %v7342_v20 = vld [vmem:[#allocation3 + $0x470] sm:$0xff]  ;;  %v996_v12 = vmax.f32 %v757_v15, 0.0  ;;  %v7341_v14 = vld [vmem:[#allocation3 + $0x468] sm:$0xff] }
  0xe2   :  { %v758_v50 = vpop.f32.mrf.mxu3  ;;  %v797_v55 = vpop.f32.mrf.mxu2 }
  0xe3   :  { %2189 = vmatpush.bf16.msra.mxu1 %v7298_v16  ;;  %v836_v45 = vpop.f32.mrf.mxu1  ;;  %v8265_v56 = vpop.f32.mrf.mxu0  ;;  %v783_v16 = vadd.f32 %v8243_v51, %v167_v8  ;;  %v997_v28 = vmax.f32 %v770_v19, 0.0  ;;  %v7313_v51 = vld [vmem:[#allocation3 + $0x388] sm:$0xff]  ;;  %v7339_v50 = vld [vmem:[#allocation3 + $0x458] sm:$0xff] }
  0xe4   :  { %2022 = vmatpush.bf16.msrb.mxu3 %v7280_v32  ;;  %v1021_v32 = vpack.c.bf16 %v996_v12, %v995_v23  ;;  %v7328_v45 = vld [vmem:[#allocation3 + $0x400] sm:$0xff]  ;;  %v7367_v55 = vld [vmem:[#allocation3 + $0x538] sm:$0xff]  ;;  %v7349_v8 = vld [vmem:[#allocation3 + $0x4a8] sm:$0xff] }
  0xe5   :  { %2200 = vmatpush.bf16.msrb.mxu2 %v7308_v27  ;;  %2035 = vmatpush.bf16.msrb.mxu0 %v7288_v33  ;;  %v998_v29 = vmax.f32 %v783_v16, 0.0  ;;  %v7321_v33 = vld [vmem:[#allocation3 + $0x3c8] sm:$0xff]  ;;  %v7348_v16 = vld [vmem:[#allocation3 + $0x4a0] sm:$0xff] }
  0xe7   :  { %2190 = vmatpush.bf16.msra.mxu1 %v7297_v26  ;;  %2023 = vmatmul.bf16.vlgmr.msrb.gmra.mxu3 %v1915_v46  ;;  %v7330_v26 = vld [vmem:[#allocation3 + $0x410] sm:$0xff]  ;;  %v8289_v35 = vpack.c.bf16 %v998_v29, %v997_v28  ;;  %v170_v29 = vperm.slane %v8270_v61, 4 }
  0xe8   :  { %2353 = vmatpush.bf16.msra.mxu3 %v7319_v34  ;;  %2036 = vmatmul.bf16.vlgmr.msrb.gmra.mxu0 %v1916_v47  ;;  %v7329_v34 = vld [vmem:[#allocation3 + $0x408] sm:$0xff] }
  0xe9   :  { %2201 = vmatpush.bf16.msrb.mxu2 %v7307_v40  ;;  %2366 = vmatpush.bf16.msra.mxu0 %v7327_v42  ;;  %v2251_v42 = vunpack.c.l.b16 %v1021_v32  ;;  %v2420_v47 = vunpack.c.l.b16 %v8289_v35  ;;  %v2421_v12 = vunpack.c.h.b16 %v8289_v35  ;;  %v7355_v35 = vld [vmem:[#allocation3 + $0x4d8] sm:$0xff] }
  0xea   :  { %v8277_v3 = vpop.f32.mrf.mxu3  ;;  %v8279_v6 = vpop.f32.mrf.mxu2 }
  0xeb   :  { %2191 = vmatpush.bf16.msra.mxu1 %v7296_v38  ;;  %v8272_v62 = vpop.f32.mrf.mxu1  ;;  %v823_v10 = vpop.f32.mrf.mxu0  ;;  %v7312_v38 = vld [vmem:[#allocation3 + $0x380] sm:$0xff] }
  0xec   :  { %2354 = vmatpush.bf16.msra.mxu3 %v7318_v44  ;;  %v7320_v44 = vld [vmem:[#allocation3 + $0x3c0] sm:$0xff]  ;;  %v7337_v10 = vld [vmem:[#allocation3 + $0x448] sm:$0xff] }
  0xed   :  { %2202 = vmatpush.bf16.msrb.mxu2 %v7306_v48  ;;  %2367 = vmatpush.bf16.msra.mxu0 %v7326_v52  ;;  %v2252_v48 = vunpack.c.h.b16 %v1021_v32  ;;  %v7359_v52 = vld [vmem:[#allocation3 + $0x4f8] sm:$0xff] }
  0xee   :  { %2192 = vmatmul.bf16.vlgmr.msra.gmra.mxu1 %v2084_v49  ;;  %v8297_v49 = vld [vmem:[%s8846_s2 + $0x18] sm:$0xff] }
  0xef   :  { %2522 = vmatpush.bf16.msrb.mxu1 %v7335_v43  ;;  %v178_v2 = vperm.slane %v8297_v49, 4  ;;  %v177_v23 = vperm.slane %v8297_v49, 3  ;;  %v7347_v32 = vld [vmem:[#allocation3 + $0x498] sm:$0xff] }
  0xf0   :  { %2355 = vmatpush.bf16.msra.mxu3 %v7317_v57  ;;  %v179_v57 = vperm.slane %v8297_v49, 5 }
  0xf1   :  { %2203 = vmatpush.bf16.msrb.mxu2 %v7305_v58  ;;  %2368 = vmatpush.bf16.msra.mxu0 %v7325_v59  ;;  %v2253_v58 = vpack.c.b16 %v2251_v42, %v2251_v42  ;;  %v7350_v59 = vld [vmem:[#allocation3 + $0x4b0] sm:$0xff]  ;;  %v7363_v42 = vld [vmem:[#allocation3 + $0x518] sm:$0xff] }
  0xf2   :  { %v810_v54 = vpop.f32.mrf.mxu3  ;;  %v849_v27 = vpop.f32.mrf.mxu2 }
  0xf3   :  { %2523 = vmatpush.bf16.msrb.mxu1 %v7334_v53  ;;  %v888_v22 = vpop.f32.mrf.mxu1  ;;  %v8287_v31 = vpop.f32.mrf.mxu0  ;;  %v168_v54 = vperm.slane %v8270_v61, 2  ;;  %v7375_v27 = vld [vmem:[#allocation3 + $0x578] sm:$0xff] }
  0xf4   :  { %2356 = vmatpush.bf16.msra.mxu3 %v7316_v21  ;;  %v2254_v21 = vpack.c.b16 %v2252_v48, %v2252_v48  ;;  %v7356_v22 = vld [vmem:[#allocation3 + $0x4e0] sm:$0xff] }
  0xf5   :  { %2204 = vmatpush.bf16.msrb.mxu2 %v7304_v63  ;;  %2369 = vmatpush.bf16.msra.mxu0 %v7324_v4  ;;  %v7338_v63 = vld [vmem:[#allocation3 + $0x450] sm:$0xff] }
  0xf7   :  { %2524 = vmatpush.bf16.msrb.mxu1 %v7333_v60  ;;  %v2422_v60 = vpack.c.b16 %v2420_v47, %v2420_v47 }
  0xf8   :  { %2205 = vmatmul.bf16.vlgmr.msrb.gmra.mxu2 %v2085_v13  ;;  %2357 = vmatpush.bf16.msra.mxu3 %v7315_v11  ;;  %v7357_v11 = vld [vmem:[#allocation3 + $0x4e8] sm:$0xff]  ;;  %v176_v13 = vperm.slane %v8297_v49, 2 }
  0xf9   :  { %2535 = vmatpush.bf16.msra.mxu2 %v7343_v9  ;;  %2370 = vmatpush.bf16.msra.mxu0 %v7323_v17  ;;  %v7365_v17 = vld [vmem:[#allocation3 + $0x528] sm:$0xff] }
  0xfa   :  { %v8291_v43 = vpop.f32.mrf.mxu3 }
  0xfb   :  { %2525 = vmatpush.bf16.msrb.mxu1 %v7332_v5  ;;  %v938_v40 = vpop.f32.mrf.mxu1  ;;  %v899_v46 = vpop.f32.mrf.mxu2 }
  0xfc   :  { %2358 = vmatpush.bf16.msra.mxu3 %v7314_v36  ;;  %v875_v53 = vpop.f32.mrf.mxu0  ;;  %v939_v4 = vadd.f32 %v938_v40, %v179_v57  ;;  %v7336_v36 = vld [vmem:[#allocation3 + $0x440] sm:$0xff]  ;;  %v796_v40 = vadd.f32 %v8262_v30, %v168_v54  ;;  %v7373_v57 = vld [vmem:[#allocation3 + $0x568] sm:$0xff] }
  0xfd   :  { %2536 = vmatpush.bf16.msra.mxu2 %v7342_v20  ;;  %2371 = vmatpush.bf16.msra.mxu0 %v7322_v25  ;;  %v900_v20 = vadd.f32 %v899_v46, %v176_v13  ;;  %v169_v25 = vperm.slane %v8270_v61, 3  ;;  %v7354_v53 = vld [vmem:[#allocation3 + $0x4d0] sm:$0xff] }
  0xfe   :  { %v999_v30 = vmax.f32 %v796_v40, 0.0  ;;  %v7380_v40 = vld [vmem:[#allocation3 + $0x5a0] sm:$0xff] }
  0xff   :  { %2526 = vmatpush.bf16.msrb.mxu1 %v7331_v18  ;;  %v1010_v18 = vmax.f32 %v939_v4, 0.0 }
 0x100   :  { %2359 = vmatpush.bf16.msra.mxu3 %v7313_v51 }
 0x101   :  { %2537 = vmatpush.bf16.msra.mxu2 %v7341_v14  ;;  %2372 = vmatpush.bf16.msra.mxu0 %v7321_v33  ;;  %v171_v14 = vperm.slane %v8270_v61, 5  ;;  %v1007_v33 = vmax.f32 %v900_v20, 0.0 }
 0x102   :  { %v862_v7 = vpop.f32.mrf.mxu3 }
 0x103   :  { %2527 = vmatpush.bf16.msrb.mxu1 %v7330_v26  ;;  %v940_v5 = vpop.f32.mrf.mxu1  ;;  %v901_v9 = vpop.f32.mrf.mxu2  ;;  %v7364_v26 = vld [vmem:[#allocation3 + $0x520] sm:$0xff]  ;;  %v835_v46 = vadd.f32 %v8256_v24, %v171_v14  ;;  %v7345_v24 = vld [vmem:[#allocation3 + $0x488] sm:$0xff]  ;;  %v7398_v14 = vld [vmem:[#allocation3 + $0x630] sm:$0xff] }
 0x104   :  { %2360 = vmatpush.bf16.msra.mxu3 %v7312_v38  ;;  %v925_v39 = vpop.f32.mrf.mxu0  ;;  %v2423_v38 = vpack.c.b16 %v2421_v12, %v2421_v12  ;;  %v7344_v7 = vld [vmem:[#allocation3 + $0x480] sm:$0xff] }
 0x105   :  { %2538 = vmatpush.bf16.msra.mxu2 %v7340_v37  ;;  %2373 = vmatpush.bf16.msra.mxu0 %v7320_v44  ;;  %v926_v15 = vadd.f32 %v925_v39, %v178_v2  ;;  %v7374_v44 = vld [vmem:[#allocation3 + $0x570] sm:$0xff]  ;;  %v7372_v2 = vld [vmem:[#allocation3 + $0x560] sm:$0xff] }
 0x107   :  { %2528 = vmatpush.bf16.msrb.mxu1 %v7329_v34  ;;  %2361 = vmatmul.bf16.vlgmr.msra.gmra.mxu3 %v2253_v58  ;;  %v1009_v19 = vmax.f32 %v926_v15, 0.0  ;;  %v7360_v15 = vld [vmem:[#allocation3 + $0x500] sm:$0xff] }
 0x108   :  { %2691 = vmatpush.bf16.msrb.mxu3 %v7351_v41  ;;  %2374 = vmatmul.bf16.vlgmr.msra.gmra.mxu0 %v2254_v21  ;;  %v809_v41 = vadd.f32 %v8277_v3, %v169_v25  ;;  %v7362_v3 = vld [vmem:[#allocation3 + $0x510] sm:$0xff]  ;;  %v180_v21 = vperm.slane %v8297_v49, 6 }
 0x109   :  { %2539 = vmatpush.bf16.msra.mxu2 %v7339_v50  ;;  %2704 = vmatpush.bf16.msrb.mxu0 %v7359_v52  ;;  %v8306_v28 = vpack.c.bf16 %v1010_v18, %v1009_v19  ;;  %v7346_v50 = vld [vmem:[#allocation3 + $0x490] sm:$0xff]  ;;  %v7391_v19 = vld [vmem:[#allocation3 + $0x5f8] sm:$0xff] }
 0x10a   :  { %v912_v51 = vpop.f32.mrf.mxu3 }
 0x10b   :  { %2529 = vmatpush.bf16.msrb.mxu1 %v7328_v45  ;;  %v913_v34 = vadd.f32 %v912_v51, %v177_v23  ;;  %v822_v45 = vadd.f32 %v8265_v56, %v170_v29  ;;  %v7390_v29 = vld [vmem:[#allocation3 + $0x5f0] sm:$0xff] }
 0x10c   :  { %2692 = vmatpush.bf16.msrb.mxu3 %v7350_v59  ;;  %v927_v37 = vpop.f32.mrf.mxu0  ;;  %v1002_v59 = vmax.f32 %v835_v46, 0.0  ;;  %v173_v46 = vperm.slane %v8270_v61, 7 }
 0x10d   :  { %2540 = vmatpush.bf16.msra.mxu2 %v7338_v63  ;;  %2705 = vmatpush.bf16.msrb.mxu0 %v7358_v0  ;;  %v1008_v47 = vmax.f32 %v913_v34, 0.0  ;;  %v951_v48 = vpop.f32.mrf.mxu2  ;;  %v1001_v58 = vmax.f32 %v822_v45, 0.0  ;;  %v7369_v34 = vld [vmem:[#allocation3 + $0x548] sm:$0xff] }
 0x10e   :  { %2530 = vmatmul.bf16.vlgmr.msrb.gmra.mxu1 %v2422_v60  ;;  %v7353_v60 = vld [vmem:[#allocation3 + $0x4c8] sm:$0xff]  ;;  %v952_v9 = vadd.f32 %v951_v48, %v180_v21  ;;  %v7388_v48 = vld [vmem:[#allocation3 + $0x5e0] sm:$0xff] }
 0x10f   :  { %2860 = vmatpush.bf16.msra.mxu1 %v7367_v55  ;;  %v8314_v52 = vpack.c.bf16 %v1008_v47, %v1007_v33  ;;  %v1000_v55 = vmax.f32 %v809_v41, 0.0  ;;  %v8319_v4 = vpack.c.bf16 %v1002_v59, %v1001_v58  ;;  %v7381_v33 = vld [vmem:[#allocation3 + $0x5a8] sm:$0xff]  ;;  %v172_v41 = vperm.slane %v8270_v61, 6  ;;  %v7602_v47 = vld [vmem:[%s8848_s4] ss:$0 sm:$0xff] }
 0x110   :  { %2693 = vmatpush.bf16.msrb.mxu3 %v7349_v8  ;;  %v7352_v8 = vld [vmem:[#allocation3 + $0x4c0] sm:$0xff]  ;;  %v7397_v37 = vld [vmem:[#allocation3 + $0x628] sm:$0xff]  ;;  %v861_v61 = vadd.f32 %v8291_v43, %v173_v46  ;;  %v7422_v46 = vld [vmem:[#allocation3 + $0x6f0] sm:$0xff] }
 0x111   :  { %2541 = vmatpush.bf16.msra.mxu2 %v7337_v10  ;;  %2706 = vmatpush.bf16.msrb.mxu0 %v7357_v11  ;;  %v1023_v0 = vpack.c.bf16 %v1000_v55, %v999_v30  ;;  %v7383_v10 = vld [vmem:[#allocation3 + $0x5b8] sm:$0xff]  ;;  %v181_v11 = vperm.slane %v8297_v49, 7  ;;  %v2758_v18 = vunpack.c.l.b16 %v8319_v4  ;;  %v2759_v45 = vunpack.c.h.b16 %v8319_v4 }
 0x112   :  { %v914_v56 = vpop.f32.mrf.mxu3  ;;  %v175_v30 = vperm.slane %v8297_v49, 1  ;;  %v7407_v55 = vld [vmem:[#allocation3 + $0x678] sm:$0xff] }
 0x113   :  { %2861 = vmatpush.bf16.msra.mxu1 %v7366_v1  ;;  %v7361_v1 = vld [vmem:[#allocation3 + $0x508] sm:$0xff]  ;;  %v2589_v13 = vunpack.c.l.b16 %v1023_v0  ;;  %v2590_v39 = vunpack.c.h.b16 %v1023_v0  ;;  %v2761_v58 = vpack.c.b16 %v2759_v45, %v2759_v45  ;;  %v7387_v56 = vld [vmem:[#allocation3 + $0x5d8] sm:$0xff]  ;;  %v7406_v0 = vld [vmem:[#allocation3 + $0x670] sm:$0xff] }
 0x114   :  { %2694 = vmatpush.bf16.msrb.mxu3 %v7348_v16  ;;  %v8317_v63 = vpop.f32.mrf.mxu0  ;;  %v7399_v16 = vld [vmem:[#allocation3 + $0x638] sm:$0xff]  ;;  %v887_v21 = vadd.f32 %v8272_v62, %v175_v30  ;;  %v7402_v45 = vld [vmem:[#allocation3 + $0x650] sm:$0xff] }
 0x115   :  { %2542 = vmatpush.bf16.msra.mxu2 %v7336_v36  ;;  %2707 = vmatpush.bf16.msrb.mxu0 %v7356_v22  ;;  %v953_v5 = vpop.f32.mrf.mxu2  ;;  %v1011_v36 = vmax.f32 %v952_v9, 0.0  ;;  %v7382_v22 = vld [vmem:[#allocation3 + $0x5b0] sm:$0xff]  ;;  %v2591_v54 = vpack.c.b16 %v2589_v13, %v2589_v13  ;;  %v2592_v25 = vpack.c.b16 %v2590_v39, %v2590_v39  ;;  %v7385_v39 = vld [vmem:[#allocation3 + $0x5c8] sm:$0xff] }
 0x116   :  { %v1004_v5 = vmax.f32 %v861_v61, 0.0  ;;  %v7421_v61 = vld [vmem:[#allocation3 + $0x6e8] sm:$0xff] }
 0x117   :  { %2862 = vmatpush.bf16.msra.mxu1 %v7365_v17  ;;  %v7371_v17 = vld [vmem:[#allocation3 + $0x558] sm:$0xff] }
 0x118   :  { %2543 = vmatmul.bf16.vlgmr.msra.gmra.mxu2 %v2423_v38  ;;  %2695 = vmatpush.bf16.msrb.mxu3 %v7347_v32 }
 0x119   :  { %2873 = vmatpush.bf16.msrb.mxu2 %v7375_v27  ;;  %2708 = vmatpush.bf16.msrb.mxu0 %v7355_v35  ;;  %v2760_v27 = vpack.c.b16 %v2758_v18, %v2758_v18  ;;  %v7389_v35 = vld [vmem:[#allocation3 + $0x5e8] sm:$0xff] }
 0x11a   :  { %v964_v20 = vpop.f32.mrf.mxu3 }
 0x11b   :  { %2863 = vmatpush.bf16.msra.mxu1 %v7364_v26  ;;  %v965_v23 = vadd.f32 %v964_v20, %v181_v11  ;;  %v7370_v26 = vld [vmem:[#allocation3 + $0x550] sm:$0xff]  ;;  %v7377_v11 = vld [vmem:[#allocation3 + $0x588] sm:$0xff]  ;;  %v7376_v20 = vld [vmem:[#allocation3 + $0x580] sm:$0xff] }
 0x11c   :  { %2696 = vmatpush.bf16.msrb.mxu3 %v7346_v50  ;;  %v979_v12 = vpop.f32.mrf.mxu0  ;;  %v7396_v50 = vld [vmem:[#allocation3 + $0x620] sm:$0xff] }
 0x11d   :  { %2874 = vmatpush.bf16.msrb.mxu2 %v7374_v44  ;;  %2709 = vmatpush.bf16.msrb.mxu0 %v7354_v53  ;;  %v1012_v51 = vmax.f32 %v965_v23, 0.0  ;;  %v7368_v44 = vld [vmem:[#allocation3 + $0x540] sm:$0xff]  ;;  %v174_v53 = vperm.slane %v8297_v49, 0  ;;  %v7415_v23 = vld [vmem:[#allocation3 + $0x6b8] sm:$0xff] }
 0x11f   :  { %2864 = vmatpush.bf16.msra.mxu1 %v7363_v42  ;;  %v8323_v32 = vpack.c.bf16 %v1012_v51, %v1011_v36  ;;  %v7603_v36 = vld [vmem:[%s8848_s4 + $0x2] ss:$0 sm:$0xff]  ;;  %v7423_v51 = vld [vmem:[#allocation3 + $0x6f8] sm:$0xff] }
 0x120   :  { %2697 = vmatpush.bf16.msrb.mxu3 %v7345_v24  ;;  %v7395_v24 = vld [vmem:[#allocation3 + $0x618] sm:$0xff] }
 0x121   :  { %2875 = vmatpush.bf16.msrb.mxu2 %v7373_v57  ;;  %2710 = vmatpush.bf16.msrb.mxu0 %v7353_v60  ;;  %v848_v57 = vadd.f32 %v8279_v6, %v172_v41  ;;  %v874_v60 = vadd.f32 %v8287_v31, %v174_v53  ;;  %v7378_v6 = vld [vmem:[#allocation3 + $0x590] sm:$0xff]  ;;  %v7405_v31 = vld [vmem:[#allocation3 + $0x668] sm:$0xff] }
 0x122   :  { %v966_v38 = vpop.f32.mrf.mxu3  ;;  %v1179_v42 = vpop.f32.mrf.mxu1  ;;  %v7430_v53 = vld [vmem:[#allocation3 + $0x730] sm:$0xff] }
 0x123   :  { %2865 = vmatpush.bf16.msra.mxu1 %v7362_v3  ;;  %v7379_v3 = vld [vmem:[#allocation3 + $0x598] sm:$0xff]  ;;  %v1180_v59 = vadd.f32 %v7602_v47, %v1179_v42  ;;  %v1003_v4 = vmax.f32 %v848_v57, 0.0  ;;  %v1005_v9 = vmax.f32 %v874_v60, 0.0  ;;  %v7413_v57 = vld [vmem:[#allocation3 + $0x6a8] sm:$0xff] }
 0x124   :  { %2698 = vmatpush.bf16.msrb.mxu3 %v7344_v7  ;;  %v7386_v7 = vld [vmem:[#allocation3 + $0x5d0] sm:$0xff] }
 0x125   :  { %2876 = vmatpush.bf16.msrb.mxu2 %v7372_v2  ;;  %2711 = vmatpush.bf16.msrb.mxu0 %v7352_v8  ;;  %v7394_v8 = vld [vmem:[#allocation3 + $0x610] sm:$0xff]  ;;  %v1025_v13 = vpack.c.bf16 %v1004_v5, %v1003_v4  ;;  %v7428_v4 = vld [vmem:[#allocation3 + $0x720] sm:$0xff]  ;;  %v7439_v5 = vld [vmem:[#allocation3 + $0x778] sm:$0xff] }
 0x127   :  { %2866 = vmatpush.bf16.msra.mxu1 %v7361_v1  ;;  %2699 = vmatmul.bf16.vlgmr.msrb.gmra.mxu3 %v2591_v54  ;;  %v2927_v12 = vunpack.c.l.b16 %v1025_v13  ;;  %v7384_v54 = vld [vmem:[#allocation3 + $0x5c0] sm:$0xff] }
 0x128   :  { %3029 = vmatpush.bf16.msra.mxu3 %v7383_v10  ;;  %2712 = vmatmul.bf16.vlgmr.msrb.gmra.mxu0 %v2592_v25  ;;  %v1006_v10 = vmax.f32 %v887_v21, 0.0  ;;  %v7392_v25 = vld [vmem:[#allocation3 + $0x600] sm:$0xff] }
 0x129   :  { %2877 = vmatpush.bf16.msrb.mxu2 %v7371_v17  ;;  %3042 = vmatpush.bf16.msra.mxu0 %v7391_v19  ;;  %v1192_v49 = vpop.f32.mrf.mxu2  ;;  %v7404_v19 = vld [vmem:[#allocation3 + $0x660] sm:$0xff] }
 0x12a   :  { %v1193_v1 = vadd.f32 %v1192_v49, %v1180_v59  ;;  %v1181_v2 = vpop.f32.mrf.mxu1  ;;  %v8337_v17 = vpack.c.bf16 %v1006_v10, %v1005_v9  ;;  %v7412_v21 = vld [vmem:[#allocation3 + $0x6a0] sm:$0xff]  ;;  %v7419_v9 = vld [vmem:[#allocation3 + $0x6d8] sm:$0xff] }
 0x12b   :  { %2867 = vmatpush.bf16.msra.mxu1 %v7360_v15  ;;  %v7393_v15 = vld [vmem:[#allocation3 + $0x608] sm:$0xff] }
 0x12c   :  { %3030 = vmatpush.bf16.msra.mxu3 %v7382_v22  ;;  %v1196_v43 = vmax.f32 %v1193_v1, 0.0  ;;  %v7420_v1 = vld [vmem:[#allocation3 + $0x6e0] sm:$0xff] }
 0x12d   :  { %2878 = vmatpush.bf16.msrb.mxu2 %v7370_v26  ;;  %3043 = vmatpush.bf16.msra.mxu0 %v7390_v29  ;;  %v7604_v26 = vld [vmem:[%s8848_s4 + $0x1] ss:$0 sm:$0xff]  ;;  %v2928_v29 = vunpack.c.h.b16 %v1025_v13 }
 0x12e   :  { %2868 = vmatmul.bf16.vlgmr.msra.gmra.mxu1 %v2760_v27  ;;  %v1197_v62 = vpack.c.bf16 %v1196_v43, %v1196_v43  ;;  %v3096_v27 = vunpack.c.l.b16 %v8337_v17 }
 0x12f   :  { %3198 = vmatpush.bf16.msrb.mxu1 %v7399_v16  ;;  %v2930_v42 = vpack.c.b16 %v2928_v29, %v2928_v29  ;;  %v7408_v29 = vld [vmem:[#allocation3 + $0x680] sm:$0xff] }
 0x130   :  { %3031 = vmatpush.bf16.msra.mxu3 %v7381_v33  ;;  %1198 = vst [vmem:[#allocation2] sm:$0xf] %v1197_v62  ;;  %v7431_v33 = vld [vmem:[#allocation3 + $0x738] sm:$0xff]  ;;  %v3098_v41 = vpack.c.b16 %v3096_v27, %v3096_v27  ;;  %v7438_v62 = vld [vmem:[#allocation3 + $0x770] sm:$0xff]  ;;  %v7605_v27 = vld [vmem:[%s8848_s4 + $0x4] ss:$0 sm:$0xff] }
 0x131   :  { %2879 = vmatpush.bf16.msrb.mxu2 %v7369_v34  ;;  %3044 = vmatpush.bf16.msra.mxu0 %v7389_v35  ;;  %v1194_v18 = vpop.f32.mrf.mxu2  ;;  %v2929_v35 = vpack.c.b16 %v2927_v12, %v2927_v12 }
 0x133   :  { %3199 = vmatpush.bf16.msrb.mxu1 %v7398_v14  ;;  %v1361_v16 = vpop.f32.mrf.mxu0  ;;  %v1517_v22 = vpop.f32.mrf.mxu1  ;;  %v7403_v14 = vld [vmem:[#allocation3 + $0x658] sm:$0xff] }
 0x134   :  { %3032 = vmatpush.bf16.msra.mxu3 %v7380_v40  ;;  %v7414_v40 = vld [vmem:[#allocation3 + $0x6b0] sm:$0xff] }
 0x135   :  { %2880 = vmatpush.bf16.msrb.mxu2 %v7368_v44  ;;  %3045 = vmatpush.bf16.msra.mxu0 %v7388_v48 }
 0x137   :  { %3200 = vmatpush.bf16.msrb.mxu1 %v7397_v37  ;;  %v1518_v37 = vadd.f32 %v7603_v36, %v1517_v22  ;;  %v7409_v22 = vld [vmem:[#allocation3 + $0x688] sm:$0xff] }
 0x138   :  { %2881 = vmatmul.bf16.vlgmr.msrb.gmra.mxu2 %v2761_v58  ;;  %3033 = vmatpush.bf16.msra.mxu3 %v7379_v3  ;;  %v1348_v34 = vpop.f32.mrf.mxu3  ;;  %v7401_v58 = vld [vmem:[#allocation3 + $0x648] sm:$0xff] }
 0x139   :  { %3211 = vmatpush.bf16.msra.mxu2 %v7407_v55  ;;  %3046 = vmatpush.bf16.msra.mxu0 %v7387_v56  ;;  %v1349_v38 = vadd.f32 %v7604_v26, %v1348_v34  ;;  %v3266_v34 = vunpack.c.h.b16 %v8314_v52 }
 0x13b   :  { %3201 = vmatpush.bf16.msrb.mxu1 %v7396_v50  ;;  %v1363_v47 = vpop.f32.mrf.mxu0  ;;  %v1362_v48 = vadd.f32 %v1361_v16, %v1349_v38  ;;  %v1519_v30 = vpop.f32.mrf.mxu1  ;;  %v7437_v16 = vld [vmem:[#allocation3 + $0x768] sm:$0xff]  ;;  %v3434_v38 = vunpack.c.l.b16 %v8306_v28 }
 0x13c   :  { %3034 = vmatpush.bf16.msra.mxu3 %v7378_v6  ;;  %v3097_v6 = vunpack.c.h.b16 %v8337_v17  ;;  %v3268_v47 = vpack.c.b16 %v3266_v34, %v3266_v34  ;;  %v7462_v30 = vld [vmem:[%s8849_s5 + $0x30] sm:$0xff]  ;;  %v7487_v34 = vld [vmem:[%s8849_s5 + $0xf8] sm:$0xff] }
 0x13d   :  { %3212 = vmatpush.bf16.msra.mxu2 %v7406_v0  ;;  %3047 = vmatpush.bf16.msra.mxu0 %v7386_v7  ;;  %v1530_v44 = vpop.f32.mrf.mxu2  ;;  %v1365_v55 = vmax.f32 %v1362_v48, 0.0  ;;  %v7400_v0 = vld [vmem:[#allocation3 + $0x640] sm:$0xff]  ;;  %v7411_v7 = vld [vmem:[#allocation3 + $0x698] sm:$0xff]  ;;  %v7434_v48 = vld [vmem:[#allocation3 + $0x750] sm:$0xff] }
 0x13e   :  { %v1531_v50 = vadd.f32 %v1530_v44, %v1518_v37  ;;  %v3099_v10 = vpack.c.b16 %v3097_v6, %v3097_v6  ;;  %v7435_v37 = vld [vmem:[#allocation3 + $0x758] sm:$0xff] }
 0x13f   :  { %3202 = vmatpush.bf16.msrb.mxu1 %v7395_v24  ;;  %v1366_v59 = vpack.c.bf16 %v1365_v55, %v1365_v55  ;;  %v7429_v24 = vld [vmem:[#allocation3 + $0x728] sm:$0xff] }
 0x140   :  { %3035 = vmatpush.bf16.msra.mxu3 %v7377_v11  ;;  %v1534_v3 = vmax.f32 %v1531_v50, 0.0  ;;  %v1350_v60 = vpop.f32.mrf.mxu3  ;;  %v3436_v50 = vpack.c.b16 %v3434_v38, %v3434_v38  ;;  %v7495_v38 = vld [vmem:[%s8849_s5 + $0x138] sm:$0xff] }
 0x141   :  { %3213 = vmatpush.bf16.msra.mxu2 %v7405_v31  ;;  %3048 = vmatpush.bf16.msra.mxu0 %v7385_v39  ;;  %1367 = vst [vmem:[#allocation2 + $0x4] sm:$0xf] %v1366_v59  ;;  %v7427_v31 = vld [vmem:[#allocation3 + $0x718] sm:$0xff]  ;;  %v7410_v39 = vld [vmem:[#allocation3 + $0x690] sm:$0xff]  ;;  %v7461_v59 = vld [vmem:[%s8849_s5 + $0x28] sm:$0xff] }
 0x142   :  { %v1535_v56 = vpack.c.bf16 %v1534_v3, %v1534_v3  ;;  %v7445_v3 = vld [vmem:[#allocation3 + $0x7a8] sm:$0xff]  ;;  %v7432_v60 = vld [vmem:[#allocation3 + $0x740] sm:$0xff] }
 0x143   :  { %3203 = vmatpush.bf16.msrb.mxu1 %v7394_v8  ;;  %v7606_v8 = vld [vmem:[%s8848_s4 + $0x3] ss:$0 sm:$0xff] }
 0x144   :  { %3036 = vmatpush.bf16.msra.mxu3 %v7376_v20  ;;  %1536 = vst [vmem:[#allocation2 + $0x8] sm:$0xf] %v1535_v56 }
 0x145   :  { %3214 = vmatpush.bf16.msra.mxu2 %v7404_v19  ;;  %3049 = vmatpush.bf16.msra.mxu0 %v7384_v54  ;;  %v1532_v49 = vpop.f32.mrf.mxu2  ;;  %v7426_v19 = vld [vmem:[#allocation3 + $0x710] sm:$0xff]  ;;  %v7425_v54 = vld [vmem:[#allocation3 + $0x708] sm:$0xff] }
 0x146   :  { %v1699_v2 = vpop.f32.mrf.mxu0 }
 0x147   :  { %3204 = vmatpush.bf16.msrb.mxu1 %v7393_v15  ;;  %3037 = vmatmul.bf16.vlgmr.msra.gmra.mxu3 %v2929_v35  ;;  %v7418_v15 = vld [vmem:[#allocation3 + $0x6d0] sm:$0xff]  ;;  %v7424_v35 = vld [vmem:[#allocation3 + $0x700] sm:$0xff] }
 0x148   :  { %3367 = vmatpush.bf16.msrb.mxu3 %v7415_v23  ;;  %3050 = vmatmul.bf16.vlgmr.msra.gmra.mxu0 %v2930_v42  ;;  %v7417_v23 = vld [vmem:[#allocation3 + $0x6c8] sm:$0xff] }
 0x149   :  { %3215 = vmatpush.bf16.msra.mxu2 %v7403_v14  ;;  %3380 = vmatpush.bf16.msrb.mxu0 %v7423_v51  ;;  %v7416_v14 = vld [vmem:[#allocation3 + $0x6c0] sm:$0xff]  ;;  %v7447_v51 = vld [vmem:[#allocation3 + $0x7b8] sm:$0xff] }
 0x14a   :  { %v1686_v11 = vpop.f32.mrf.mxu3 }
 0x14b   :  { %3205 = vmatpush.bf16.msrb.mxu1 %v7392_v25  ;;  %v1855_v43 = vpop.f32.mrf.mxu1  ;;  %v1687_v13 = vadd.f32 %v7606_v8, %v1686_v11  ;;  %v7436_v25 = vld [vmem:[#allocation3 + $0x760] sm:$0xff]  ;;  %v7470_v8 = vld [vmem:[%s8849_s5 + $0x70] sm:$0xff] }
 0x14c   :  { %3368 = vmatpush.bf16.msrb.mxu3 %v7414_v40  ;;  %v7455_v40 = vld [vmem:[#allocation3 + $0x7f8] sm:$0xff]  ;;  %v1856_v42 = vadd.f32 %v7605_v27, %v1855_v43  ;;  %v7450_v11 = vld [vmem:[#allocation3 + $0x7d0] sm:$0xff]  ;;  %v3603_v27 = vunpack.c.l.b16 %v8323_v32 }
 0x14d   :  { %3216 = vmatpush.bf16.msra.mxu2 %v7402_v45  ;;  %3381 = vmatpush.bf16.msrb.mxu0 %v7422_v46  ;;  %v1700_v17 = vadd.f32 %v1699_v2, %v1687_v13  ;;  %v7446_v45 = vld [vmem:[#allocation3 + $0x7b0] sm:$0xff]  ;;  %v7471_v2 = vld [vmem:[%s8849_s5 + $0x78] sm:$0xff] }
 0x14e   :  { %3206 = vmatmul.bf16.vlgmr.msrb.gmra.mxu1 %v3098_v41  ;;  %v1701_v18 = vpop.f32.mrf.mxu0  ;;  %v7463_v41 = vld [vmem:[%s8849_s5 + $0x38] sm:$0xff]  ;;  %v7458_v13 = vld [vmem:[%s8849_s5 + $0x10] sm:$0xff] }
 0x14f   :  { %3536 = vmatpush.bf16.msra.mxu1 %v7431_v33  ;;  %v1703_v36 = vmax.f32 %v1700_v17, 0.0  ;;  %v3265_v33 = vunpack.c.l.b16 %v8314_v52  ;;  %v7451_v43 = vld [vmem:[#allocation3 + $0x7d8] sm:$0xff]  ;;  %v7469_v17 = vld [vmem:[%s8849_s5 + $0x68] sm:$0xff] }
 0x150   :  { %3369 = vmatpush.bf16.msrb.mxu3 %v7413_v57  ;;  %v7441_v18 = vld [vmem:[#allocation3 + $0x788] sm:$0xff] }
 0x151   :  { %3217 = vmatpush.bf16.msra.mxu2 %v7401_v58  ;;  %3382 = vmatpush.bf16.msrb.mxu0 %v7421_v61  ;;  %v1704_v12 = vpack.c.bf16 %v1703_v36, %v1703_v36  ;;  %v3267_v46 = vpack.c.b16 %v3265_v33, %v3265_v33  ;;  %v7433_v58 = vld [vmem:[#allocation3 + $0x748] sm:$0xff]  ;;  %v7467_v33 = vld [vmem:[%s8849_s5 + $0x58] sm:$0xff] }
 0x152   :  { %v1688_v26 = vpop.f32.mrf.mxu3  ;;  %v7453_v61 = vld [vmem:[#allocation3 + $0x7e8] sm:$0xff] }
 0x153   :  { %3537 = vmatpush.bf16.msra.mxu1 %v7430_v53  ;;  %v1857_v20 = vpop.f32.mrf.mxu1  ;;  %1705 = vst [vmem:[#allocation2 + $0xc] sm:$0xf] %v1704_v12  ;;  %v7454_v53 = vld [vmem:[#allocation3 + $0x7f0] sm:$0xff]  ;;  %v7479_v26 = vld [vmem:[%s8849_s5 + $0xb8] sm:$0xff] }
 0x154   :  { %3370 = vmatpush.bf16.msrb.mxu3 %v7412_v21  ;;  %v3435_v21 = vunpack.c.h.b16 %v8306_v28  ;;  %v7608_v28 = vld [vmem:[%s8848_s4 + $0x5] ss:$0 sm:$0xff]  ;;  %v7457_v20 = vld [vmem:[%s8849_s5 + $0x8] sm:$0xff] }
 0x155   :  { %3218 = vmatpush.bf16.msra.mxu2 %v7400_v0  ;;  %3383 = vmatpush.bf16.msrb.mxu0 %v7420_v1  ;;  %v7452_v0 = vld [vmem:[#allocation3 + $0x7e0] sm:$0xff] }
 0x156   :  { %v7460_v1 = vld [vmem:[%s8849_s5 + $0x20] sm:$0xff] }
 0x157   :  { %3538 = vmatpush.bf16.msra.mxu1 %v7429_v24  ;;  %v7444_v24 = vld [vmem:[#allocation3 + $0x7a0] sm:$0xff] }
 0x158   :  { %3219 = vmatmul.bf16.vlgmr.msra.gmra.mxu2 %v3099_v10  ;;  %3371 = vmatpush.bf16.msrb.mxu3 %v7411_v7  ;;  %v7459_v7 = vld [vmem:[%s8849_s5 + $0x18] sm:$0xff]  ;;  %v7442_v10 = vld [vmem:[#allocation3 + $0x790] sm:$0xff] }
 0x159   :  { %3549 = vmatpush.bf16.msrb.mxu2 %v7439_v5  ;;  %3384 = vmatpush.bf16.msrb.mxu0 %v7419_v9  ;;  %v3437_v5 = vpack.c.b16 %v3435_v21, %v3435_v21  ;;  %v7503_v21 = vld [vmem:[%s8849_s5 + $0x178] sm:$0xff] }
 0x15b   :  { %3539 = vmatpush.bf16.msra.mxu1 %v7428_v4  ;;  %v1868_v44 = vpop.f32.mrf.mxu2  ;;  %v7443_v4 = vld [vmem:[#allocation3 + $0x798] sm:$0xff] }
 0x15c   :  { %3372 = vmatpush.bf16.msrb.mxu3 %v7410_v39  ;;  %v1869_v52 = vadd.f32 %v1868_v44, %v1856_v42  ;;  %v7478_v42 = vld [vmem:[%s8849_s5 + $0xb0] sm:$0xff] }
 0x15d   :  { %3550 = vmatpush.bf16.msrb.mxu2 %v7438_v62  ;;  %3385 = vmatpush.bf16.msrb.mxu0 %v7418_v15 }
 0x15e   :  { %v1872_v55 = vmax.f32 %v1869_v52, 0.0 }
 0x15f   :  { %3540 = vmatpush.bf16.msra.mxu1 %v7427_v31 }
 0x160   :  { %3373 = vmatpush.bf16.msrb.mxu3 %v7409_v22  ;;  %v1873_v57 = vpack.c.bf16 %v1872_v55, %v1872_v55  ;;  %v7468_v22 = vld [vmem:[%s8849_s5 + $0x60] sm:$0xff]  ;;  %v7485_v55 = vld [vmem:[%s8849_s5 + $0xe8] sm:$0xff] }
 0x161   :  { %3551 = vmatpush.bf16.msrb.mxu2 %v7437_v16  ;;  %3386 = vmatpush.bf16.msrb.mxu0 %v7417_v23  ;;  %v7449_v16 = vld [vmem:[#allocation3 + $0x7c8] sm:$0xff]  ;;  %v7607_v23 = vld [vmem:[%s8848_s4 + $0x6] ss:$0 sm:$0xff] }
 0x162   :  { %1874 = vst [vmem:[#allocation2 + $0x10] sm:$0xf] %v1873_v57 }
 0x163   :  { %3541 = vmatpush.bf16.msra.mxu1 %v7426_v19  ;;  %v1870_v56 = vpop.f32.mrf.mxu2 }
 0x164   :  { %3374 = vmatpush.bf16.msrb.mxu3 %v7408_v29  ;;  %v7448_v29 = vld [vmem:[#allocation3 + $0x7c0] sm:$0xff] }
 0x165   :  { %3552 = vmatpush.bf16.msrb.mxu2 %v7436_v25  ;;  %3387 = vmatpush.bf16.msrb.mxu0 %v7416_v14  ;;  %v2037_v49 = vpop.f32.mrf.mxu0  ;;  %v8396_v25 = vld [vmem:[#allocation2] sm:$0xff] }
 0x166   :  { %v7456_v14 = vld [vmem:[%s8849_s5] sm:$0xff] }
 0x167   :  { %3542 = vmatpush.bf16.msra.mxu1 %v7425_v54  ;;  %3375 = vmatmul.bf16.vlgmr.msrb.gmra.mxu3 %v3267_v46  ;;  %v7440_v54 = vld [vmem:[#allocation3 + $0x780] sm:$0xff]  ;;  %v7466_v46 = vld [vmem:[%s8849_s5 + $0x50] sm:$0xff] }
 0x168   :  { %3705 = vmatpush.bf16.msra.mxu3 %v7447_v51  ;;  %3388 = vmatmul.bf16.vlgmr.msrb.gmra.mxu0 %v3268_v47  ;;  %v3604_v51 = vunpack.c.h.b16 %v8323_v32  ;;  %v3605_v32 = vpack.c.b16 %v3603_v27, %v3603_v27  ;;  %v7486_v47 = vld [vmem:[%s8849_s5 + $0xf0] sm:$0xff]  ;;  %v7499_v27 = vld [vmem:[%s8849_s5 + $0x158] sm:$0xff] }
 0x169   :  { %3553 = vmatpush.bf16.msrb.mxu2 %v7435_v37  ;;  %3718 = vmatpush.bf16.msra.mxu0 %v7455_v40 }
 0x16a   :  { %v2024_v9 = vpop.f32.mrf.mxu3  ;;  %v3606_v44 = vpack.c.b16 %v3604_v51, %v3604_v51 }
 0x16b   :  { %3543 = vmatpush.bf16.msra.mxu1 %v7424_v35  ;;  %v2193_v6 = vpop.f32.mrf.mxu1  ;;  %v2025_v31 = vadd.f32 %v7608_v28, %v2024_v9  ;;  %v4010_v35 = vunpack.c.l.b16 %v8396_v25  ;;  %v7502_v28 = vld [vmem:[%s8849_s5 + $0x170] sm:$0xff] }
 0x16c   :  { %3706 = vmatpush.bf16.msra.mxu3 %v7446_v45  ;;  %v2194_v37 = vadd.f32 %v7607_v23, %v2193_v6  ;;  %v7483_v6 = vld [vmem:[%s8849_s5 + $0xd8] sm:$0xff] }
 0x16d   :  { %3554 = vmatpush.bf16.msrb.mxu2 %v7434_v48  ;;  %3719 = vmatpush.bf16.msra.mxu0 %v7454_v53  ;;  %v2039_v62 = vpop.f32.mrf.mxu0  ;;  %v2038_v39 = vadd.f32 %v2037_v49, %v2025_v31  ;;  %v4026_v45 = vpack.c.b16 %v4010_v35, %v4010_v35  ;;  %v7494_v48 = vld [vmem:[%s8849_s5 + $0x130] sm:$0xff]  ;;  %v7477_v53 = vld [vmem:[%s8849_s5 + $0xa8] sm:$0xff]  ;;  %v4011_v49 = vunpack.c.h.b16 %v8396_v25 }
 0x16e   :  { %3544 = vmatmul.bf16.vlgmr.msra.gmra.mxu1 %v3436_v50  ;;  %v7490_v62 = vld [vmem:[%s8849_s5 + $0x110] sm:$0xff] }
 0x16f   :  { %4826 = vmatpush.bf16.msrb.mxu1 %v7463_v41  ;;  %v2041_v19 = vmax.f32 %v2038_v39, 0.0  ;;  %v7473_v39 = vld [vmem:[%s8849_s5 + $0x88] sm:$0xff] }
 0x170   :  { %3707 = vmatpush.bf16.msra.mxu3 %v7445_v3  ;;  %v7493_v3 = vld [vmem:[%s8849_s5 + $0x128] sm:$0xff] }
 0x171   :  { %3555 = vmatpush.bf16.msrb.mxu2 %v7433_v58  ;;  %3720 = vmatpush.bf16.msra.mxu0 %v7453_v61  ;;  %v2042_v36 = vpack.c.bf16 %v2041_v19, %v2041_v19  ;;  %v7476_v58 = vld [vmem:[%s8849_s5 + $0xa0] sm:$0xff] }
 0x172   :  { %v2026_v12 = vpop.f32.mrf.mxu3  ;;  %v7464_v61 = vld [vmem:[%s8849_s5 + $0x40] sm:$0xff] }
 0x173   :  { %4827 = vmatpush.bf16.msrb.mxu1 %v7462_v30  ;;  %v2195_v15 = vpop.f32.mrf.mxu1  ;;  %2043 = vst [vmem:[#allocation2 + $0x14] sm:$0xf] %v2042_v36  ;;  %v7465_v30 = vld [vmem:[%s8849_s5 + $0x48] sm:$0xff]  ;;  %v7500_v19 = vld [vmem:[%s8849_s5 + $0x160] sm:$0xff] }
 0x174   :  { %3708 = vmatpush.bf16.msra.mxu3 %v7444_v24  ;;  %v7481_v15 = vld [vmem:[%s8849_s5 + $0xc8] sm:$0xff]  ;;  %v7480_v12 = vld [vmem:[%s8849_s5 + $0xc0] sm:$0xff] }
 0x175   :  { %3556 = vmatpush.bf16.msrb.mxu2 %v7432_v60  ;;  %3721 = vmatpush.bf16.msra.mxu0 %v7452_v0  ;;  %v7492_v60 = vld [vmem:[%s8849_s5 + $0x120] sm:$0xff]  ;;  %v7475_v0 = vld [vmem:[%s8849_s5 + $0x98] sm:$0xff]  ;;  %v7609_v36 = vld [vmem:[%s8848_s4 + $0x8] ss:$0 sm:$0xff] }
 0x177   :  { %4828 = vmatpush.bf16.msrb.mxu1 %v7461_v59  ;;  %v7484_v59 = vld [vmem:[%s8849_s5 + $0xe0] sm:$0xff] }
 0x178   :  { %3557 = vmatmul.bf16.vlgmr.msrb.gmra.mxu2 %v3437_v5  ;;  %3709 = vmatpush.bf16.msra.mxu3 %v7443_v4  ;;  %v7491_v4 = vld [vmem:[%s8849_s5 + $0x118] sm:$0xff] }
 0x179   :  { %4839 = vmatpush.bf16.msra.mxu2 %v7471_v2  ;;  %3722 = vmatpush.bf16.msra.mxu0 %v7451_v43  ;;  %v4027_v2 = vpack.c.b16 %v4011_v49, %v4011_v49 }
 0x17a   :  { %v8501_v23 = vld [vmem:[#allocation2 + $0x10] sm:$0xff] }
 0x17b   :  { %4829 = vmatpush.bf16.msrb.mxu1 %v7460_v1  ;;  %v2206_v40 = vpop.f32.mrf.mxu2  ;;  %v7610_v1 = vld [vmem:[%s8848_s4 + $0x7] ss:$0 sm:$0xff]  ;;  %v4014_v51 = vunpack.c.l.b16 %v8501_v23 }
 0x17c   :  { %3710 = vmatpush.bf16.msra.mxu3 %v7442_v10  ;;  %v2207_v41 = vadd.f32 %v2206_v40, %v2194_v37 }
 0x17d   :  { %4840 = vmatpush.bf16.msra.mxu2 %v7470_v8  ;;  %3723 = vmatpush.bf16.msra.mxu0 %v7450_v11  ;;  %v7482_v8 = vld [vmem:[%s8849_s5 + $0xd0] sm:$0xff]  ;;  %v7501_v11 = vld [vmem:[%s8849_s5 + $0x168] sm:$0xff] }
 0x17e   :  { %v2210_v52 = vmax.f32 %v2207_v41, 0.0  ;;  %v7498_v41 = vld [vmem:[%s8849_s5 + $0x150] sm:$0xff] }
 0x17f   :  { %4830 = vmatpush.bf16.msrb.mxu1 %v7459_v7  ;;  %v7474_v7 = vld [vmem:[%s8849_s5 + $0x90] sm:$0xff] }
 0x180   :  { %3711 = vmatpush.bf16.msra.mxu3 %v7441_v18  ;;  %v2211_v50 = vpack.c.bf16 %v2210_v52, %v2210_v52  ;;  %v7489_v18 = vld [vmem:[%s8849_s5 + $0x108] sm:$0xff] }
 0x181   :  { %4841 = vmatpush.bf16.msra.mxu2 %v7469_v17  ;;  %3724 = vmatpush.bf16.msra.mxu0 %v7449_v16  ;;  %v3735_v16 = vld [vmem:[#allocation2 + $0x8] sm:$0xff] }
 0x182   :  { %2212 = vst [vmem:[#allocation2 + $0x18] sm:$0xf] %v2211_v50  ;;  %v4012_v25 = vunpack.c.l.b16 %v3735_v16  ;;  %v7517_v50 = vld [vmem:[%s8849_s5 + $0x1e8] sm:$0xff] }
 0x183   :  { %4831 = vmatpush.bf16.msrb.mxu1 %v7458_v13  ;;  %v2208_v57 = vpop.f32.mrf.mxu2 }
 0x184   :  { %3712 = vmatpush.bf16.msra.mxu3 %v7440_v54  ;;  %v7511_v54 = vld [vmem:[%s8849_s5 + $0x1b8] sm:$0xff]  ;;  %v4028_v37 = vpack.c.b16 %v4012_v25, %v4012_v25 }
 0x185   :  { %4842 = vmatpush.bf16.msra.mxu2 %v7468_v22  ;;  %3725 = vmatpush.bf16.msra.mxu0 %v7448_v29  ;;  %v2375_v56 = vpop.f32.mrf.mxu0  ;;  %v7472_v22 = vld [vmem:[%s8849_s5 + $0x80] sm:$0xff]  ;;  %v4013_v29 = vunpack.c.h.b16 %v3735_v16 }
 0x186   :  { %v7504_v16 = vld [vmem:[%s8849_s5 + $0x180] sm:$0xff] }
 0x187   :  { %4832 = vmatpush.bf16.msrb.mxu1 %v7457_v20  ;;  %3713 = vmatmul.bf16.vlgmr.msra.gmra.mxu3 %v3605_v32  ;;  %v4029_v32 = vpack.c.b16 %v4013_v29, %v4013_v29 }
 0x188   :  { %4852 = vmatpush.bf16.msrb.mxu3 %v7479_v26  ;;  %3726 = vmatmul.bf16.vlgmr.msra.gmra.mxu0 %v3606_v44  ;;  %v7488_v26 = vld [vmem:[%s8849_s5 + $0x100] sm:$0xff]  ;;  %v7518_v44 = vld [vmem:[%s8849_s5 + $0x1f0] sm:$0xff] }
 0x189   :  { %4843 = vmatpush.bf16.msra.mxu2 %v7467_v33  ;;  %4865 = vmatpush.bf16.msrb.mxu0 %v7487_v34  ;;  %v7527_v34 = vld [vmem:[%s8849_s5 + $0x238] sm:$0xff] }
 0x18a   :  { %v2362_v5 = vpop.f32.mrf.mxu3 }
 0x18b   :  { %4833 = vmatpush.bf16.msrb.mxu1 %v7456_v14  ;;  %v2531_v24 = vpop.f32.mrf.mxu1  ;;  %v2363_v43 = vadd.f32 %v7610_v1, %v2362_v5  ;;  %v7519_v14 = vld [vmem:[%s8849_s5 + $0x1f8] sm:$0xff]  ;;  %v7534_v1 = vld [vmem:[%s8849_s5 + $0x270] sm:$0xff] }
 0x18c   :  { %4853 = vmatpush.bf16.msrb.mxu3 %v7478_v42  ;;  %v2532_v33 = vadd.f32 %v7609_v36, %v2531_v24  ;;  %v4030_v42 = vpack.c.b16 %v4014_v51, %v4014_v51  ;;  %v7524_v24 = vld [vmem:[%s8849_s5 + $0x220] sm:$0xff]  ;;  %v7543_v36 = vld [vmem:[%s8849_s5 + $0x2b8] sm:$0xff]  ;;  %v7542_v51 = vld [vmem:[%s8849_s5 + $0x2b0] sm:$0xff] }
 0x18d   :  { %4844 = vmatpush.bf16.msra.mxu2 %v7466_v46  ;;  %4866 = vmatpush.bf16.msrb.mxu0 %v7486_v47  ;;  %v2376_v9 = vadd.f32 %v2375_v56, %v2363_v43  ;;  %v2377_v10 = vpop.f32.mrf.mxu0  ;;  %v7526_v46 = vld [vmem:[%s8849_s5 + $0x230] sm:$0xff]  ;;  %v7509_v47 = vld [vmem:[%s8849_s5 + $0x1a8] sm:$0xff] }
 0x18e   :  { %4834 = vmatmul.bf16.vlgmr.msrb.gmra.mxu1 %v4026_v45  ;;  %v7514_v43 = vld [vmem:[%s8849_s5 + $0x1d0] sm:$0xff] }
 0x18f   :  { %4878 = vmatpush.bf16.msra.mxu1 %v7495_v38  ;;  %v2379_v13 = vmax.f32 %v2376_v9, 0.0  ;;  %v7510_v38 = vld [vmem:[%s8849_s5 + $0x1b0] sm:$0xff] }
 0x190   :  { %4854 = vmatpush.bf16.msrb.mxu3 %v7477_v53  ;;  %v7525_v53 = vld [vmem:[%s8849_s5 + $0x228] sm:$0xff]  ;;  %v7522_v10 = vld [vmem:[%s8849_s5 + $0x210] sm:$0xff] }
 0x191   :  { %4845 = vmatpush.bf16.msra.mxu2 %v7465_v30  ;;  %4867 = vmatpush.bf16.msrb.mxu0 %v7485_v55  ;;  %v2380_v17 = vpack.c.bf16 %v2379_v13, %v2379_v13  ;;  %v7508_v55 = vld [vmem:[%s8849_s5 + $0x1a0] sm:$0xff] }
 0x192   :  { %v2364_v20 = vpop.f32.mrf.mxu3  ;;  %v7532_v13 = vld [vmem:[%s8849_s5 + $0x260] sm:$0xff] }
 0x193   :  { %4879 = vmatpush.bf16.msra.mxu1 %v7494_v48  ;;  %v2533_v31 = vpop.f32.mrf.mxu1  ;;  %2381 = vst [vmem:[#allocation2 + $0x1c] sm:$0xf] %v2380_v17  ;;  %v7497_v48 = vld [vmem:[%s8849_s5 + $0x148] sm:$0xff] }
 0x194   :  { %4855 = vmatpush.bf16.msrb.mxu3 %v7476_v58  ;;  %v7516_v58 = vld [vmem:[%s8849_s5 + $0x1e0] sm:$0xff]  ;;  %v7505_v31 = vld [vmem:[%s8849_s5 + $0x188] sm:$0xff] }
 0x195   :  { %4846 = vmatpush.bf16.msra.mxu2 %v7464_v61  ;;  %4868 = vmatpush.bf16.msrb.mxu0 %v7484_v59  ;;  %v7535_v61 = vld [vmem:[%s8849_s5 + $0x278] sm:$0xff]  ;;  %v4015_v59 = vunpack.c.h.b16 %v8501_v23  ;;  %v7521_v17 = vld [vmem:[%s8849_s5 + $0x208] sm:$0xff] }
 0x196   :  { %v7531_v23 = vld [vmem:[%s8849_s5 + $0x258] sm:$0xff] }
 0x197   :  { %4880 = vmatpush.bf16.msra.mxu1 %v7493_v3  ;;  %v7496_v3 = vld [vmem:[%s8849_s5 + $0x140] sm:$0xff]  ;;  %v4031_v49 = vpack.c.b16 %v4015_v59, %v4015_v59  ;;  %v7539_v59 = vld [vmem:[%s8849_s5 + $0x298] sm:$0xff] }
 0x198   :  { %4847 = vmatmul.bf16.vlgmr.msra.gmra.mxu2 %v4027_v2  ;;  %4856 = vmatpush.bf16.msrb.mxu3 %v7475_v0  ;;  %v7515_v0 = vld [vmem:[%s8849_s5 + $0x1d8] sm:$0xff] }
 0x199   :  { %4891 = vmatpush.bf16.msrb.mxu2 %v7503_v21  ;;  %4869 = vmatpush.bf16.msrb.mxu0 %v7483_v6  ;;  %v7612_v21 = vld [vmem:[%s8848_s4 + $0x9] ss:$0 sm:$0xff]  ;;  %v7523_v6 = vld [vmem:[%s8849_s5 + $0x218] sm:$0xff] }
 0x19b   :  { %4881 = vmatpush.bf16.msra.mxu1 %v7492_v60  ;;  %v2544_v35 = vpop.f32.mrf.mxu2  ;;  %v7507_v60 = vld [vmem:[%s8849_s5 + $0x198] sm:$0xff] }
 0x19c   :  { %4857 = vmatpush.bf16.msrb.mxu3 %v7474_v7  ;;  %v2545_v40 = vadd.f32 %v2544_v35, %v2532_v33  ;;  %v7533_v7 = vld [vmem:[%s8849_s5 + $0x268] sm:$0xff] }
 0x19d   :  { %4892 = vmatpush.bf16.msrb.mxu2 %v7502_v28  ;;  %4870 = vmatpush.bf16.msrb.mxu0 %v7482_v8 }
 0x19e   :  { %v2548_v45 = vmax.f32 %v2545_v40, 0.0  ;;  %v7550_v40 = vld [vmem:[%s8849_s5 + $0x2f0] sm:$0xff] }
 0x19f   :  { %4882 = vmatpush.bf16.msra.mxu1 %v7491_v4  ;;  %v7506_v4 = vld [vmem:[%s8849_s5 + $0x190] sm:$0xff] }
 0x1a0   :  { %4858 = vmatpush.bf16.msrb.mxu3 %v7473_v39  ;;  %v2549_v52 = vpack.c.bf16 %v2548_v45, %v2548_v45  ;;  %v3737_v39 = vld [vmem:[#allocation2 + $0x18] sm:$0xff]  ;;  %v7529_v45 = vld [vmem:[%s8849_s5 + $0x248] sm:$0xff] }
 0x1a1   :  { %4893 = vmatpush.bf16.msrb.mxu2 %v7501_v11  ;;  %4871 = vmatpush.bf16.msrb.mxu0 %v7481_v15  ;;  %v7513_v11 = vld [vmem:[%s8849_s5 + $0x1c8] sm:$0xff]  ;;  %v4016_v20 = vunpack.c.l.b16 %v3737_v39 }
 0x1a2   :  { %2550 = vst [vmem:[#allocation2 + $0x20] sm:$0xf] %v2549_v52  ;;  %v7557_v52 = vld [vmem:[%s8849_s5 + $0x328] sm:$0xff] }
 0x1a3   :  { %4883 = vmatpush.bf16.msra.mxu1 %v7490_v62  ;;  %v2546_v30 = vpop.f32.mrf.mxu2 }
 0x1a4   :  { %4859 = vmatpush.bf16.msrb.mxu3 %v7472_v22  ;;  %v7512_v22 = vld [vmem:[%s8849_s5 + $0x1c0] sm:$0xff] }
 0x1a5   :  { %4894 = vmatpush.bf16.msrb.mxu2 %v7500_v19  ;;  %4872 = vmatpush.bf16.msrb.mxu0 %v7480_v12  ;;  %v2713_v57 = vpop.f32.mrf.mxu0  ;;  %v4017_v12 = vunpack.c.h.b16 %v3737_v39  ;;  %v7536_v39 = vld [vmem:[%s8849_s5 + $0x280] sm:$0xff] }
 0x1a7   :  { %4884 = vmatpush.bf16.msra.mxu1 %v7489_v18  ;;  %4860 = vmatmul.bf16.vlgmr.msrb.gmra.mxu3 %v4028_v37  ;;  %v7611_v18 = vld [vmem:[%s8848_s4 + $0xa] ss:$0 sm:$0xff]  ;;  %v4033_v35 = vpack.c.b16 %v4017_v12, %v4017_v12 }
 0x1a8   :  { %4904 = vmatpush.bf16.msra.mxu3 %v7511_v54  ;;  %4873 = vmatmul.bf16.vlgmr.msrb.gmra.mxu0 %v4029_v32  ;;  %v7520_v54 = vld [vmem:[%s8849_s5 + $0x200] sm:$0xff]  ;;  %v7558_v32 = vld [vmem:[%s8849_s5 + $0x330] sm:$0xff] }
 0x1a9   :  { %4895 = vmatpush.bf16.msrb.mxu2 %v7499_v27  ;;  %4917 = vmatpush.bf16.msra.mxu0 %v7519_v14  ;;  %v7559_v27 = vld [vmem:[%s8849_s5 + $0x338] sm:$0xff]  ;;  %v4032_v14 = vpack.c.b16 %v4016_v20, %v4016_v20 }
 0x1aa   :  { %v2700_v2 = vpop.f32.mrf.mxu3 }
 0x1ab   :  { %4885 = vmatpush.bf16.msra.mxu1 %v7488_v26  ;;  %v2869_v56 = vpop.f32.mrf.mxu1  ;;  %v2701_v28 = vadd.f32 %v7612_v21, %v2700_v2  ;;  %v7551_v26 = vld [vmem:[%s8849_s5 + $0x2f8] sm:$0xff]  ;;  %v7565_v2 = vld [vmem:[%s8849_s5 + $0x368] sm:$0xff] }
 0x1ac   :  { %4905 = vmatpush.bf16.msra.mxu3 %v7510_v38  ;;  %v2870_v25 = vadd.f32 %v7611_v18, %v2869_v56  ;;  %v7614_v56 = vld [vmem:[%s8848_s4 + $0xb] ss:$0 sm:$0xff]  ;;  %v7547_v21 = vld [vmem:[%s8849_s5 + $0x2d8] sm:$0xff]  ;;  %v7544_v18 = vld [vmem:[%s8849_s5 + $0x2c0] sm:$0xff] }
 0x1ad   :  { %4896 = vmatpush.bf16.msrb.mxu2 %v7498_v41  ;;  %4918 = vmatpush.bf16.msra.mxu0 %v7518_v44  ;;  %v2715_v5 = vpop.f32.mrf.mxu0  ;;  %v2714_v8 = vadd.f32 %v2713_v57, %v2701_v28 }
 0x1ae   :  { %4886 = vmatmul.bf16.vlgmr.msra.gmra.mxu1 %v4030_v42  ;;  %v7541_v42 = vld [vmem:[%s8849_s5 + $0x2a8] sm:$0xff] }
 0x1af   :  { %4930 = vmatpush.bf16.msrb.mxu1 %v7527_v34  ;;  %v2717_v62 = vmax.f32 %v2714_v8, 0.0  ;;  %v7530_v34 = vld [vmem:[%s8849_s5 + $0x250] sm:$0xff]  ;;  %v7537_v8 = vld [vmem:[%s8849_s5 + $0x288] sm:$0xff] }
 0x1b0   :  { %4906 = vmatpush.bf16.msra.mxu3 %v7509_v47  ;;  %v7549_v47 = vld [vmem:[%s8849_s5 + $0x2e8] sm:$0xff] }
 0x1b1   :  { %4897 = vmatpush.bf16.msrb.mxu2 %v7497_v48  ;;  %4919 = vmatpush.bf16.msra.mxu0 %v7517_v50  ;;  %v2718_v15 = vpack.c.bf16 %v2717_v62, %v2717_v62  ;;  %v7540_v50 = vld [vmem:[%s8849_s5 + $0x2a0] sm:$0xff]  ;;  %v7545_v62 = vld [vmem:[%s8849_s5 + $0x2c8] sm:$0xff] }
 0x1b2   :  { %v2702_v19 = vpop.f32.mrf.mxu3 }
 0x1b3   :  { %4931 = vmatpush.bf16.msrb.mxu1 %v7526_v46  ;;  %v2871_v9 = vpop.f32.mrf.mxu1  ;;  %2719 = vst [vmem:[#allocation2 + $0x24] sm:$0xf] %v2718_v15  ;;  %v7613_v15 = vld [vmem:[%s8848_s4 + $0xc] ss:$0 sm:$0xff]  ;;  %v7552_v19 = vld [vmem:[%s8849_s5 + $0x300] sm:$0xff] }
 0x1b4   :  { %4907 = vmatpush.bf16.msra.mxu3 %v7508_v55  ;;  %v7567_v55 = vld [vmem:[%s8849_s5 + $0x378] sm:$0xff] }
 0x1b5   :  { %4898 = vmatpush.bf16.msrb.mxu2 %v7496_v3  ;;  %4920 = vmatpush.bf16.msra.mxu0 %v7516_v58  ;;  %v7548_v58 = vld [vmem:[%s8849_s5 + $0x2e0] sm:$0xff] }
 0x1b7   :  { %4932 = vmatpush.bf16.msrb.mxu1 %v7525_v53  ;;  %v7528_v53 = vld [vmem:[%s8849_s5 + $0x240] sm:$0xff] }
 0x1b8   :  { %4899 = vmatmul.bf16.vlgmr.msrb.gmra.mxu2 %v4031_v49  ;;  %4908 = vmatpush.bf16.msra.mxu3 %v7507_v60  ;;  %v7566_v60 = vld [vmem:[%s8849_s5 + $0x370] sm:$0xff]  ;;  %v7555_v49 = vld [vmem:[%s8849_s5 + $0x318] sm:$0xff] }
 0x1b9   :  { %4943 = vmatpush.bf16.msra.mxu2 %v7535_v61  ;;  %4921 = vmatpush.bf16.msra.mxu0 %v7515_v0  ;;  %v7556_v61 = vld [vmem:[%s8849_s5 + $0x320] sm:$0xff] }
 0x1ba   :  { %v3738_v38 = vld [vmem:[#allocation2 + $0x20] sm:$0xff] }
 0x1bb   :  { %4933 = vmatpush.bf16.msrb.mxu1 %v7524_v24  ;;  %v2882_v29 = vpop.f32.mrf.mxu2  ;;  %v4018_v41 = vunpack.c.l.b16 %v3738_v38  ;;  %v4019_v30 = vunpack.c.h.b16 %v3738_v38  ;;  %v7574_v38 = vld [vmem:[%s8849_s5 + $0x3b0] sm:$0xff] }
 0x1bc   :  { %4909 = vmatpush.bf16.msra.mxu3 %v7506_v4  ;;  %v2883_v33 = vadd.f32 %v2882_v29, %v2870_v25  ;;  %v7575_v29 = vld [vmem:[%s8849_s5 + $0x3b8] sm:$0xff] }
 0x1bd   :  { %4944 = vmatpush.bf16.msra.mxu2 %v7534_v1  ;;  %4922 = vmatpush.bf16.msra.mxu0 %v7514_v43  ;;  %v4034_v46 = vpack.c.b16 %v4018_v41, %v4018_v41  ;;  %v4035_v24 = vpack.c.b16 %v4019_v30, %v4019_v30  ;;  %v7538_v1 = vld [vmem:[%s8849_s5 + $0x290] sm:$0xff]  ;;  %v7560_v41 = vld [vmem:[%s8849_s5 + $0x340] sm:$0xff] }
 0x1be   :  { %v2886_v37 = vmax.f32 %v2883_v33, 0.0  ;;  %v7546_v43 = vld [vmem:[%s8849_s5 + $0x2d0] sm:$0xff] }
 0x1bf   :  { %4934 = vmatpush.bf16.msrb.mxu1 %v7523_v6 }
 0x1c0   :  { %4910 = vmatpush.bf16.msra.mxu3 %v7505_v31  ;;  %v2887_v44 = vpack.c.bf16 %v2886_v37, %v2886_v37  ;;  %v7589_v37 = vld [vmem:[%s8851_s7 + $0x28] sm:$0xff] }
 0x1c1   :  { %4945 = vmatpush.bf16.msra.mxu2 %v7533_v7  ;;  %4923 = vmatpush.bf16.msra.mxu0 %v7513_v11  ;;  %v7554_v7 = vld [vmem:[%s8849_s5 + $0x310] sm:$0xff]  ;;  %v7553_v11 = vld [vmem:[%s8849_s5 + $0x308] sm:$0xff] }
 0x1c2   :  { %2888 = vst [vmem:[#allocation2 + $0x28] sm:$0xf] %v2887_v44  ;;  %v7581_v44 = vld [vmem:[%s8849_s5 + $0x3e8] sm:$0xff] }
 0x1c3   :  { %4935 = vmatpush.bf16.msrb.mxu1 %v7522_v10  ;;  %v2884_v48 = vpop.f32.mrf.mxu2  ;;  %v7564_v10 = vld [vmem:[%s8849_s5 + $0x360] sm:$0xff] }
 0x1c4   :  { %4911 = vmatpush.bf16.msra.mxu3 %v7504_v16  ;;  %v7591_v16 = vld [vmem:[%s8851_s7 + $0x38] sm:$0xff] }
 0x1c5   :  { %4946 = vmatpush.bf16.msra.mxu2 %v7532_v13  ;;  %4924 = vmatpush.bf16.msra.mxu0 %v7512_v22  ;;  %v3051_v3 = vpop.f32.mrf.mxu0  ;;  %v7562_v22 = vld [vmem:[%s8849_s5 + $0x350] sm:$0xff]  ;;  %v7587_v48 = vld [vmem:[%s8851_s7 + $0x18] sm:$0xff] }
 0x1c7   :  { %4936 = vmatpush.bf16.msrb.mxu1 %v7521_v17  ;;  %4912 = vmatmul.bf16.vlgmr.msra.gmra.mxu3 %v4032_v14  ;;  %v7563_v17 = vld [vmem:[%s8849_s5 + $0x358] sm:$0xff] }
 0x1c8   :  { %4956 = vmatpush.bf16.msrb.mxu3 %v7543_v36  ;;  %4925 = vmatmul.bf16.vlgmr.msra.gmra.mxu0 %v4033_v35  ;;  %v7583_v14 = vld [vmem:[%s8849_s5 + $0x3f8] sm:$0xff] }
 0x1c9   :  { %4947 = vmatpush.bf16.msra.mxu2 %v7531_v23  ;;  %4969 = vmatpush.bf16.msrb.mxu0 %v7551_v26 }
 0x1ca   :  { %v3038_v0 = vpop.f32.mrf.mxu3 }
 0x1cb   :  { %4937 = vmatpush.bf16.msrb.mxu1 %v7520_v54  ;;  %v3207_v57 = vpop.f32.mrf.mxu1  ;;  %v3039_v6 = vadd.f32 %v7614_v56, %v3038_v0  ;;  %v7590_v54 = vld [vmem:[%s8851_s7 + $0x30] sm:$0xff]  ;;  %v7579_v56 = vld [vmem:[%s8849_s5 + $0x3d8] sm:$0xff] }
 0x1cc   :  { %4957 = vmatpush.bf16.msrb.mxu3 %v7542_v51  ;;  %v3208_v20 = vadd.f32 %v7613_v15, %v3207_v57  ;;  %v7561_v51 = vld [vmem:[%s8849_s5 + $0x348] sm:$0xff]  ;;  %v7586_v57 = vld [vmem:[%s8851_s7 + $0x10] sm:$0xff] }
 0x1cd   :  { %4948 = vmatpush.bf16.msra.mxu2 %v7530_v34  ;;  %4970 = vmatpush.bf16.msrb.mxu0 %v7550_v40  ;;  %v3052_v4 = vadd.f32 %v3051_v3, %v3039_v6  ;;  %v3053_v28 = vpop.f32.mrf.mxu0  ;;  %v7582_v40 = vld [vmem:[%s8849_s5 + $0x3f0] sm:$0xff] }
 0x1ce   :  { %4938 = vmatmul.bf16.vlgmr.msrb.gmra.mxu1 %v4034_v46  ;;  %v7588_v46 = vld [vmem:[%s8851_s7 + $0x20] sm:$0xff]  ;;  %v7577_v28 = vld [vmem:[%s8849_s5 + $0x3c8] sm:$0xff] }
 0x1cf   :  { %4982 = vmatpush.bf16.msra.mxu1 %v7559_v27  ;;  %v3055_v9 = vmax.f32 %v3052_v4, 0.0  ;;  %v7569_v4 = vld [vmem:[%s8849_s5 + $0x388] sm:$0xff] }
 0x1d0   :  { %4958 = vmatpush.bf16.msrb.mxu3 %v7541_v42  ;;  %v7573_v42 = vld [vmem:[%s8849_s5 + $0x3a8] sm:$0xff] }
 0x1d1   :  { %4949 = vmatpush.bf16.msra.mxu2 %v7529_v45  ;;  %4971 = vmatpush.bf16.msrb.mxu0 %v7549_v47  ;;  %v3056_v31 = vpack.c.bf16 %v3055_v9, %v3055_v9 }
 0x1d2   :  { %v3040_v13 = vpop.f32.mrf.mxu3 }
 0x1d3   :  { %4983 = vmatpush.bf16.msra.mxu1 %v7558_v32  ;;  %v3209_v5 = vpop.f32.mrf.mxu1  ;;  %3057 = vst [vmem:[#allocation2 + $0x2c] sm:$0xf] %v3056_v31 }
 0x1d4   :  { %4959 = vmatpush.bf16.msrb.mxu3 %v7540_v50  ;;  %v7572_v50 = vld [vmem:[%s8849_s5 + $0x3a0] sm:$0xff] }
 0x1d5   :  { %4950 = vmatpush.bf16.msra.mxu2 %v7528_v53  ;;  %4972 = vmatpush.bf16.msrb.mxu0 %v7548_v58  ;;  %v7580_v53 = vld [vmem:[%s8849_s5 + $0x3e0] sm:$0xff] }
 0x1d7   :  { %4984 = vmatpush.bf16.msra.mxu1 %v7557_v52  ;;  %v7616_v52 = vld [vmem:[%s8848_s4 + $0xd] ss:$0 sm:$0xff] }
 0x1d8   :  { %4951 = vmatmul.bf16.vlgmr.msra.gmra.mxu2 %v4035_v24  ;;  %4960 = vmatpush.bf16.msrb.mxu3 %v7539_v59  ;;  %v7571_v59 = vld [vmem:[%s8849_s5 + $0x398] sm:$0xff] }
 0x1d9   :  { %4995 = vmatpush.bf16.msrb.mxu2 %v7567_v55  ;;  %4973 = vmatpush.bf16.msrb.mxu0 %v7547_v21  ;;  %v7570_v21 = vld [vmem:[%s8849_s5 + $0x390] sm:$0xff] }
 0x1da   :  { %v3739_v12 = vld [vmem:[#allocation2 + $0x28] sm:$0xff] }
 0x1db   :  { %4985 = vmatpush.bf16.msra.mxu1 %v7556_v61  ;;  %v3220_v36 = vpop.f32.mrf.mxu2  ;;  %v4020_v26 = vunpack.c.l.b16 %v3739_v12  ;;  %v4021_v27 = vunpack.c.h.b16 %v3739_v12 }
 0x1dc   :  { %4961 = vmatpush.bf16.msrb.mxu3 %v7538_v1  ;;  %v3221_v23 = vadd.f32 %v3220_v36, %v3208_v20  ;;  %v7615_v1 = vld [vmem:[%s8848_s4 + $0xe] ss:$0 sm:$0xff]  ;;  %v7618_v20 = vld [vmem:[%s8848_s4 + $0xf] ss:$0 sm:$0xff] }
 0x1dd   :  { %4996 = vmatpush.bf16.msrb.mxu2 %v7566_v60  ;;  %4974 = vmatpush.bf16.msrb.mxu0 %v7546_v43  ;;  %v4036_v34 = vpack.c.b16 %v4020_v26, %v4020_v26  ;;  %v4037_v35 = vpack.c.b16 %v4021_v27, %v4021_v27  ;;  %v7585_v60 = vld [vmem:[%s8851_s7 + $0x8] sm:$0xff] }
 0x1de   :  { %v3224_v25 = vmax.f32 %v3221_v23, 0.0 }
 0x1df   :  { %4986 = vmatpush.bf16.msra.mxu1 %v7555_v49  ;;  %v7578_v49 = vld [vmem:[%s8849_s5 + $0x3d0] sm:$0xff] }
 0x1e0   :  { %4962 = vmatpush.bf16.msrb.mxu3 %v7537_v8  ;;  %v3225_v33 = vpack.c.bf16 %v3224_v25, %v3224_v25  ;;  %v7576_v8 = vld [vmem:[%s8849_s5 + $0x3c0] sm:$0xff] }
 0x1e1   :  { %4997 = vmatpush.bf16.msrb.mxu2 %v7565_v2  ;;  %4975 = vmatpush.bf16.msrb.mxu0 %v7545_v62  ;;  %v7584_v2 = vld [vmem:[%s8851_s7] sm:$0xff] }
 0x1e2   :  { %3226 = vst [vmem:[#allocation2 + $0x30] sm:$0xf] %v3225_v33  ;;  %v7617_v33 = vld [vmem:[%s8850_s6] ss:$0 sm:$0xff] }
 0x1e3   :  { %4987 = vmatpush.bf16.msra.mxu1 %v7554_v7  ;;  %v3222_v32 = vpop.f32.mrf.mxu2  ;;  %v7568_v7 = vld [vmem:[%s8849_s5 + $0x380] sm:$0xff] }
 0x1e4   :  { %4963 = vmatpush.bf16.msrb.mxu3 %v7536_v39 }
 0x1e5   :  { %4998 = vmatpush.bf16.msrb.mxu2 %v7564_v10  ;;  %4976 = vmatpush.bf16.msrb.mxu0 %v7544_v18  ;;  %v3389_v45 = vpop.f32.mrf.mxu0  ;;  %v7601_v18 = vld [vmem:[%s8846_s2 + $0x20] ss:$0 sm:$0xff] }
 0x1e6   :  { %v978_v36 = vadd.f32 %v7601_v18, %v8317_v63  ;;  %v7619_v18 = vld [vmem:[%s8852_s8] ss:$0 sm:$0xff]  ;;  %s7677_s8 = smov 112  }
 0x1e7   :  { %4988 = vmatpush.bf16.msra.mxu1 %v7553_v11  ;;  %4964 = vmatmul.bf16.vlgmr.msrb.gmra.mxu3 %v4036_v34 }
 0x1e8   :  { %5008 = vmatpush.bf16.msra.mxu3 %v7575_v29  ;;  %4977 = vmatmul.bf16.vlgmr.msrb.gmra.mxu0 %v4037_v35  ;;  %v1013_v12 = vmax.f32 %v978_v36, 0.0 }
 0x1e9   :  { %4999 = vmatpush.bf16.msrb.mxu2 %v7563_v17  ;;  %5021 = vmatpush.bf16.msra.mxu0 %v7583_v14 }
 0x1ea   :  { %v3376_v30 = vpop.f32.mrf.mxu3  ;;  %v1030_v29 = vpack.c.bf16 %v1013_v12, %v1013_v12 }
 0x1eb   :  { %4989 = vmatpush.bf16.msra.mxu1 %v7552_v19  ;;  %v3545_v47 = vpop.f32.mrf.mxu1  ;;  %v3377_v55 = vadd.f32 %v7616_v52, %v3376_v30 }
 0x1ec   :  { %5009 = vmatpush.bf16.msra.mxu3 %v7574_v38  ;;  %v3546_v5 = vadd.f32 %v7615_v1, %v3545_v47 }
 0x1ed   :  { %5000 = vmatpush.bf16.msrb.mxu2 %v7562_v22  ;;  %5022 = vmatpush.bf16.msra.mxu0 %v7582_v40  ;;  %v3391_v3 = vpop.f32.mrf.mxu0  ;;  %v3390_v58 = vadd.f32 %v3389_v45, %v3377_v55 }
 0x1ef   :  { %5121 = vmatpush.bf16.msrb.mxu1 %v7591_v16  ;;  %v3393_v24 = vmax.f32 %v3390_v58, 0.0 }
 0x1f0   :  { %5010 = vmatpush.bf16.msra.mxu3 %v7573_v42 }
 0x1f1   :  { %5001 = vmatpush.bf16.msrb.mxu2 %v7561_v51  ;;  %5023 = vmatpush.bf16.msra.mxu0 %v7581_v44  ;;  %v3394_v0 = vpack.c.bf16 %v3393_v24, %v3393_v24 }
 0x1f2   :  { %v3378_v6 = vpop.f32.mrf.mxu3 }
 0x1f3   :  { %5122 = vmatpush.bf16.msrb.mxu1 %v7590_v54  ;;  %v3547_v61 = vpop.f32.mrf.mxu1  ;;  %3395 = vst [vmem:[#allocation2 + $0x34] sm:$0xf] %v3394_v0 }
 0x1f4   :  { %5011 = vmatpush.bf16.msra.mxu3 %v7572_v50 }
 0x1f5   :  { %5002 = vmatpush.bf16.msrb.mxu2 %v7560_v41  ;;  %5024 = vmatpush.bf16.msra.mxu0 %v7580_v53 }
 0x1f7   :  { %5123 = vmatpush.bf16.msrb.mxu1 %v7589_v37 }
 0x1f8   :  { %5012 = vmatpush.bf16.msra.mxu3 %v7571_v59 }
 0x1f9   :  { %5025 = vmatpush.bf16.msra.mxu0 %v7579_v56 }
 0x1fa   :  { %v3740_v31 = vld [vmem:[#allocation2 + $0x30] sm:$0xff] }
 0x1fb   :  { %5124 = vmatpush.bf16.msrb.mxu1 %v7588_v46  ;;  %v3558_v43 = vpop.f32.mrf.mxu2  ;;  %v4022_v62 = vunpack.c.l.b16 %v3740_v31  ;;  %v4023_v11 = vunpack.c.h.b16 %v3740_v31 }
 0x1fc   :  { %5013 = vmatpush.bf16.msra.mxu3 %v7570_v21  ;;  %v3559_v9 = vadd.f32 %v3558_v43, %v3546_v5 }
 0x1fd   :  { %5026 = vmatpush.bf16.msra.mxu0 %v7578_v49  ;;  %v4038_v39 = vpack.c.b16 %v4022_v62, %v4022_v62  ;;  %v4039_v15 = vpack.c.b16 %v4023_v11, %v4023_v11  ;;  %v7592_v62 = vld [vmem:[%s8853_s9] sm:$0xff] }
 0x1fe   :  { %v3562_v10 = vmax.f32 %v3559_v9, 0.0 }
 0x1ff   :  { %5125 = vmatpush.bf16.msrb.mxu1 %v7587_v48  ;;  %5003 = vmatmul.bf16.vlgmr.msrb.gmra.mxu2 %v4039_v15 }
 0x200   :  { %5014 = vmatpush.bf16.msra.mxu3 %v7569_v4  ;;  %v3563_v13 = vpack.c.bf16 %v3562_v10, %v3562_v10  ;;  %4990 = vmatmul.bf16.vlgmr.msra.gmra.mxu1 %v4038_v39  ;;  %v7593_v10 = vld [vmem:[%s8853_s9 + $0x8] sm:$0xff] }
 0x201   :  { %5027 = vmatpush.bf16.msra.mxu0 %v7577_v28  ;;  %v7595_v28 = vld [vmem:[%s8853_s9 + $0x18] sm:$0xff] }
 0x202   :  { %3564 = vst [vmem:[#allocation2 + $0x38] sm:$0xf] %v3563_v13  ;;  %5180 = vmatpush.bf16.msra.mxu2 %v7595_v28 }
 0x203   :  { %5126 = vmatpush.bf16.msrb.mxu1 %v7586_v57  ;;  %v3560_v17 = vpop.f32.mrf.mxu2 }
 0x204   :  { %5015 = vmatpush.bf16.msra.mxu3 %v7568_v7  ;;  %v7594_v7 = vld [vmem:[%s8853_s9 + $0x10] sm:$0xff] }
 0x205   :  { %5028 = vmatpush.bf16.msra.mxu0 %v7576_v8  ;;  %v3727_v19 = vpop.f32.mrf.mxu0 }
 0x206   :  { %5181 = vmatpush.bf16.msra.mxu2 %v7594_v7 }
 0x207   :  { %5127 = vmatpush.bf16.msrb.mxu1 %v7585_v60 }
 0x20a   :  { %v3714_v22 = vpop.f32.mrf.mxu3  ;;  %5182 = vmatpush.bf16.msra.mxu2 %v7593_v10  ;;  %v5233_v10 = vstv %s7133_s19 }
 0x20b   :  { %5128 = vmatpush.bf16.msrb.mxu1 %v7584_v2  ;;  %v4835_v16 = vpop.f32.mrf.mxu1  ;;  %v3715_v23 = vadd.f32 %v7618_v20, %v3714_v22 }
 0x20c   :  { %v4836_v34 = vadd.f32 %v7617_v33, %v4835_v16 }
 0x20d   :  { %v3728_v54 = vadd.f32 %v3727_v19, %v3715_v23  ;;  %v3729_v25 = vpop.f32.mrf.mxu0 }
 0x20e   :  { %5183 = vmatpush.bf16.msra.mxu2 %v7592_v62 }
 0x20f   :  { %v3731_v27 = vmax.f32 %v3728_v54, 0.0 }
 0x210   :  { %5129 = vmatmul.bf16.vlgmr.msrb.gmra.mxu1 %v1030_v29 }
 0x211   :  { %v3732_v14 = vpack.c.bf16 %v3731_v27, %v3731_v27 }
 0x212   :  { %v3716_v51 = vpop.f32.mrf.mxu3 }
 0x213   :  { %v4837_v26 = vpop.f32.mrf.mxu1  ;;  %3733 = vst [vmem:[#allocation2 + $0x3c] sm:$0xf] %v3732_v14  ;;  %v7620_v14 = vld [vmem:[%s8854_s10] ss:$0 sm:$0xff]  ;;  %s5229_s10 = sld [smem:[#allocation6]] }
 0x21a   :  { %v3741_v63 = vld [vmem:[#allocation2 + $0x38] sm:$0xff] }
 0x21b   :  { %v4848_v35 = vpop.f32.mrf.mxu2  ;;  %v4024_v38 = vunpack.c.l.b16 %v3741_v63  ;;  %v4025_v40 = vunpack.c.h.b16 %v3741_v63 }
 0x21c   :  { %v4849_v37 = vadd.f32 %v4848_v35, %v4836_v34 }
 0x21d   :  { %v4040_v32 = vpack.c.b16 %v4024_v38, %v4024_v38  ;;  %v4041_v41 = vpack.c.b16 %v4025_v40, %v4025_v40 }
 0x21f   :  { %5016 = vmatmul.bf16.vlgmr.msra.gmra.mxu3 %v4040_v32  ;;  %5029 = vmatmul.bf16.vlgmr.msra.gmra.mxu0 %v4041_v41 }
 0x223   :  { %v4850_v42 = vpop.f32.mrf.mxu2 }
 0x225   :  { %v4874_v44 = vpop.f32.mrf.mxu0 }
 0x22a   :  { %v4861_v46 = vpop.f32.mrf.mxu3 }
 0x22b   :  { %v4887_v45 = vpop.f32.mrf.mxu1  ;;  %v4862_v47 = vadd.f32 %v4861_v46, %v4849_v37 }
 0x22d   :  { %v4875_v52 = vadd.f32 %v4874_v44, %v4862_v47  ;;  %v4876_v48 = vpop.f32.mrf.mxu0 }
 0x22f   :  { %v4888_v53 = vadd.f32 %v4887_v45, %v4875_v52 }
 0x232   :  { %v4863_v30 = vpop.f32.mrf.mxu3 }
 0x233   :  { %v4889_v50 = vpop.f32.mrf.mxu1 }
 0x23b   :  { %v4900_v55 = vpop.f32.mrf.mxu2 }
 0x23c   :  { %v4901_v3 = vadd.f32 %v4900_v55, %v4888_v53 }
 0x243   :  { %v4902_v57 = vpop.f32.mrf.mxu2 }
 0x245   :  { %v4926_v58 = vpop.f32.mrf.mxu0 }
 0x24a   :  { %v4913_v61 = vpop.f32.mrf.mxu3 }
 0x24b   :  { %v4939_v59 = vpop.f32.mrf.mxu1  ;;  %v4914_v56 = vadd.f32 %v4913_v61, %v4901_v3 }
 0x24d   :  { %v4927_v24 = vadd.f32 %v4926_v58, %v4914_v56  ;;  %v4928_v60 = vpop.f32.mrf.mxu0 }
 0x24f   :  { %v4940_v21 = vadd.f32 %v4939_v59, %v4927_v24 }
 0x252   :  { %v4915_v49 = vpop.f32.mrf.mxu3 }
 0x253   :  { %v4941_v0 = vpop.f32.mrf.mxu1 }
 0x25b   :  { %v4952_v1 = vpop.f32.mrf.mxu2 }
 0x25c   :  { %v4953_v6 = vadd.f32 %v4952_v1, %v4940_v21 }
 0x263   :  { %v4954_v2 = vpop.f32.mrf.mxu2 }
 0x265   :  { %v4978_v4 = vpop.f32.mrf.mxu0 }
 0x26a   :  { %v4965_v5 = vpop.f32.mrf.mxu3 }
 0x26b   :  { %v4966_v43 = vadd.f32 %v4965_v5, %v4953_v6 }
 0x26d   :  { %v4980_v8 = vpop.f32.mrf.mxu0  ;;  %v4979_v9 = vadd.f32 %v4978_v4, %v4966_v43 }
 0x272   :  { %v4967_v31 = vpop.f32.mrf.mxu3 }
 0x27d   :  { %v4991_v11 = vpop.f32.mrf.mxu1 }
 0x27e   :  { %v4992_v13 = vadd.f32 %v4991_v11, %v4979_v9  ;;  %v5230_v9 = vstv %s5229_s10 }
 0x282   :  { %v5004_v39 = vpop.f32.mrf.mxu2 }
 0x283   :  { %v5005_v15 = vadd.f32 %v5004_v39, %v4992_v13 }
 0x285   :  { %v4993_v17 = vpop.f32.mrf.mxu1 }
 0x28a   :  { %v5006_v19 = vpop.f32.mrf.mxu2 }
 0x28d   :  { %v5130_v16 = vpop.f32.mrf.mxu1 }
 0x28e   :  { %v5131_v20 = vadd.f32 %v7619_v18, %v5130_v16 }
 0x290   :  { %v5134_v36 = vmax.f32 %v5131_v20, 0.0 }
 0x292   :  { %v5135_v22 = vpack.c.bf16 %v5134_v36, %v5134_v36 }
 0x294   :  { %7132 = vmatmul.msk.bf16.vlgmr.msra.gmra.mxu2 %vm5172_vm1, %v5135_v22 }
 0x295   :  { %v5132_v23 = vpop.f32.mrf.mxu1 }
 0x29c   :  { %v5030_v12 = vpop.f32.mrf.mxu0 }
 0x2a2   :  { %v5017_v54 = vpop.f32.mrf.mxu3 }
 0x2a3   :  { %v5018_v25 = vadd.f32 %v5017_v54, %v5005_v15 }
 0x2a4   :  { %v5032_v26 = vpop.f32.mrf.mxu0 }
 0x2a5   :  { %v5031_v27 = vadd.f32 %v5030_v12, %v5018_v25 }
 0x2a7   :  { %v7083_v47 = vmul.f32 -1.442695, %v5031_v27 }
 0x2aa   :  { %v5019_v29 = vpop.f32.mrf.mxu3 }
 0x317   :  { %v5185_v51 = vpop.f32.mrf.mxu2 }
 0x318   :  { %v5186_v33 = vadd.f32 %v7620_v14, %v5185_v51 }
 0x31a   :  { %v5202_v34 = vsel %vm5201_vm2, %v5186_v33, -inf  ;;  %v5190_v35 = vsel %vm5189_vm3, %v5186_v33, -inf }
 0x31b   :  { %5203 = vmax.xlane.f32.xlu0 %v5202_v34  ;;  %5191 = vmax.xlane.f32.xlu1 %v5190_v35 }
 0x31f   :  { %v5187_v37 = vpop.f32.mrf.mxu2 }
 0x38e   :  { %v5204_v63 = vpop.xlane.xlu0 %5203  ;;  %v5192_v38 = vpop.xlane.xlu1 %5191 }
 0x38f   :  { %v5205_v40 = vsub.f32 %v5186_v33, %v5204_v63  ;;  %v5193_v32 = vsub.f32 %v5186_v33, %v5192_v38 }
 0x391   :  { %v5206_v41 = vmul.f32 1.442695, %v5205_v40  ;;  %v5194_v42 = vmul.f32 1.442695, %v5193_v32 }
 0x393   :  { %7621 = vpow2.f32 %v5206_v41 }
 0x394   :  { %7623 = vpow2.f32 %v5194_v42 }
 0x395   :  { %7625 = vpow2.f32 %v7083_v47 }
 0x399   :  { %v7622_v44 = vpop.eup %7621 }
 0x39a   :  { %v7624_v45 = vpop.eup %7623  ;;  %5209 = vrot.lane.b32.xlu0 %v7622_v44, %s7677_s8 }
 0x39b   :  { %v5196_v46 = vsel %vm5189_vm3, %v7624_v45, 0.0  ;;  %v7626_v52 = vpop.eup %7625 }
 0x39c   :  { %5197 = vadd.xlane.f32.xlu2 %v5196_v46  ;;  %v5037_v48 = vadd.f32 1.0, %v7626_v52 }
 0x39e   :  { %7627 = vrcp.f32 %v5037_v48  ;;  %v5049_v59 = vand.u32 2147483648, %v5037_v48  ;;  %vm5043_vm5 = vweird.f32 %v5037_v48  ;;  %v5047_v56 = vand.u32 2147483647, %v5037_v48 }
 0x3a0   :  { %v5050_v21 = vor.u32 1.1754944e-38, %v5049_v59  ;;  %vm5048_vm7 = vcmp.eq.f32.partialorder %v5047_v56, 8.507059e+37 }
 0x3a4   :  { %v7628_v50 = vpop.eup %7627 }
 0x3a5   :  { %v5039_v53 = vmul.f32 %v7628_v50, %v5037_v48  ;;  %vm5044_vm4 = vweird.f32 %v7628_v50 }
 0x3a6   :  { %vm5045_vm6 = vmor %vm5043_vm5, %vm5044_vm4 }
 0x3a7   :  { %v5040_v30 = vsub.f32 1.0, %v5039_v53 }
 0x3a9   :  { %v5041_v57 = vmul.f32 %v7628_v50, %v5040_v30 }
 0x3ab   :  { %v5042_v61 = vadd.f32 %v7628_v50, %v5041_v57 }
 0x3ad   :  { %v5046_v24 = vsel %vm5045_vm6, %v7628_v50, %v5042_v61 }
 0x3ae   :  { %v5051_v0 = vsel %vm5048_vm7, %v5050_v21, %v5046_v24 }
 0x40c   :  { %v5210_v55 = vpop.permute.xlu0 %5209 }
 0x40d   :  { %v5212_v3 = vsel %vm5189_vm3, %v5210_v55, 0.0 }
 0x40e   :  { %5213 = vadd.xlane.f32.xlu1 %v5212_v3 }
 0x40f   :  { %v5198_v58 = vpop.xlane.xlu2 %5197 }
 0x410   :  { %7629 = vrcp.f32 %v5198_v58 }
 0x416   :  { %v7630_v60 = vpop.eup %7629 }
 0x417   :  { %v5200_v49 = vmul.f32 %v7630_v60, %v7624_v45 }
 0x419   :  { %v5217_v1 = vmul.f32 %v5200_v49, %v5051_v0 }
 0x41b   :  { %v5218_v6 = vsel %vm5189_vm3, %v5217_v1, 0.0 }
 0x41c   :  { %5219 = vadd.xlane.f32.xlu1 %v5218_v6 }
 0x481   :  { %v5214_v2 = vpop.xlane.xlu1 %5213 }
 0x482   :  { %7631 = vrcp.f32 %v5214_v2 }
 0x488   :  { %v7632_v4 = vpop.eup %7631 }
 0x489   :  { %v5216_v28 = vmul.f32 %v7632_v4, %v7622_v44 }
 0x48b   :  { %v5221_v5 = vmul.f32 %v5216_v28, %v5051_v0 }
 0x48d   :  { %5223 = vrot.lane.b32.xlu2 %v5221_v5, %s7677_s8 }
 0x48f   :  { %v5220_v8 = vpop.xlane.xlu1 %5219 }
 0x490   :  { %v5231_v62 = vmul.f32 %v5230_v9, %v5220_v8  ;;  %v5236_v13 = vsel %vm548_vm0, %v5051_v0, %v5220_v8 }
 0x4e7   :  { %v5224_v43 = vpop.permute.xlu2 %5223 }
 0x4e8   :  { %v5226_v7 = vsel %vm5189_vm3, %v5224_v43, 0.0 }
 0x4e9   :  { %5227 = vadd.xlane.f32.xlu1 %v5226_v7 }
 0x55c   :  { %v5228_v31 = vpop.xlane.xlu1 %5227 }
 0x55d   :  { %v5234_v11 = vmul.f32 %v5233_v10, %v5228_v31  ;;  %v5238_v15 = vsel %vm5237_vm8, %v5236_v13, %v5228_v31 }
 0x55f   :  { %v5235_v39 = vadd.f32 %v5234_v11, %v5231_v62 }
 0x561   :  { %v5240_v17 = vsel %vm5239_vm9, %v5238_v15, %v5235_v39 }
 0x562   :  { %v5242_v18 = vsel %vm5241_vm10, %v5240_v17, 0.0 }
 0x563   :  { %5243 = vst [vmem:[%s8856_s12] sm:$0xff] %v5242_v18 }
 0x564   :  { %5248 = vsyncpa [#allocation4], 1 }
 0x565   :  { %5249 = vsyncpa [#allocation5], 1 }

</bundles_post_ra>
